<compile_context>
chip_gen: v7x
topology: tpu7x:2x2x1
jax: 0.10.0
libtpu: 0.0.40
codegen_flags: <defaults>
</compile_context>

<pallas_src>
import functools
import math

import jax
import jax.numpy as jnp
import numpy as np
from jax import lax
from jax.experimental import pallas as pl
from jax.experimental.pallas import tpu as pltpu


def temporal_kernel(x_ref, w_ref, b_ref, pool_ref, o_ref, xs_ref, *,
                    num_layers, kernel_size, input_dim, timeframes,
                    block_samples):
    """Processes Bt samples packed as one (F, Bt*T) tile: conv/GLU/residual + pool."""
    F = input_dim
    T = timeframes
    Bt = block_samples
    lanes = Bt * T
    K = kernel_size
    pad = (K - 1) // 2                       # matches PyTorch only for odd K
    sqrt_half = math.sqrt(0.5)

    # bf16 in HBM/VMEM; keep the working state (residual chain) in f32.
    x = x_ref[...].astype(jnp.float32)       # (F, Bt*T)

    # Within-sample time position of every lane; used to zero the conv's 'same'
    # padding region and to stop rolls leaking across sample boundaries.
    # Built once per grid step (cheap: two compares on a (1, lanes) iota).
    col = lax.broadcasted_iota(jnp.int32, (1, lanes), 1) % T
    masks = {}
    for k in range(K):
        d = k - pad
        if d != 0:
            valid = jnp.logical_and(col >= -d, col < T - d)
            masks[d] = valid.astype(jnp.float32)

    residual = x
    for l in range(num_layers):              # static, small
        # Write the K temporally shifted, boundary-masked copies of x directly
        # into the bf16 VMEM scratch (row block k*F..k*F+F matches the fused
        # weight layout) — no jnp.concatenate materialization.
        for k in range(K):
            d = k - pad
            if d == 0:
                tap = x
            else:
                # tap[:, t] = x[:, t + d], zero outside the sample's [0, T) window
                tap = pltpu.roll(x, shift=(-d) % lanes, axis=1) * masks[d]
            xs_ref[pl.ds(k * F, F), :] = tap.astype(jnp.bfloat16)

        # One fused-tap MXU matmul per layer (bf16 x bf16 -> f32 accumulate).
        acc = jnp.dot(w_ref[l], xs_ref[...],
                      preferred_element_type=jnp.float32)          # (2F, lanes)
        acc = acc + b_ref[l]                                        # (2F, 1) bias
        # dropout is identity (eval); GLU over the channel (sublane) axis.
        gated = acc[:F, :] * jax.nn.sigmoid(acc[F:, :])
        x = gated + residual
        residual = x * sqrt_half

    # TODO(synk): torch.rand time-mask is stochastic; with mask_prob=0.0 it is
    # all ones, so it is applied as identity here.

    # Global average pool over T per sample = one matmul against the constant
    # 0/(1/T) segment matrix (loaded once, constant index map). Lane-dense
    # (F, Bt) output block -> unmasked full-width stores.
    o_ref[...] = jnp.dot(x, pool_ref[...], preferred_element_type=jnp.float32)


@functools.partial(jax.jit, static_argnames=("kernel_size", "block_samples"))
def temporal_processing(x, W, b, *, kernel_size, block_samples=128):
    """x: (B, N, T, F); W: (L, K, 2F, F); b: (L, 2F). Returns (B, N, F)."""
    B, N, T, F = x.shape
    L = W.shape[0]
    BN = B * N
    Bt = block_samples
    assert Bt % 128 == 0, "block_samples must be a multiple of 128 (lane-dense output)"

    nblk = -(-BN // Bt)                      # ceil; keep >= 2 (and even) on v7x
    BN_pad = nblk * Bt

    # Channels-first, sample-major/time-minor lane layout: xk[f, s*T+t] = x[s,t,f].
    # Cast to bf16 *before* the relayout so the transpose/pad and the kernel's
    # input DMAs move half the bytes; jit fuses cast+transpose+pad into one
    # producer fusion.
    # TODO(synk): fully removing this HBM round trip would need an in-kernel
    # (Bt*T, F) -> (F, Bt*T) relayout; kept host-side for lowering robustness.
    xb = x.astype(jnp.bfloat16).reshape(BN, T, F)
    xk = jnp.transpose(xb, (2, 0, 1)).reshape(F, BN * T)
    if BN_pad != BN:
        xk = jnp.pad(xk, ((0, 0), (0, (BN_pad - BN) * T)))   # zero samples, discarded

    # Fuse the K conv taps: Wf[l, o, k*F + i] = W[l, k, o, i]  ->  (L, 2F, K*F), bf16.
    Wf = jnp.transpose(W, (0, 2, 1, 3)).reshape(L, 2 * F, kernel_size * F)
    Wf = Wf.astype(jnp.bfloat16)
    b3 = b.reshape(L, 2 * F, 1).astype(jnp.float32)

    # Constant segment-mean matrix pool[n, s] = (n // T == s) / T, built once
    # outside the kernel and fetched into VMEM once (constant index map).
    seg = lax.broadcasted_iota(jnp.int32, (Bt * T, Bt), 0) // T
    smp = lax.broadcasted_iota(jnp.int32, (Bt * T, Bt), 1)
    pool = jnp.where(seg == smp, jnp.float32(1.0 / T), jnp.float32(0.0))

    kernel = functools.partial(
        temporal_kernel, num_layers=L, kernel_size=kernel_size,
        input_dim=F, timeframes=T, block_samples=Bt)

    out = pl.pallas_call(
        kernel,
        out_shape=jax.ShapeDtypeStruct((F, BN_pad), jnp.float32),
        grid_spec=pltpu.PrefetchScalarGridSpec(
            num_scalar_prefetch=0,
            grid=(nblk,),
            in_specs=[
                pl.BlockSpec((F, Bt * T), lambda i: (0, i)),     # Bt samples / step
                pl.BlockSpec(Wf.shape, lambda i: (0, 0, 0)),     # fused weights (once)
                pl.BlockSpec(b3.shape, lambda i: (0, 0, 0)),     # biases (once)
                pl.BlockSpec(pool.shape, lambda i: (0, 0)),      # pool matrix (once)
            ],
            out_specs=pl.BlockSpec((F, Bt), lambda i: (0, i)),   # lane-dense output
            scratch_shapes=[
                pltpu.VMEM((kernel_size * F, Bt * T), jnp.bfloat16),  # shifted-tap stack
            ],
        ),
        compiler_params=pltpu.CompilerParams(
            dimension_semantics=("parallel",),
            vmem_limit_bytes=32 * 1024 * 1024),
    )(xk, Wf, b3, pool)

    y = out[:, :BN].T                        # tiny (F, BN) transpose, inside the jit
    return y.reshape(B, N, F)


def reference_forward(x, W, b, *, kernel_size):
    """Pure-JAX reference mirroring the PyTorch module (eval mode)."""
    B, N, T, F = x.shape
    L = W.shape[0]
    pad = (kernel_size - 1) // 2
    xc = jnp.transpose(x.reshape(B * N, T, F), (0, 2, 1))        # (BN, F, T)
    residual = xc
    for l in range(L):
        w_oih = jnp.transpose(W[l], (1, 2, 0))                    # (2F, F, K)
        conv = lax.conv_general_dilated(
            xc, w_oih, window_strides=(1,), padding=[(pad, pad)],
            dimension_numbers=("NCH", "OIH", "NCH"),
            precision=lax.Precision.HIGHEST)
        conv = conv + b[l][None, :, None]
        H = conv.shape[1]
        gated = conv[:, : H // 2] * jax.nn.sigmoid(conv[:, H // 2:])
        xc = gated + residual
        residual = xc * jnp.sqrt(jnp.float32(0.5))
    y = jnp.mean(xc, axis=2)                                      # (BN, F)
    return y.reshape(B, N, F)


if __name__ == "__main__":
    # Module config: hidden_dim must be 2 * input_dim for the GLU residual to typecheck.
    # B*N = 240 -> 2 grid blocks of Bt=128 (even nblk for v7x's two TensorCores)
    # and exercises the zero-padded-sample path (240 -> 256).
    B, N, T = 3, 80, 16
    INPUT_DIM = 16
    HIDDEN_DIM = 2 * INPUT_DIM
    KERNEL_SIZE = 3
    NUM_LAYERS = 2

    key = jax.random.PRNGKey(0)
    kx, kw, kb = jax.random.split(key, 3)
    x = jax.random.normal(kx, (B, N, T, INPUT_DIM), jnp.float32)
    # Deterministic synthetic Conv1d params, stored as (L, K, out=2F, in=F).
    W = 0.1 * jax.random.normal(kw, (NUM_LAYERS, KERNEL_SIZE, HIDDEN_DIM, INPUT_DIM),
                                jnp.float32)
    b = 0.1 * jax.random.normal(kb, (NUM_LAYERS, HIDDEN_DIM), jnp.float32)

    y = temporal_processing(x, W, b, kernel_size=KERNEL_SIZE)
    y = jax.block_until_ready(y)

    y_ref = reference_forward(x, W, b, kernel_size=KERNEL_SIZE)
    # Conv operands are stored/fed in bf16 (f32 accumulation, f32 residual chain)
    # vs the f32 HIGHEST reference; 1e-2 is the standard bf16-matmul tolerance.
    np.testing.assert_allclose(np.asarray(y), np.asarray(y_ref), rtol=1e-2, atol=1e-2)
    assert y.shape == (B, N, INPUT_DIM)

    print("KERNEL_OK")
</pallas_src>

<mosaic_0001>
module attributes {stable_mosaic.version = 11 : i64} {
  func.func @temporal_kernel(%arg0: i32, %arg1: memref<16x2048xbf16, #tpu.memory_space<vmem>>, %arg2: memref<2x32x48xbf16, #tpu.memory_space<vmem>>, %arg3: memref<2x32x1xf32, #tpu.memory_space<vmem>>, %arg4: memref<2048x128xf32, #tpu.memory_space<vmem>>, %arg5: memref<16x128xf32, #tpu.memory_space<vmem>>, %arg6: memref<48x2048xbf16, #tpu.memory_space<vmem>>) attributes {dimension_semantics = [#tpu.dimension_semantics<parallel>], iteration_bounds = array<i64: 2>, scalar_prefetch = 0 : i64, scratch_operands = 1 : i64, tpu.core_type = #tpu.core_type<tc>, window_params = [{transform_indices = @transform_0, window_bounds = array<i64: 16, 2048>}, {pipeline_mode = #tpu.pipeline_mode<synchronous>, transform_indices = @transform_1, window_bounds = array<i64: 2, 32, 48>}, {pipeline_mode = #tpu.pipeline_mode<synchronous>, transform_indices = @transform_2, window_bounds = array<i64: 2, 32, 1>}, {pipeline_mode = #tpu.pipeline_mode<synchronous>, transform_indices = @transform_3, window_bounds = array<i64: 2048, 128>}, {transform_indices = @transform_4, window_bounds = array<i64: 16, 128>}]} {
    %c0 = arith.constant 0 : index
    %c0_0 = arith.constant 0 : index
    %0 = vector.load %arg1[%c0, %c0_0] : memref<16x2048xbf16, #tpu.memory_space<vmem>>, vector<16x2048xbf16>
    %1 = arith.extf %0 : vector<16x2048xbf16> to vector<16x2048xf32>
    %2 = tpu.iota {dimensions = array<i32: 1>} : vector<1x2048xi32>
    %c16_i32 = arith.constant 16 : i32
    %c0_i32 = arith.constant 0 : i32
    %3 = arith.cmpi eq, %c16_i32, %c0_i32 : i32
    %c1_i32 = arith.constant 1 : i32
    %4 = arith.select %3, %c1_i32, %c16_i32 : i32
    %5 = vector.broadcast %4 : i32 to vector<1x2048xi32>
    %6 = arith.remsi %2, %5 : vector<1x2048xi32>
    %c0_i32_1 = arith.constant 0 : i32
    %7 = vector.broadcast %c0_i32_1 : i32 to vector<1x2048xi32>
    %8 = arith.cmpi ne, %6, %7 : vector<1x2048xi32>
    %c0_i32_2 = arith.constant 0 : i32
    %9 = vector.broadcast %c0_i32_2 : i32 to vector<1x2048xi32>
    %10 = arith.cmpi slt, %6, %9 : vector<1x2048xi32>
    %c0_i32_3 = arith.constant 0 : i32
    %11 = arith.cmpi slt, %4, %c0_i32_3 : i32
    %12 = vector.broadcast %11 : i1 to vector<1x2048xi1>
    %13 = vector.broadcast %12 : vector<1x2048xi1> to vector<1x2048xi1>
    %14 = arith.xori %10, %13 : vector<1x2048xi1>
    %15 = arith.andi %14, %8 : vector<1x2048xi1>
    %16 = vector.broadcast %4 : i32 to vector<1x2048xi32>
    %17 = arith.addi %6, %16 : vector<1x2048xi32>
    %18 = arith.select %15, %17, %6 : vector<1x2048xi1>, vector<1x2048xi32>
    %c1_i32_4 = arith.constant 1 : i32
    %19 = vector.broadcast %c1_i32_4 : i32 to vector<1x2048xi32>
    %20 = arith.cmpi sge, %18, %19 : vector<1x2048xi32>
    %c17_i32 = arith.constant 17 : i32
    %21 = vector.broadcast %c17_i32 : i32 to vector<1x2048xi32>
    %22 = arith.cmpi slt, %18, %21 : vector<1x2048xi32>
    %23 = arith.andi %20, %22 : vector<1x2048xi1>
    %24 = arith.extui %23 : vector<1x2048xi1> to vector<1x2048xi32>
    %25 = arith.sitofp %24 : vector<1x2048xi32> to vector<1x2048xf32>
    %c-1_i32 = arith.constant -1 : i32
    %26 = vector.broadcast %c-1_i32 : i32 to vector<1x2048xi32>
    %27 = arith.cmpi sge, %18, %26 : vector<1x2048xi32>
    %c15_i32 = arith.constant 15 : i32
    %28 = vector.broadcast %c15_i32 : i32 to vector<1x2048xi32>
    %29 = arith.cmpi slt, %18, %28 : vector<1x2048xi32>
    %30 = arith.andi %27, %29 : vector<1x2048xi1>
    %31 = arith.extui %30 : vector<1x2048xi1> to vector<1x2048xi32>
    %32 = arith.sitofp %31 : vector<1x2048xi32> to vector<1x2048xf32>
    %c1_i32_5 = arith.constant 1 : i32
    %33 = tpu.dynamic_rotate %1 by %c1_i32_5 dim 1 : vector<16x2048xf32>, i32 -> vector<16x2048xf32>
    %34 = vector.broadcast %25 : vector<1x2048xf32> to vector<16x2048xf32>
    %35 = arith.mulf %33, %34 : vector<16x2048xf32>
    %36 = arith.truncf %35 : vector<16x2048xf32> to vector<16x2048xbf16>
    %c0_6 = arith.constant 0 : index
    %c0_7 = arith.constant 0 : index
    %37 = vector.load %arg6[%c0_6, %c0_7] : memref<48x2048xbf16, #tpu.memory_space<vmem>>, vector<16x2048xbf16>
    tpu.vector_store %arg6[%c0_6, %c0_7], %36 {strides = array<i32>} : memref<48x2048xbf16, #tpu.memory_space<vmem>>, vector<16x2048xbf16>,
    %38 = arith.truncf %1 : vector<16x2048xf32> to vector<16x2048xbf16>
    %c16 = arith.constant 16 : index
    %c0_8 = arith.constant 0 : index
    %39 = vector.load %arg6[%c16, %c0_8] : memref<48x2048xbf16, #tpu.memory_space<vmem>>, vector<16x2048xbf16>
    tpu.vector_store %arg6[%c16, %c0_8], %38 {strides = array<i32>} : memref<48x2048xbf16, #tpu.memory_space<vmem>>, vector<16x2048xbf16>,
    %c2047_i32 = arith.constant 2047 : i32
    %40 = tpu.dynamic_rotate %1 by %c2047_i32 dim 1 : vector<16x2048xf32>, i32 -> vector<16x2048xf32>
    %41 = vector.broadcast %32 : vector<1x2048xf32> to vector<16x2048xf32>
    %42 = arith.mulf %40, %41 : vector<16x2048xf32>
    %43 = arith.truncf %42 : vector<16x2048xf32> to vector<16x2048xbf16>
    %c32 = arith.constant 32 : index
    %c0_9 = arith.constant 0 : index
    %44 = vector.load %arg6[%c32, %c0_9] : memref<48x2048xbf16, #tpu.memory_space<vmem>>, vector<16x2048xbf16>
    tpu.vector_store %arg6[%c32, %c0_9], %43 {strides = array<i32>} : memref<48x2048xbf16, #tpu.memory_space<vmem>>, vector<16x2048xbf16>,
    %c0_10 = arith.constant 0 : index
    %c0_11 = arith.constant 0 : index
    %c0_12 = arith.constant 0 : index
    %45 = vector.load %arg2[%c0_10, %c0_11, %c0_12] : memref<2x32x48xbf16, #tpu.memory_space<vmem>>, vector<1x32x48xbf16>
    %46 = vector.shape_cast %45 : vector<1x32x48xbf16> to vector<32x48xbf16>
    %c0_13 = arith.constant 0 : index
    %c0_14 = arith.constant 0 : index
    %47 = vector.load %arg6[%c0_13, %c0_14] : memref<48x2048xbf16, #tpu.memory_space<vmem>>, vector<48x2048xbf16>
    %cst = arith.constant dense<0.000000e+00> : vector<32x2048xf32>
    %48 = tpu.matmul %46, %47, %cst {dimension_numbers = #tpu.dot_dimension_numbers<[1], [0], [0], [1], [0, 0, 1, 1], [], []>} : vector<32x48xbf16>, vector<48x2048xbf16>, vector<32x2048xf32> -> vector<32x2048xf32>
    %c0_15 = arith.constant 0 : index
    %c0_16 = arith.constant 0 : index
    %c0_17 = arith.constant 0 : index
    %49 = vector.load %arg3[%c0_15, %c0_16, %c0_17] : memref<2x32x1xf32, #tpu.memory_space<vmem>>, vector<1x32x1xf32>
    %50 = vector.shape_cast %49 : vector<1x32x1xf32> to vector<32x1xf32>
    %51 = vector.broadcast %50 : vector<32x1xf32> to vector<32x2048xf32>
    %52 = arith.addf %48, %51 : vector<32x2048xf32>
    %53 = vector.extract_strided_slice %52 {offsets = [0, 0], sizes = [16, 2048], strides = [1, 1]} : vector<32x2048xf32> to vector<16x2048xf32>
    %54 = vector.extract_strided_slice %52 {offsets = [16, 0], sizes = [16, 2048], strides = [1, 1]} : vector<32x2048xf32> to vector<16x2048xf32>
    %55 = arith.negf %54 : vector<16x2048xf32>
    %56 = math.exp %55 : vector<16x2048xf32>
    %cst_18 = arith.constant 1.000000e+00 : f32
    %57 = vector.broadcast %cst_18 : f32 to vector<16x2048xf32>
    %58 = arith.addf %57, %56 : vector<16x2048xf32>
    %59 = arith.divf %57, %58 : vector<16x2048xf32>
    %60 = arith.mulf %53, %59 : vector<16x2048xf32>
    %61 = arith.addf %60, %1 : vector<16x2048xf32>
    %cst_19 = arith.constant 0.707106769 : f32
    %62 = vector.broadcast %cst_19 : f32 to vector<16x2048xf32>
    %63 = arith.mulf %61, %62 : vector<16x2048xf32>
    %c1_i32_20 = arith.constant 1 : i32
    %64 = tpu.dynamic_rotate %61 by %c1_i32_20 dim 1 : vector<16x2048xf32>, i32 -> vector<16x2048xf32>
    %65 = vector.broadcast %25 : vector<1x2048xf32> to vector<16x2048xf32>
    %66 = arith.mulf %64, %65 : vector<16x2048xf32>
    %67 = arith.truncf %66 : vector<16x2048xf32> to vector<16x2048xbf16>
    %c0_21 = arith.constant 0 : index
    %c0_22 = arith.constant 0 : index
    %68 = vector.load %arg6[%c0_21, %c0_22] : memref<48x2048xbf16, #tpu.memory_space<vmem>>, vector<16x2048xbf16>
    tpu.vector_store %arg6[%c0_21, %c0_22], %67 {strides = array<i32>} : memref<48x2048xbf16, #tpu.memory_space<vmem>>, vector<16x2048xbf16>,
    %69 = arith.truncf %61 : vector<16x2048xf32> to vector<16x2048xbf16>
    %c16_23 = arith.constant 16 : index
    %c0_24 = arith.constant 0 : index
    %70 = vector.load %arg6[%c16_23, %c0_24] : memref<48x2048xbf16, #tpu.memory_space<vmem>>, vector<16x2048xbf16>
    tpu.vector_store %arg6[%c16_23, %c0_24], %69 {strides = array<i32>} : memref<48x2048xbf16, #tpu.memory_space<vmem>>, vector<16x2048xbf16>,
    %c2047_i32_25 = arith.constant 2047 : i32
    %71 = tpu.dynamic_rotate %61 by %c2047_i32_25 dim 1 : vector<16x2048xf32>, i32 -> vector<16x2048xf32>
    %72 = vector.broadcast %32 : vector<1x2048xf32> to vector<16x2048xf32>
    %73 = arith.mulf %71, %72 : vector<16x2048xf32>
    %74 = arith.truncf %73 : vector<16x2048xf32> to vector<16x2048xbf16>
    %c32_26 = arith.constant 32 : index
    %c0_27 = arith.constant 0 : index
    %75 = vector.load %arg6[%c32_26, %c0_27] : memref<48x2048xbf16, #tpu.memory_space<vmem>>, vector<16x2048xbf16>
    tpu.vector_store %arg6[%c32_26, %c0_27], %74 {strides = array<i32>} : memref<48x2048xbf16, #tpu.memory_space<vmem>>, vector<16x2048xbf16>,
    %c1 = arith.constant 1 : index
    %c0_28 = arith.constant 0 : index
    %c0_29 = arith.constant 0 : index
    %76 = vector.load %arg2[%c1, %c0_28, %c0_29] : memref<2x32x48xbf16, #tpu.memory_space<vmem>>, vector<1x32x48xbf16>
    %77 = vector.shape_cast %76 : vector<1x32x48xbf16> to vector<32x48xbf16>
    %c0_30 = arith.constant 0 : index
    %c0_31 = arith.constant 0 : index
    %78 = vector.load %arg6[%c0_30, %c0_31] : memref<48x2048xbf16, #tpu.memory_space<vmem>>, vector<48x2048xbf16>
    %cst_32 = arith.constant dense<0.000000e+00> : vector<32x2048xf32>
    %79 = tpu.matmul %77, %78, %cst_32 {dimension_numbers = #tpu.dot_dimension_numbers<[1], [0], [0], [1], [0, 0, 1, 1], [], []>} : vector<32x48xbf16>, vector<48x2048xbf16>, vector<32x2048xf32> -> vector<32x2048xf32>
    %c1_33 = arith.constant 1 : index
    %c0_34 = arith.constant 0 : index
    %c0_35 = arith.constant 0 : index
    %80 = vector.load %arg3[%c1_33, %c0_34, %c0_35] : memref<2x32x1xf32, #tpu.memory_space<vmem>>, vector<1x32x1xf32>
    %81 = vector.shape_cast %80 : vector<1x32x1xf32> to vector<32x1xf32>
    %82 = vector.broadcast %81 : vector<32x1xf32> to vector<32x2048xf32>
    %83 = arith.addf %79, %82 : vector<32x2048xf32>
    %84 = vector.extract_strided_slice %83 {offsets = [0, 0], sizes = [16, 2048], strides = [1, 1]} : vector<32x2048xf32> to vector<16x2048xf32>
    %85 = vector.extract_strided_slice %83 {offsets = [16, 0], sizes = [16, 2048], strides = [1, 1]} : vector<32x2048xf32> to vector<16x2048xf32>
    %86 = arith.negf %85 : vector<16x2048xf32>
    %87 = math.exp %86 : vector<16x2048xf32>
    %cst_36 = arith.constant 1.000000e+00 : f32
    %88 = vector.broadcast %cst_36 : f32 to vector<16x2048xf32>
    %89 = arith.addf %88, %87 : vector<16x2048xf32>
    %90 = arith.divf %88, %89 : vector<16x2048xf32>
    %91 = arith.mulf %84, %90 : vector<16x2048xf32>
    %92 = arith.addf %91, %63 : vector<16x2048xf32>
    %c0_37 = arith.constant 0 : index
    %c0_38 = arith.constant 0 : index
    %93 = vector.load %arg4[%c0_37, %c0_38] : memref<2048x128xf32, #tpu.memory_space<vmem>>, vector<2048x128xf32>
    %cst_39 = arith.constant dense<0.000000e+00> : vector<16x128xf32>
    %94 = tpu.matmul %92, %93, %cst_39 {dimension_numbers = #tpu.dot_dimension_numbers<[1], [0], [0], [1], [0, 0, 1, 1], [], []>} : vector<16x2048xf32>, vector<2048x128xf32>, vector<16x128xf32> -> vector<16x128xf32>
    %c0_40 = arith.constant 0 : index
    %c0_41 = arith.constant 0 : index
    %95 = vector.load %arg5[%c0_40, %c0_41] : memref<16x128xf32, #tpu.memory_space<vmem>>, vector<16x128xf32>
    tpu.vector_store %arg5[%c0_40, %c0_41], %94 {strides = array<i32>} : memref<16x128xf32, #tpu.memory_space<vmem>>, vector<16x128xf32>,
    return
  }
  func.func @transform_0(%arg0: i32) -> (i32, i32) {
    %c0_i32 = arith.constant 0 : i32
    %c0_i32_0 = arith.constant 0 : i32
    return %c0_i32, %arg0 : i32, i32
  }
  func.func @transform_1(%arg0: i32) -> (i32, i32, i32) {
    %c0_i32 = arith.constant 0 : i32
    %c0_i32_0 = arith.constant 0 : i32
    %c0_i32_1 = arith.constant 0 : i32
    %c0_i32_2 = arith.constant 0 : i32
    return %c0_i32, %c0_i32_0, %c0_i32_1 : i32, i32, i32
  }
  func.func @transform_2(%arg0: i32) -> (i32, i32, i32) {
    %c0_i32 = arith.constant 0 : i32
    %c0_i32_0 = arith.constant 0 : i32
    %c0_i32_1 = arith.constant 0 : i32
    %c0_i32_2 = arith.constant 0 : i32
    return %c0_i32, %c0_i32_0, %c0_i32_1 : i32, i32, i32
  }
  func.func @transform_3(%arg0: i32) -> (i32, i32) {
    %c0_i32 = arith.constant 0 : i32
    %c0_i32_0 = arith.constant 0 : i32
    %c0_i32_1 = arith.constant 0 : i32
    return %c0_i32, %c0_i32_0 : i32, i32
  }
  func.func @transform_4(%arg0: i32) -> (i32, i32) {
    %c0_i32 = arith.constant 0 : i32
    %c0_i32_0 = arith.constant 0 : i32
    return %c0_i32, %arg0 : i32, i32
  }
}

</mosaic_0001>

<bundles_post_ra>
// kernel: temporal_processing.1
= control target key start
LH: loop header
LB: loop body
LE: loop exit
PB: predicated region body
PF: predicated region fallthrough
CT: control target
= control target key end

     0   :  { %s5203_s15 = smov 0   ;;  %s5205_s16 = smov 0   ;;  %s8224_s0 = inlined_call_operand.vmem [shape: bf16[16,4096], index: 0, kind: input, shape index: {}]   ;;  %s8225_s1 = inlined_call_operand.vmem [shape: bf16[2,32,48], index: 1, kind: input, shape index: {}]   ;;  %s8226_s2 = inlined_call_operand.vmem [shape: f32[2,32,1], index: 2, kind: input, shape index: {}]   ;;  %s8227_s3 = inlined_call_operand.vmem [shape: f32[2048,128], index: 3, kind: input, shape index: {}]   ;;  %s8228_s4 = inlined_call_operand.vmem [shape: f32[16,256], index: 4, kind: output, shape index: {}]  }
   0x1   :  { %s5207_s17 = smov 0  }
   0x2 LB: > { %s3969_s18 = sadd.s32 4294967295, %s5172_s17   ;;  %s5220_s19 = sadd.s32 1, %s5172_s17   ;;  %s5172_s17 = sphi %s5207_s17, %s8600_s17   ;;  %s5168_s16 = sphi %s5205_s16, %s8599_s16   ;;  %s5164_s15 = sphi %s5203_s15, %s8598_s15  }
   0x3   : > { %s18_s20 = ssub.s32 %s5172_s17, %s5220_s19  ;;  %s21_s21 = sadd.s32 1, %s5168_s16 }
   0x4   : > { %p19_p0 = scmp.eq.s32.totalorder %s18_s20, 0  ;;  %p28_p1 = scmp.ne.s32.totalorder %s5168_s16, %s5164_s15 }
   0x5   : > { %p29_p2 = scmp.eq.s32.totalorder %s5172_s17, 0  ;;  %p121_p3 = scmp.eq.s32.totalorder %s3969_s18, 1 }
   0x6   : > { %s5231_s22 = scalar_select %p19_p0, %s5168_s16, %s21_s21  }
   0x7   : > { %p30_p4 = por %p29_p2, %p28_p1  ;;  %p5233_p5 = por %p121_p3, %p28_p1 }
   0x8   : > { %p3972_p6 = scmp.ge.s32.totalorder %s5172_s17, 2 }
   0xa   : > { %152 = sbr.rel (%p3972_p6) target bundleno = 29 (0x1d), region = 28 }
  0x11   : > { %155 = sbr.rel (!%p30_p4) target bundleno = 29 (0x1d), region = 32  ;;  %s157_s24 = sand.u32 (%p30_p4), 1, %s5168_s16  }
  0x12   : > { %s4139_s25 = sshll.u32 (%p30_p4), %s5172_s17, 6  ;;  %s3973_s26 = sshll.u32 (%p30_p4), %s157_s24, 7 }
  0x13   : > { %s5243_s29 = scalar_lea.vmem (%p30_p4), %s8224_s0, %s4139_s25  ;;  %s159_s30 = scalar_lea.vmem (%p30_p4), [#allocation3], %s3973_s26 }
  0x14   : > { %v175_v0 = vld [vmem:[%s5243_s29] sm:$0xff] (%p30_p4)  ;;  %v177_v1 = vld [vmem:[%s5243_s29 + $0x8] sm:$0xff] (%p30_p4)  ;;  %v179_v2 = vld [vmem:[%s5243_s29 + $0x10] sm:$0xff] (%p30_p4) }
  0x15   : > { %176 = vst [vmem:[%s159_s30] sm:$0xff] (%p30_p4), %v175_v0  ;;  %178 = vst [vmem:[%s159_s30 + $0x8] sm:$0xff] (%p30_p4), %v177_v1  ;;  %v181_v3 = vld [vmem:[%s5243_s29 + $0x18] sm:$0xff] (%p30_p4)  ;;  %v183_v4 = vld [vmem:[%s5243_s29 + $0x20] sm:$0xff] (%p30_p4) }
  0x16   : > { %180 = vst [vmem:[%s159_s30 + $0x10] sm:$0xff] (%p30_p4), %v179_v2  ;;  %v185_v5 = vld [vmem:[%s5243_s29 + $0x28] sm:$0xff] (%p30_p4)  ;;  %182 = vst [vmem:[%s159_s30 + $0x18] sm:$0xff] (%p30_p4), %v181_v3  ;;  %v187_v6 = vld [vmem:[%s5243_s29 + $0x30] sm:$0xff] (%p30_p4) }
  0x17   : > { %184 = vst [vmem:[%s159_s30 + $0x20] sm:$0xff] (%p30_p4), %v183_v4  ;;  %186 = vst [vmem:[%s159_s30 + $0x28] sm:$0xff] (%p30_p4), %v185_v5  ;;  %v189_v7 = vld [vmem:[%s5243_s29 + $0x38] sm:$0xff] (%p30_p4)  ;;  %v191_v8 = vld [vmem:[%s5243_s29 + $0x80] sm:$0xff] (%p30_p4) }
  0x18   : > { %188 = vst [vmem:[%s159_s30 + $0x30] sm:$0xff] %v187_v6  ;;  %190 = vst [vmem:[%s159_s30 + $0x38] sm:$0xff] %v189_v7  ;;  %v193_v9 = vld [vmem:[%s5243_s29 + $0x88] sm:$0xff]  ;;  %v195_v10 = vld [vmem:[%s5243_s29 + $0x90] sm:$0xff] }
  0x19   : > { %192 = vst [vmem:[%s159_s30 + $0x40] sm:$0xff] %v191_v8  ;;  %v197_v11 = vld [vmem:[%s5243_s29 + $0x98] sm:$0xff]  ;;  %194 = vst [vmem:[%s159_s30 + $0x48] sm:$0xff] %v193_v9  ;;  %v199_v12 = vld [vmem:[%s5243_s29 + $0xa0] sm:$0xff] }
  0x1a   : > { %196 = vst [vmem:[%s159_s30 + $0x50] sm:$0xff] %v195_v10  ;;  %198 = vst [vmem:[%s159_s30 + $0x58] sm:$0xff] %v197_v11  ;;  %v201_v13 = vld [vmem:[%s5243_s29 + $0xa8] sm:$0xff]  ;;  %v203_v14 = vld [vmem:[%s5243_s29 + $0xb0] sm:$0xff] }
  0x1b   : > { %200 = vst [vmem:[%s159_s30 + $0x60] sm:$0xff] %v199_v12  ;;  %202 = vst [vmem:[%s159_s30 + $0x68] sm:$0xff] %v201_v13  ;;  %v205_v15 = vld [vmem:[%s5243_s29 + $0xb8] sm:$0xff] }
  0x1c   : > { %204 = vst [vmem:[%s159_s30 + $0x70] sm:$0xff] %v203_v14  ;;  %206 = vst [vmem:[%s159_s30 + $0x78] sm:$0xff] %v205_v15 }
  0x1d PF: > { %p3976_p7 = scmp.ge.s32.totalorder %s5172_s17, 1  ;;  %p211_p8 = scmp.lt.s32.totalorder %s5172_s17, 3 }
  0x1f   : > { %p212_p9 = pnand %p3976_p7, %p211_p8 }
  0x21   : > { %215 = sbr.rel (%p212_p9) target bundleno = 1226 (0x4ca), region = 55 }
  0x28   : > { %s218_s5 = sand.u32 1, %s5164_s15   ;;  %s5174_s8 = smov 1   ;;  %v8280_v53 = vmov 0   ;;  %v5695_v60 = vld [vmem:[%s8225_s1] sm:$0xff]  }
  0x29   : > { %s3977_s6 = sshll.u32 %s218_s5, 7  ;;  %s5175_s9 = smov 127   ;;  %1257 = vmatprep.mubr.bf16.mxu1 %v8280_v53  ;;  %1204 = vmatprep.mubr.bf16.mxu0 %v8280_v53 }
  0x2a   : > { %s5266_s7 = scalar_lea.vmem [#allocation3], %s3977_s6  ;;  %4889 = vset.pattern.permute.xlu1 %v8280_v53  ;;  %4888 = vset.pattern.permute.xlu0 %v8280_v53  ;;  %s3978_s6 = sshll.u32 %s218_s5, 4 }
  0x2b   : > { %v5269_v16 = vld [vmem:[%s5266_s7 + $0x8] sm:$0xff]  ;;  %v5275_v18 = vld [vmem:[%s5266_s7] sm:$0xff]  ;;  %v5287_v26 = vld [vmem:[%s5266_s7 + $0x10] sm:$0xff] }
  0x2c   : > { %8373 = vst [vmem:[#allocation5_spill] sm:$0xff] %v5269_v16  ;;  %v5272_v17 = vld [vmem:[%s5266_s7 + $0x48] sm:$0xff]  ;;  %v8260_v19 = vunpack.c.l.bf16 %v5269_v16  ;;  %v5280_v21 = vld [vmem:[%s5266_s7 + $0x40] sm:$0xff]  ;;  %v8255_v22 = vunpack.c.h.bf16 %v5275_v18  ;;  %v8254_v23 = vunpack.c.h.bf16 %v5269_v16  ;;  %v5290_v27 = vld [vmem:[%s5266_s7 + $0x50] sm:$0xff]  ;;  %v8250_v31 = vunpack.c.l.bf16 %v5287_v26 }
  0x2d   : > { %8374 = vst [vmem:[#allocation6_spill] sm:$0xff] %v5272_v17  ;;  %v8259_v20 = vunpack.c.l.bf16 %v5272_v17  ;;  %v8256_v24 = vunpack.c.h.bf16 %v5280_v21  ;;  %v8253_v25 = vunpack.c.h.bf16 %v5272_v17  ;;  %v8251_v32 = vunpack.c.l.bf16 %v5290_v27  ;;  %v5312_v33 = vld [vmem:[%s5266_s7 + $0x18] sm:$0xff]  ;;  %v5343_v44 = vld [vmem:[%s5266_s7 + $0x20] sm:$0xff]  ;;  %v5359_v49 = vld [vmem:[%s5266_s7 + $0x28] sm:$0xff] }
  0x2e   : > { %8375 = vst [vmem:[#allocation7_spill] sm:$0xff] %v5312_v33  ;;  %v5315_v34 = vld [vmem:[%s5266_s7 + $0x58] sm:$0xff]  ;;  %v8242_v36 = vunpack.c.l.bf16 %v5312_v33  ;;  %v8240_v38 = vunpack.c.h.bf16 %v5312_v33  ;;  %v8249_v41 = vunpack.c.h.bf16 %v5287_v26  ;;  %v8248_v42 = vunpack.c.h.bf16 %v5290_v27  ;;  %v5346_v45 = vld [vmem:[%s5266_s7 + $0x60] sm:$0xff]  ;;  %v5362_v50 = vld [vmem:[%s5266_s7 + $0x68] sm:$0xff] }
  0x2f   : > { %v4728_v28 = vpack.i.bf16 %v8259_v20, %v8260_v19  ;;  %v5300_v29 = vpack.i.bf16 %v8256_v24, %v8255_v22  ;;  %v4733_v30 = vpack.i.bf16 %v8253_v25, %v8254_v23  ;;  %8376 = vst [vmem:[#allocation8_spill] sm:$0xff] %v5315_v34  ;;  %v5322_v35 = vpack.i.bf16 %v8251_v32, %v8250_v31  ;;  %v5403_v1 = vld [vmem:[%s5266_s7 + $0x30] sm:$0xff]  ;;  %v5419_v6 = vld [vmem:[%s5266_s7 + $0x38] sm:$0xff] }
  0x30   : > { %v8241_v37 = vunpack.c.l.bf16 %v5315_v34  ;;  %v8233_v39 = vunpack.c.h.bf16 %v5315_v34  ;;  %v5353_v46 = vpack.i.bf16 %v8248_v42, %v8249_v41  ;;  %v8246_v47 = vunpack.c.l.bf16 %v5343_v44  ;;  %8377 = vst [vmem:[#allocation9_spill] sm:$0xff] %v5403_v1  ;;  %v5406_v2 = vld [vmem:[%s5266_s7 + $0x70] sm:$0xff]  ;;  %v5422_v7 = vld [vmem:[%s5266_s7 + $0x78] sm:$0xff]  ;;  %s241_s7 = scalar_lea.vmem [#allocation4], %s3978_s6 }
  0x31   : > { %4729 = vrot.lane.b32.xlu0 %v4728_v28, %s5174_s8  ;;  %4739 = vrot.lane.b32.xlu1 %v5300_v29, %s5174_s8  ;;  %v8245_v48 = vunpack.c.l.bf16 %v5346_v45  ;;  %v4014_v51 = vcombine.high %v5269_v16, %v5272_v17  ;;  %v4013_v52 = vcombine.low %v5269_v16, %v5272_v17  ;;  %v8232_v56 = vunpack.c.l.bf16 %v5359_v49 }
  0x32   : > { %v4758_v40 = vpack.i.bf16 %v8241_v37, %v8242_v36  ;;  %v4763_v43 = vpack.i.bf16 %v8233_v39, %v8240_v38  ;;  %v8231_v57 = vunpack.c.l.bf16 %v5362_v50  ;;  %v8230_v58 = vunpack.c.h.bf16 %v5359_v49 }
  0x33   : > { %v5378_v55 = vpack.i.bf16 %v8245_v48, %v8246_v47  ;;  %v8229_v59 = vunpack.c.h.bf16 %v5362_v50  ;;  %v8244_v62 = vunpack.c.h.bf16 %v5343_v44  ;;  %v8243_v63 = vunpack.c.h.bf16 %v5346_v45 }
  0x34   : > { %v4788_v61 = vpack.i.bf16 %v8231_v57, %v8232_v56  ;;  %v8235_v4 = vunpack.c.l.bf16 %v5403_v1  ;;  %v8234_v5 = vunpack.c.l.bf16 %v5406_v2  ;;  %v8258_v9 = vunpack.c.l.bf16 %v5275_v18 }
  0x35   : > { %4734 = vrot.lane.b32.xlu0 %v4733_v30, %s5174_s8  ;;  %4744 = vrot.lane.b32.xlu1 %v4733_v30, %s5175_s9  ;;  %v4793_v0 = vpack.i.bf16 %v8229_v59, %v8230_v58  ;;  %v5413_v3 = vpack.i.bf16 %v8243_v63, %v8244_v62  ;;  %v8257_v10 = vunpack.c.l.bf16 %v5280_v21  ;;  %v8252_v12 = vunpack.c.h.bf16 %v5419_v6 }
  0x36   : > { %v4808_v8 = vpack.i.bf16 %v8234_v5, %v8235_v4  ;;  %v8247_v13 = vunpack.c.h.bf16 %v5422_v7  ;;  %v8237_v30 = vunpack.c.l.bf16 %v5422_v7  ;;  %v292_v57 = vlaneseq }
  0x37   : > { %v4818_v15 = vpack.i.bf16 %v8257_v10, %v8258_v9 }
  0x38   : > { %v5467_v39 = vand.u32 127, %v292_v57 }
  0x39   : > { %4749 = vrot.lane.b32.xlu0 %v5322_v35, %s5175_s9  ;;  %4754 = vrot.lane.b32.xlu1 %v4728_v28, %s5175_s9  ;;  %v8236_v28 = vunpack.c.l.bf16 %v5419_v6 }
  0x3a   : > { %8378 = vst [vmem:[#allocation10_spill] sm:$0xff] %v5467_v39  ;;  %v301_v5 = vadd.s32 1024, %v5467_v39  ;;  %vm725_vm8 = vcmp.lt.s32.totalorder %v5467_v39, 1  ;;  %v299_v47 = vadd.s32 768, %v5467_v39  ;;  %vm982_vm12 = vcmp.lt.s32.totalorder %v5467_v39, 127 }
  0x3c   : > { %v369_v4 = vand.u32 15, %v301_v5  ;;  %v302_v5 = vadd.s32 1152, %v5467_v39  ;;  %v355_v25 = vand.u32 15, %v299_v47 }
  0x3d   : > { %4759 = vrot.lane.b32.xlu0 %v4758_v40, %s5174_s8  ;;  %4764 = vrot.lane.b32.xlu1 %v4763_v43, %s5174_s8 }
  0x3e   : > { %vm605_vm0 = vcmp.lt.s32.totalorder %v369_v4, 15  ;;  %vm509_vm1 = vcmp.ge.s32.totalorder %v369_v4, 1  ;;  %vm507_vm15 = vcmp.ge.s32.totalorder %v355_v25, 1 }
  0x41   : > { %4769 = vrot.lane.b32.xlu0 %v5353_v46, %s5174_s8  ;;  %4774 = vrot.lane.b32.xlu1 %v4763_v43, %s5175_s9  ;;  %v8239_v43 = vunpack.c.h.bf16 %v5403_v1 }
  0x45   : > { %4779 = vrot.lane.b32.xlu0 %v5378_v55, %s5175_s9  ;;  %4784 = vrot.lane.b32.xlu1 %v4758_v40, %s5175_s9  ;;  %v4823_v40 = vpack.i.bf16 %v8247_v13, %v8252_v12 }
  0x49   : > { %4789 = vrot.lane.b32.xlu0 %v4788_v61, %s5174_s8  ;;  %4794 = vrot.lane.b32.xlu1 %v4793_v0, %s5174_s8 }
  0x4d   : > { %4799 = vrot.lane.b32.xlu0 %v5413_v3, %s5174_s8  ;;  %4804 = vrot.lane.b32.xlu1 %v4793_v0, %s5175_s9  ;;  %v8238_v0 = vunpack.c.h.bf16 %v5406_v2 }
  0x4f   : > { %v4833_v56 = vpack.i.bf16 %v8238_v0, %v8239_v43  ;;  %v305_v43 = vadd.s32 1536, %v5467_v39 }
  0x51   : > { %4809 = vrot.lane.b32.xlu0 %v4808_v8, %s5175_s9  ;;  %4814 = vrot.lane.b32.xlu1 %v4788_v61, %s5175_s9  ;;  %v4828_v61 = vpack.i.bf16 %v8237_v30, %v8236_v28  ;;  %v8272_v28 = vmov 0.0  }
  0x52   : > { %v5476_v30 = vsel %vm605_vm0, 1.0, %v8272_v28  ;;  %v5479_v57 = vsel %vm509_vm1, 1.0, %v8272_v28  ;;  %vm5621_vm0 = vcmp.lt.s32.totalorder %v355_v25, 15  ;;  %vm1165_vm1 = vcmask 392192  }
  0x53   : > { %8379 = vst [vmem:[#allocation11_spill] sm:$0xff] %v5476_v30  ;;  %8380 = vst [vmem:[#allocation12_spill] sm:$0xff] %v5479_v57 }
  0x55   : > { %4819 = vrot.lane.b32.xlu0 %v4818_v15, %s5174_s8  ;;  %4824 = vrot.lane.b32.xlu1 %v4823_v40, %s5174_s8 }
  0x59   : > { %4829 = vrot.lane.b32.xlu0 %v4828_v61, %s5174_s8  ;;  %4834 = vrot.lane.b32.xlu1 %v4833_v56, %s5174_s8 }
  0x5d   : > { %4839 = vrot.lane.b32.xlu0 %v5300_v29, %s5175_s9  ;;  %4844 = vrot.lane.b32.xlu1 %v4818_v15, %s5175_s9  ;;  %v397_v29 = vand.u32 15, %v305_v43  ;;  %v376_v43 = vand.u32 15, %v302_v5 }
  0x5f   : > { %vm609_vm2 = vcmp.lt.s32.totalorder %v397_v29, 15  ;;  %vm513_vm3 = vcmp.ge.s32.totalorder %v397_v29, 1  ;;  %vm510_vm4 = vcmp.ge.s32.totalorder %v376_v43, 1  ;;  %vm606_vm5 = vcmp.lt.s32.totalorder %v376_v43, 15  ;;  %v1134_v43 = vld [vmem:[%s8226_s2 + $0x18] sm:$0xff] }
  0x60   : > { %v5492_v15 = vsel %vm609_vm2, 1.0, %v8272_v28  ;;  %v5495_v38 = vsel %vm513_vm3, 1.0, %v8272_v28  ;;  %v5507_v29 = vsel %vm510_vm4, 1.0, %v8272_v28  ;;  %v5510_v37 = vsel %vm606_vm5, 1.0, %v8272_v28 }
  0x61   : > { %4849 = vrot.lane.b32.xlu0 %v4823_v40, %s5175_s9  ;;  %4854 = vrot.lane.b32.xlu1 %v4828_v61, %s5175_s9  ;;  %8381 = vst [vmem:[#allocation13_spill] sm:$0xff] %v5492_v15  ;;  %8382 = vst [vmem:[#allocation14_spill] sm:$0xff] %v5495_v38 }
  0x62   : > { %8383 = vst [vmem:[#allocation15_spill] sm:$0xff] %v5507_v29  ;;  %8384 = vst [vmem:[#allocation16_spill] sm:$0xff] %v5510_v37 }
  0x65   : > { %4859 = vrot.lane.b32.xlu0 %v5322_v35, %s5174_s8  ;;  %4864 = vrot.lane.b32.xlu1 %v5353_v46, %s5175_s9  ;;  %v306_v35 = vadd.s32 1664, %v5467_v39 }
  0x67   : > { %v404_v46 = vand.u32 15, %v306_v35  ;;  %v295_v35 = vadd.s32 256, %v5467_v39 }
  0x69   : > { %4869 = vrot.lane.b32.xlu0 %v5378_v55, %s5174_s8  ;;  %4874 = vrot.lane.b32.xlu1 %v5413_v3, %s5175_s9  ;;  %vm514_vm6 = vcmp.ge.s32.totalorder %v404_v46, 1  ;;  %vm610_vm7 = vcmp.lt.s32.totalorder %v404_v46, 15  ;;  %v1133_v3 = vld [vmem:[%s8226_s2 + $0x10] sm:$0xff]  ;;  %v296_v46 = vadd.s32 384, %v5467_v39  ;;  %v327_v36 = vand.u32 15, %v295_v35 }
  0x6a   : > { %v5516_v5 = vsel %vm514_vm6, 1.0, %v8272_v28  ;;  %v5520_v55 = vsel %vm610_vm7, 1.0, %v8272_v28 }
  0x6b   : > { %8385 = vst [vmem:[#allocation17_spill] sm:$0xff] %v5516_v5  ;;  %8386 = vst [vmem:[#allocation18_spill] sm:$0xff] %v5520_v55  ;;  %v334_v63 = vand.u32 15, %v296_v46  ;;  %vm503_vm9 = vcmp.ge.s32.totalorder %v327_v36, 1  ;;  %vm5562_vm13 = vcmp.lt.s32.totalorder %v327_v36, 15 }
  0x6c   : > { %v5546_v35 = vsel %vm503_vm9, 1.0, %v8272_v28 }
  0x6d   : > { %4879 = vrot.lane.b32.xlu0 %v4808_v8, %s5174_s8  ;;  %4884 = vrot.lane.b32.xlu1 %v4833_v56, %s5175_s9  ;;  %v1131_v8 = vld [vmem:[%s8226_s2] sm:$0xff]  ;;  %v1132_v56 = vld [vmem:[%s8226_s2 + $0x8] sm:$0xff]  ;;  %vm504_vm10 = vcmp.ge.s32.totalorder %v334_v63, 1  ;;  %8387 = vst [vmem:[#allocation19_spill] sm:$0xff] %v5546_v35  ;;  %vm600_vm11 = vcmp.lt.s32.totalorder %v334_v63, 15 }
  0x6e   : > { %v5559_v12 = vsel %vm504_vm10, 1.0, %v8272_v28  ;;  %v5581_v20 = vsel %vm600_vm11, 1.0, %v8272_v28 }
  0x6f   : > { %8388 = vst [vmem:[#allocation20_spill] sm:$0xff] %v5559_v12  ;;  %8391 = vst [vmem:[#allocation21_spill] sm:$0xff] %v5581_v20 }
  0x71   : > { %1152 = vperm.xlu1 %4889, %v1134_v43   ;;  %1147 = vperm.xlu0 %4888, %v1133_v3  }
  0x75   : > { %1137 = vperm.xlu1 %4889, %v1131_v8   ;;  %1142 = vperm.xlu0 %4888, %v1132_v56   ;;  %v300_v56 = vadd.s32 896, %v5467_v39 }
  0x77   : > { %v362_v22 = vand.u32 15, %v300_v56 }
  0x79   : > { %vm5605_vm14 = vcmp.ge.s32.totalorder %v362_v22, 1  ;;  %vm5640_vm2 = vcmp.lt.s32.totalorder %v362_v22, 15 }
  0xa3   : > { %v4730_v62 = vpop.permute.xlu0 %4729  ;;  %v5537_v48 = vpop.permute.xlu1 %4739 }
  0xa4   : > { %v4732_v43 = vunpack.i.h.bf16 %v4730_v62  ;;  %v4731_v3 = vunpack.i.l.bf16 %v4730_v62  ;;  %v8269_v13 = vunpack.i.h.bf16 %v5537_v48  ;;  %v8270_v8 = vunpack.i.l.bf16 %v5537_v48 }
  0xa6   : > { %v752_v62 = vsel %vm725_vm8, %v8270_v8, %v4731_v3  ;;  %v753_v46 = vsel %vm725_vm8, %v8269_v13, %v4732_v43 }
  0xa7   : > { %v5543_v42 = vpop.permute.xlu0 %4734  ;;  %v4745_v32 = vpop.permute.xlu1 %4744  ;;  %v760_v63 = vmul.f32 %v5546_v35, %v752_v62  ;;  %v776_v9 = vmul.f32 %v5546_v35, %v753_v46 }
  0xa8   : > { %v8262_v41 = vunpack.i.h.bf16 %v5543_v42  ;;  %v8261_v31 = vunpack.i.l.bf16 %v5543_v42  ;;  %v4747_v19 = vunpack.i.h.bf16 %v4745_v32  ;;  %v4746_v61 = vunpack.i.l.bf16 %v4745_v32 }
  0xa9   : > { %v792_v0 = vpack.c.bf16 %v776_v9, %v760_v63 }
  0xaa   : > { %v750_v24 = vsel %vm725_vm8, %v4731_v3, %v8261_v31  ;;  %v751_v10 = vsel %vm725_vm8, %v4732_v43, %v8262_v41  ;;  %v5584_v3 = vadd.s32 1280, %v5467_v39 }
  0xab   : > { %v5576_v47 = vpop.permute.xlu0 %4749  ;;  %v761_v36 = vmul.f32 %v5559_v12, %v750_v24  ;;  %v777_v56 = vmul.f32 %v5559_v12, %v751_v10  ;;  %v5588_v40 = vpop.permute.xlu1 %4754  ;;  %v5595_v10 = vsel %vm5562_vm13, 1.0, %v8272_v28 }
  0xac   : > { %v8264_v43 = vunpack.i.h.bf16 %v5576_v47  ;;  %v8263_v62 = vunpack.i.l.bf16 %v5576_v47  ;;  %v8266_v46 = vunpack.i.h.bf16 %v5588_v40  ;;  %v8265_v24 = vunpack.i.l.bf16 %v5588_v40  ;;  %8392 = vst [vmem:[#allocation22_spill] sm:$0xff] %v5595_v10 }
  0xad   : > { %v793_v4 = vpack.c.bf16 %v777_v56, %v761_v36 }
  0xae   : > { %v1005_v32 = vsel %vm982_vm12, %v4746_v61, %v8263_v62  ;;  %v1006_v31 = vsel %vm982_vm12, %v4747_v19, %v8264_v43  ;;  %v1007_v63 = vsel %vm982_vm12, %v8265_v24, %v4746_v61  ;;  %v1008_v56 = vsel %vm982_vm12, %v8266_v46, %v4747_v19 }
  0xaf   : > { %v4760_v36 = vpop.permute.xlu0 %4759  ;;  %1225 = vmatprep.subr.bf16.mxu1 %v793_v4  ;;  %v1018_v23 = vmul.f32 %v5581_v20, %v1005_v32  ;;  %v1034_v9 = vmul.f32 %v5581_v20, %v1006_v31  ;;  %v5619_v58 = vpop.permute.xlu1 %4764  ;;  %v5633_v19 = vsel %vm5605_vm14, 1.0, %v8272_v28  ;;  %v1017_v25 = vmul.f32 %v5595_v10, %v1007_v63 }
  0xb0   : > { %v4762_v62 = vunpack.i.h.bf16 %v4760_v36  ;;  %v4761_v43 = vunpack.i.l.bf16 %v4760_v36  ;;  %1226 = vmatpush1.bf16.msra.mxu1 %v792_v0  ;;  %v8267_v31 = vunpack.i.h.bf16 %v5619_v58  ;;  %v8268_v61 = vunpack.i.l.bf16 %v5619_v58  ;;  %8397 = vst [vmem:[#allocation23_spill] sm:$0xff] %v5633_v19 }
  0xb1   : > { %1227 = vmatprep.subr.bf16.mxu1 %v4014_v51  ;;  %v5636_v0 = vadd.s32 1408, %v5467_v39  ;;  %v1033_v32 = vmul.f32 %v5595_v10, %v1008_v56  ;;  %v5645_v24 = vadd.s32 128, %v5467_v39  ;;  %v5656_v63 = vsel %vm507_vm15, 1.0, %v8272_v28 }
  0xb2   : > { %v743_v41 = vsel %vm725_vm8, %v4762_v62, %v8267_v31  ;;  %v742_v51 = vsel %vm725_vm8, %v4761_v43, %v8268_v61  ;;  %8400 = vst [vmem:[#allocation24_spill] sm:$0xff] %v5656_v63  ;;  %v1050_v56 = vpack.c.bf16 %v1034_v9, %v1018_v23  ;;  %v5670_v61 = vsel %vm5621_vm0, 1.0, %v8272_v28 }
  0xb3   : > { %v5658_v22 = vpop.permute.xlu0 %4769  ;;  %v4775_v14 = vpop.permute.xlu1 %4774  ;;  %v765_v31 = vmul.f32 %v5633_v19, %v742_v51  ;;  %v781_v11 = vmul.f32 %v5633_v19, %v743_v41  ;;  %8401 = vst [vmem:[#allocation25_spill] sm:$0xff] %v5670_v61  ;;  %v383_v23 = vand.u32 15, %v5584_v3  ;;  %v5676_v9 = vsel %vm5640_vm2, 1.0, %v8272_v28 }
  0xb4   : > { %v8274_v46 = vunpack.i.h.bf16 %v5658_v22  ;;  %v8271_v59 = vunpack.i.l.bf16 %v5658_v22  ;;  %1228 = vmatpush1.bf16.msra.mxu1 %v4013_v52  ;;  %8402 = vst [vmem:[#allocation26_spill] sm:$0xff] %v5676_v9  ;;  %v8277_v13 = vand.u32 15, %v5636_v0  ;;  %v1049_v41 = vpack.c.bf16 %v1033_v32, %v1017_v25 }
  0xb5   : > { %1229 = vmatprep.subr.bf16.mxu1 %v1050_v56  ;;  %v797_v8 = vpack.c.bf16 %v781_v11, %v765_v31  ;;  %v4776_v28 = vunpack.i.l.bf16 %v4775_v14  ;;  %vm5738_vm4 = vcmp.ge.s32.totalorder %v383_v23, 1  ;;  %vm5743_vm5 = vcmp.lt.s32.totalorder %v383_v23, 15 }
  0xb6   : > { %v744_v52 = vsel %vm725_vm8, %v8271_v59, %v4761_v43  ;;  %v745_v4 = vsel %vm725_vm8, %v8274_v46, %v4762_v62  ;;  %v4777_v59 = vunpack.i.h.bf16 %v4775_v14  ;;  %vm5706_vm3 = vcmp.ge.s32.totalorder %v8277_v13, 1 }
  0xb7   : > { %v764_v51 = vmul.f32 %v5656_v63, %v744_v52  ;;  %v780_v36 = vmul.f32 %v5656_v63, %v745_v4  ;;  %v5690_v56 = vpop.permute.xlu0 %4779  ;;  %v5700_v32 = vpop.permute.xlu1 %4784  ;;  %v5719_v46 = vadd.s32 1792, %v5467_v39  ;;  %v8420_v10 = vcombine.low %v5312_v33, %v5315_v34 }
  0xb8   : > { %v8276_v62 = vunpack.i.h.bf16 %v5690_v56  ;;  %v8275_v25 = vunpack.i.l.bf16 %v5690_v56  ;;  %1230 = vmatpush1.bf16.msra.mxu1 %v1049_v41  ;;  %v8278_v52 = vunpack.i.h.bf16 %v5700_v32  ;;  %v8279_v11 = vunpack.i.l.bf16 %v5700_v32 }
  0xb9   : > { %1331 = vmatprep.subr.bf16.mxu1 %v797_v8  ;;  %v796_v31 = vpack.c.bf16 %v780_v36, %v764_v51  ;;  %v5722_v8 = vadd.s32 1920, %v5467_v39 }
  0xba   : > { %v997_v14 = vsel %vm982_vm12, %v4776_v28, %v8275_v25  ;;  %v998_v41 = vsel %vm982_vm12, %v4777_v59, %v8276_v62  ;;  %v999_v51 = vsel %vm982_vm12, %v8279_v11, %v4776_v28  ;;  %v1000_v36 = vsel %vm982_vm12, %v8278_v52, %v4777_v59 }
  0xbb   : > { %v4790_v25 = vpop.permute.xlu0 %4789  ;;  %4031 = vmatmul.mubr.msk.bf16.vlgmr.msra.gmra.mrb[0].mxu1 %vm1165_vm1, %v5695_v60  ;;  %v1022_v62 = vmul.f32 %v5676_v9, %v997_v14  ;;  %v1038_v13 = vmul.f32 %v5676_v9, %v998_v41  ;;  %v5736_v54 = vpop.permute.xlu1 %4794  ;;  %v8410_v41 = vmov 0.0   ;;  %v8412_v11 = vand.u32 15, %v5645_v24 }
  0xbc   : > { %v4792_v43 = vunpack.i.h.bf16 %v4790_v25  ;;  %v4791_v3 = vunpack.i.l.bf16 %v4790_v25  ;;  %1332 = vmatpush1.bf16.msra.mxu1 %v796_v31  ;;  %1267 = vmatprep.mubr.bf16.mxu1 %v8280_v53  ;;  %v8409_v25 = vcombine.high %v5312_v33, %v5315_v34  ;;  %v5755_v31 = vsel %vm5706_vm3, 1.0, %v8410_v41 }
  0xbd   : > { %8411 = vst [vmem:[#allocation27_spill] sm:$0xff] %v5755_v31  ;;  %vm5759_vm6 = vcmp.ge.s32.totalorder %v8412_v11, 1  ;;  %v1021_v53 = vmul.f32 %v5670_v61, %v999_v51  ;;  %v1037_v52 = vmul.f32 %v5670_v61, %v1000_v36  ;;  %v8415_v9 = vand.u32 15, %v5467_v39 }
  0xbe   : > { %1333 = vmatprep.subr.bf16.mxu1 %v8409_v25  ;;  %v8418_v4 = vunpack.i.h.bf16 %v5736_v54  ;;  %v8419_v19 = vunpack.i.l.bf16 %v5736_v54  ;;  %v1054_v36 = vpack.c.bf16 %v1038_v13, %v1022_v62  ;;  %v5798_v62 = vsel %vm5738_vm4, 1.0, %v8410_v41 }
  0xbf   : > { %vm5768_vm7 = vcmp.ge.s32.totalorder %v8415_v9, 1  ;;  %v5780_v63 = vpop.permute.xlu0 %4799  ;;  %v5785_v9 = vld [vmem:[%s8225_s1 + $0x8] sm:$0xff]   ;;  %8421 = vst [vmem:[#allocation28_spill] sm:$0xff] %v5798_v62  ;;  %v5803_v14 = vsel %vm5743_vm5, 1.0, %v8410_v41  ;;  %v5808_v61 = vsel %vm5759_vm6, 1.0, %v8410_v41 }
  0xc0   : > { %v735_v11 = vsel %vm725_vm8, %v4792_v43, %v8418_v4  ;;  %v734_v51 = vsel %vm725_vm8, %v4791_v3, %v8419_v19  ;;  %v8296_v20 = vunpack.i.l.bf16 %v5780_v63  ;;  %v4805_v4 = vpop.permute.xlu1 %4804  ;;  %1334 = vmatpush1.bf16.msra.mxu1 %v8420_v10  ;;  %8422 = vst [vmem:[#allocation29_spill] sm:$0xff] %v5803_v14  ;;  %8423 = vst [vmem:[#allocation30_spill] sm:$0xff] %v5808_v61  ;;  %v8424_v10 = vand.u32 15, %v5636_v0 }
  0xc1   : > { %v769_v19 = vmul.f32 %v5755_v31, %v734_v51  ;;  %v785_v13 = vmul.f32 %v5755_v31, %v735_v11  ;;  %1335 = vmatprep.subr.bf16.mxu1 %v1054_v36  ;;  %v8427_v59 = vunpack.i.h.bf16 %v5780_v63  ;;  %v1053_v36 = vpack.c.bf16 %v1037_v52, %v1021_v53 }
  0xc2   : > { %vm5812_vm9 = vcmp.lt.s32.totalorder %v8424_v10, 15  ;;  %v736_v28 = vsel %vm725_vm8, %v8296_v20, %v4791_v3  ;;  %v5827_v23 = vsel %vm5768_vm7, 1.0, %v8410_v41  ;;  %v8430_v31 = vand.u32 15, %v5719_v46 }
  0xc3   : > { %v737_v51 = vsel %vm725_vm8, %v8427_v59, %v4792_v43  ;;  %8428 = vst [vmem:[#allocation31_spill] sm:$0xff] %v5827_v23  ;;  %v5829_v0 = vpop.permute.xlu0 %4809  ;;  %4032 = vmatmul.mubr.msk.bf16.gmra.mrb[4].mxu1 %vm1165_vm1, %v5785_v9  ;;  %v801_v10 = vpack.c.bf16 %v785_v13, %v769_v19  ;;  %v8431_v3 = vand.u32 15, %v5722_v8  ;;  %v8434_v53 = vand.u32 15, %v5645_v24 }
  0xc4   : > { %8429 = vst [vmem:[#allocation32_spill] sm:$0xff] %v5829_v0  ;;  %vm515_vm10 = vcmp.ge.s32.totalorder %v8430_v31, 1  ;;  %v768_v52 = vmul.f32 %v5798_v62, %v736_v28  ;;  %v784_v25 = vmul.f32 %v5798_v62, %v737_v51  ;;  %v8310_v19 = vunpack.i.h.bf16 %v5829_v0  ;;  %v5851_v13 = vpop.permute.xlu1 %4814  ;;  %1336 = vmatpush1.bf16.msra.mxu1 %v1053_v36 }
  0xc5   : > { %vm5837_vm11 = vcmp.ge.s32.totalorder %v8431_v3, 1  ;;  %vm5843_vm13 = vcmp.lt.s32.totalorder %v8434_v53, 15  ;;  %v8307_v31 = vunpack.i.l.bf16 %v5829_v0  ;;  %v8437_v59 = vmov 0   ;;  %1437 = vmatprep.subr.bf16.mxu1 %v801_v10 }
  0xc6   : > { %1363 = vmatprep.mubr.bf16.mxu1 %v8437_v59  ;;  %v4807_v3 = vunpack.i.h.bf16 %v4805_v4  ;;  %v4806_v12 = vunpack.i.l.bf16 %v4805_v4  ;;  %v5857_v28 = vsel %vm515_vm10, 1.0, %v8410_v41  ;;  %v5862_v51 = vsel %vm5812_vm9, 1.0, %v8410_v41 }
  0xc7   : > { %8438 = vst [vmem:[#allocation33_spill] sm:$0xff] %v5857_v28  ;;  %8439 = vst [vmem:[#allocation34_spill] sm:$0xff] %v5862_v51  ;;  %v5867_v36 = vsel %vm5837_vm11, 1.0, %v8410_v41  ;;  %v8441_v4 = vand.u32 15, %v5467_v39  ;;  %v4820_v53 = vpop.permute.xlu0 %4819  ;;  %v5884_v20 = vadd.s32 512, %v5467_v39  ;;  %v800_v33 = vpack.c.bf16 %v784_v25, %v768_v52 }
  0xc8   : > { %8440 = vst [vmem:[#allocation35_spill] sm:$0xff] %v5867_v36  ;;  %v989_v10 = vsel %vm982_vm12, %v4806_v12, %v8307_v31  ;;  %v990_v11 = vsel %vm982_vm12, %v4807_v3, %v8310_v19  ;;  %v4825_v62 = vpop.permute.xlu1 %4824  ;;  %v4822_v35 = vunpack.i.h.bf16 %v4820_v53  ;;  %v4821_v34 = vunpack.i.l.bf16 %v4820_v53 }
  0xc9   : > { %vm5871_vm14 = vcmp.lt.s32.totalorder %v8441_v4, 15  ;;  %v5889_v4 = vsel %vm5843_vm13, 1.0, %v8410_v41  ;;  %v5892_v31 = vadd.s32 640, %v5467_v39  ;;  %v8445_v17 = vunpack.i.l.bf16 %v5851_v13 }
  0xca   : > { %8444 = vst [vmem:[#allocation36_spill] sm:$0xff] %v5889_v4  ;;  %v8446_v16 = vunpack.i.h.bf16 %v5851_v13  ;;  %v4827_v43 = vunpack.i.h.bf16 %v4825_v62  ;;  %v4826_v55 = vunpack.i.l.bf16 %v4825_v62  ;;  %v8447_v0 = vunpack.i.l.bf16 %v5537_v48 }
  0xcb   : > { %v991_v19 = vsel %vm982_vm12, %v8445_v17, %v4806_v12  ;;  %v8448_v25 = vunpack.i.h.bf16 %v5537_v48  ;;  %v1026_v1 = vmul.f32 %v5862_v51, %v989_v10  ;;  %v1042_v17 = vmul.f32 %v5862_v51, %v990_v11  ;;  %4035 = vmatmul.mubr.msk.bf16.vlgmr.msra.gmra.mrb[8].mxu1 %vm1165_vm1, %v5695_v60 }
  0xcc   : > { %v992_v15 = vsel %vm982_vm12, %v8446_v16, %v4807_v3  ;;  %v754_v52 = vsel %vm725_vm8, %v4821_v34, %v8447_v0  ;;  %v4830_v16 = vpop.permute.xlu0 %4829  ;;  %v756_v0 = vsel %vm725_vm8, %v4826_v55, %v4821_v34  ;;  %v757_v48 = vsel %vm725_vm8, %v4827_v43, %v4822_v35  ;;  %v5920_v3 = vpop.permute.xlu1 %4834  ;;  %1438 = vmatpush1.bf16.msra.mxu1 %v800_v33 }
  0xcd   : > { %v755_v53 = vsel %vm725_vm8, %v4822_v35, %v8448_v25  ;;  %v759_v12 = vmul.f32 %v5808_v61, %v754_v52  ;;  %v4832_v10 = vunpack.i.h.bf16 %v4830_v16  ;;  %v4831_v25 = vunpack.i.l.bf16 %v4830_v16  ;;  %1373 = vmatprep.mubr.bf16.mxu1 %v8437_v59 }
  0xce   : > { %v775_v62 = vmul.f32 %v5808_v61, %v755_v53  ;;  %v758_v11 = vmul.f32 %v5827_v23, %v756_v0  ;;  %v774_v51 = vmul.f32 %v5827_v23, %v757_v48  ;;  %v1025_v52 = vmul.f32 %v5803_v14, %v991_v19 }
  0xcf   : > { %v1041_v53 = vmul.f32 %v5803_v14, %v992_v15  ;;  %v8449_v35 = vcombine.high %v5359_v49, %v5362_v50  ;;  %v8325_v33 = vunpack.i.l.bf16 %v5920_v3  ;;  %v727_v16 = vsel %vm725_vm8, %v4832_v10, %v4827_v43  ;;  %v8497_v14 = vld [vmem:[#allocation6_spill] sm:$0xff] }
  0xd0   : > { %v791_v61 = vpack.c.bf16 %v775_v62, %v759_v12  ;;  %v726_v0 = vsel %vm725_vm8, %v4831_v25, %v4826_v55  ;;  %v790_v48 = vpack.c.bf16 %v774_v51, %v758_v11  ;;  %v4840_v23 = vpop.permute.xlu0 %4839  ;;  %v1058_v19 = vpack.c.bf16 %v1042_v17, %v1026_v1  ;;  %v4845_v43 = vpop.permute.xlu1 %4844 }
  0xd1   : > { %1439 = vmatprep.subr.bf16.mxu1 %v8449_v35  ;;  %v773_v15 = vmul.f32 %v5867_v36, %v726_v0  ;;  %v789_v34 = vmul.f32 %v5867_v36, %v727_v16  ;;  %v5941_v12 = vsel %vm5871_vm14, 1.0, %v8410_v41  ;;  %v8451_v62 = vcombine.low %v5359_v49, %v5362_v50 }
  0xd2   : > { %1172 = vmatprep.subr.bf16.mxu0 %v791_v61  ;;  %8450 = vst [vmem:[#allocation37_spill] sm:$0xff] %v5941_v12  ;;  %v4842_v35 = vunpack.i.h.bf16 %v4840_v23  ;;  %v4841_v55 = vunpack.i.l.bf16 %v4840_v23  ;;  %v341_v61 = vand.u32 15, %v5884_v20  ;;  %v348_v1 = vand.u32 15, %v5892_v31 }
  0xd3   : > { %1440 = vmatpush1.bf16.msra.mxu1 %v8451_v62  ;;  %1173 = vmatpush1.bf16.msra.mxu0 %v790_v48  ;;  %v4847_v51 = vunpack.i.h.bf16 %v4845_v43  ;;  %v4846_v17 = vunpack.i.l.bf16 %v4845_v43  ;;  %v1057_v11 = vpack.c.bf16 %v1041_v53, %v1025_v52  ;;  %v8452_v24 = vcombine.high %v5275_v18, %v5280_v21 }
  0xd4   : > { %1441 = vmatprep.subr.bf16.mxu1 %v1058_v19  ;;  %v805_v16 = vpack.c.bf16 %v789_v34, %v773_v15  ;;  %v8453_v0 = vunpack.i.h.bf16 %v5920_v3  ;;  %v728_v23 = vsel %vm725_vm8, %v8325_v33, %v4831_v25  ;;  %v8454_v31 = vunpack.i.h.bf16 %v5588_v40  ;;  %4036 = vmatmul.mubr.msk.bf16.gmra.mrb[12].mxu1 %vm1165_vm1, %v5785_v9  ;;  %v4850_v25 = vpop.permute.xlu0 %4849 }
  0xd5   : > { %1174 = vmatprep.subr.bf16.mxu0 %v8452_v24  ;;  %v8455_v53 = vunpack.i.l.bf16 %v5588_v40  ;;  %v1012_v48 = vsel %vm982_vm12, %v4847_v51, %v4842_v35  ;;  %v8456_v40 = vcombine.low %v5275_v18, %v5280_v21  ;;  %v5980_v24 = vpop.permute.xlu1 %4854  ;;  %1469 = vmatprep.mubr.bf16.mxu1 %v8437_v59  ;;  %vm505_vm0 = vcmp.ge.s32.totalorder %v341_v61, 1 }
  0xd6   : > { %v729_v62 = vsel %vm725_vm8, %v8453_v0, %v4832_v10  ;;  %v1010_v52 = vsel %vm982_vm12, %v4842_v35, %v8454_v31  ;;  %v1011_v10 = vsel %vm982_vm12, %v4846_v17, %v4841_v55  ;;  %v1031_v35 = vmul.f32 %v5941_v12, %v1012_v48 }
  0xd7   : > { %v1009_v34 = vsel %vm982_vm12, %v4841_v55, %v8455_v53  ;;  %v1032_v15 = vmul.f32 %v5889_v4, %v1010_v52  ;;  %1442 = vmatpush1.bf16.msra.mxu1 %v1057_v11  ;;  %1175 = vmatpush1.bf16.msra.mxu0 %v8456_v40  ;;  %v1015_v43 = vmul.f32 %v5941_v12, %v1011_v10  ;;  %v4852_v55 = vunpack.i.h.bf16 %v4850_v25 }
  0xd8   : > { %v1016_v19 = vmul.f32 %v5889_v4, %v1009_v34  ;;  %v4851_v0 = vunpack.i.l.bf16 %v4850_v25  ;;  %1543 = vmatprep.subr.bf16.mxu1 %v805_v16  ;;  %v788_v53 = vmul.f32 %v5857_v28, %v729_v62  ;;  %v772_v11 = vmul.f32 %v5857_v28, %v728_v23  ;;  %v4860_v48 = vpop.permute.xlu0 %4859 }
  0xd9   : > { %v1047_v52 = vpack.c.bf16 %v1031_v35, %v1015_v43  ;;  %v8457_v34 = vand.u32 15, %v5722_v8  ;;  %vm506_vm2 = vcmp.ge.s32.totalorder %v348_v1, 1  ;;  %v4862_v10 = vunpack.i.h.bf16 %v4860_v48  ;;  %v4865_v35 = vpop.permute.xlu1 %4864 }
  0xda   : > { %v1048_v31 = vpack.c.bf16 %v1032_v15, %v1016_v19  ;;  %v4861_v25 = vunpack.i.l.bf16 %v4860_v48  ;;  %v1014_v16 = vsel %vm982_vm12, %v4852_v55, %v4847_v51  ;;  %v1013_v62 = vsel %vm982_vm12, %v4851_v0, %v4846_v17 }
  0xdb   : > { %vm612_vm15 = vcmp.lt.s32.totalorder %v8457_v34, 15  ;;  %v5997_v8 = vsel %vm505_vm0, 1.0, %v8410_v41  ;;  %v804_v19 = vpack.c.bf16 %v788_v53, %v772_v11  ;;  %v6000_v15 = vsel %vm506_vm2, 1.0, %v8410_v41 }
  0xdc   : > { %1176 = vmatprep.subr.bf16.mxu0 %v1048_v31  ;;  %v5994_v23 = vsel %vm612_vm15, 1.0, %v8410_v41  ;;  %8459 = vst [vmem:[#allocation39_spill] sm:$0xff] %v5997_v8  ;;  %8460 = vst [vmem:[#allocation40_spill] sm:$0xff] %v6000_v15  ;;  %v4857_v40 = vunpack.i.h.bf16 %v5980_v24  ;;  %v4856_v43 = vunpack.i.l.bf16 %v5980_v24  ;;  %v8461_v51 = vunpack.i.h.bf16 %v5543_v42  ;;  %4039 = vmatmul.mubr.msk.bf16.vlgmr.msra.gmra.mrb[16].mxu1 %vm1165_vm1, %v5695_v60  ;;  %v8493_v24 = vld [vmem:[#allocation18_spill] sm:$0xff] }
  0xdd   : > { %1177 = vmatpush1.bf16.msra.mxu0 %v1047_v52  ;;  %8458 = vst [vmem:[#allocation38_spill] sm:$0xff] %v5994_v23  ;;  %v8462_v31 = vunpack.i.l.bf16 %v5543_v42  ;;  %v8463_v53 = vunpack.i.h.bf16 %v5658_v22  ;;  %v8464_v34 = vunpack.i.l.bf16 %v5658_v22  ;;  %v1030_v42 = vmul.f32 %v5994_v23, %v1013_v62  ;;  %1544 = vmatpush1.bf16.msra.mxu1 %v804_v19 }
  0xde   : > { %v749_v17 = vsel %vm725_vm8, %v8461_v51, %v4862_v10  ;;  %v1046_v51 = vmul.f32 %v5994_v23, %v1014_v16  ;;  %v4866_v33 = vunpack.i.l.bf16 %v4865_v35  ;;  %1479 = vmatprep.mubr.bf16.mxu1 %v8437_v59  ;;  %vm602_vm4 = vcmp.lt.s32.totalorder %v348_v1, 15  ;;  %v4870_v16 = vpop.permute.xlu0 %4869 }
  0xdf   : > { %v748_v52 = vsel %vm725_vm8, %v8462_v31, %v4861_v25  ;;  %v747_v11 = vsel %vm725_vm8, %v4862_v10, %v8463_v53  ;;  %v746_v48 = vsel %vm725_vm8, %v4861_v25, %v8464_v34  ;;  %v8465_v31 = vand.u32 15, %v5719_v46 }
  0xe0   : > { %4029 = vmatmul.mubr.msk.bf16.vlgmr.msra.gmra.mrb[0].mxu0 %vm1165_vm1, %v5695_v60  ;;  %v778_v10 = vmul.f32 %v5997_v8, %v749_v17  ;;  %v762_v22 = vmul.f32 %v5997_v8, %v748_v52  ;;  %v8466_v25 = vcombine.high %v5419_v6, %v5422_v7  ;;  %v4867_v62 = vunpack.i.h.bf16 %v4865_v35 }
  0xe1   : > { %vm611_vm3 = vcmp.lt.s32.totalorder %v8465_v31, 15  ;;  %1214 = vmatprep.mubr.bf16.mxu0 %v8437_v59  ;;  %v763_v46 = vmul.f32 %v6000_v15, %v746_v48  ;;  %v779_v19 = vmul.f32 %v6000_v15, %v747_v11  ;;  %v984_v17 = vsel %vm982_vm12, %v4857_v40, %v4852_v55 }
  0xe2   : > { %1545 = vmatprep.subr.bf16.mxu1 %v8466_v25  ;;  %v6038_v53 = vsel %vm611_vm3, 1.0, %v8410_v41  ;;  %v983_v52 = vsel %vm982_vm12, %v4856_v43, %v4851_v0  ;;  %v1062_v1 = vpack.c.bf16 %v1046_v51, %v1030_v42  ;;  %vm601_vm5 = vcmp.lt.s32.totalorder %v341_v61, 15 }
  0xe3   : > { %8467 = vst [vmem:[#allocation41_spill] sm:$0xff] %v6038_v53  ;;  %v8468_v35 = vcombine.low %v5419_v6, %v5422_v7  ;;  %v6054_v11 = vsel %vm602_vm4, 1.0, %v8410_v41  ;;  %v8470_v34 = vunpack.i.l.bf16 %v5700_v32  ;;  %v4872_v48 = vunpack.i.h.bf16 %v4870_v16 }
  0xe4   : > { %8469 = vst [vmem:[#allocation42_spill] sm:$0xff] %v6054_v11  ;;  %v4871_v31 = vunpack.i.l.bf16 %v4870_v16  ;;  %v794_v25 = vpack.c.bf16 %v778_v10, %v762_v22  ;;  %v1045_v0 = vmul.f32 %v6038_v53, %v984_v17  ;;  %v1029_v20 = vmul.f32 %v6038_v53, %v983_v52  ;;  %4040 = vmatmul.mubr.msk.bf16.gmra.mrb[20].mxu1 %vm1165_vm1, %v5785_v9 }
  0xe5   : > { %1546 = vmatpush1.bf16.msra.mxu1 %v8468_v35  ;;  %v1001_v55 = vsel %vm982_vm12, %v4866_v33, %v8470_v34  ;;  %v8471_v61 = vunpack.i.h.bf16 %v5700_v32  ;;  %v795_v51 = vpack.c.bf16 %v779_v19, %v763_v46  ;;  %v6071_v16 = vsel %vm601_vm5, 1.0, %v8410_v41  ;;  %1575 = vmatprep.mubr.bf16.mxu1 %v8437_v59 }
  0xe6   : > { %1547 = vmatprep.subr.bf16.mxu1 %v1062_v1  ;;  %8472 = vst [vmem:[#allocation43_spill] sm:$0xff] %v6071_v16  ;;  %v8473_v10 = vunpack.i.h.bf16 %v5576_v47  ;;  %v8474_v32 = vunpack.i.l.bf16 %v5576_v47  ;;  %v1020_v46 = vmul.f32 %v6054_v11, %v1001_v55  ;;  %v8475_v19 = vunpack.i.h.bf16 %v5780_v63  ;;  %v4875_v47 = vpop.permute.xlu1 %4874 }
  0xe7   : > { %v1002_v42 = vsel %vm982_vm12, %v4867_v62, %v8471_v61  ;;  %1278 = vmatprep.subr.bf16.mxu0 %v795_v51  ;;  %v8476_v41 = vunpack.i.l.bf16 %v5780_v63  ;;  %v1061_v35 = vpack.c.bf16 %v1045_v0, %v1029_v20  ;;  %v8478_v63 = vunpack.i.h.bf16 %v5619_v58 }
  0xe8   : > { %4030 = vmatmul.mubr.msk.bf16.gmra.mrb[4].mxu0 %vm1165_vm1, %v5785_v9  ;;  %v1004_v22 = vsel %vm982_vm12, %v8473_v10, %v4867_v62  ;;  %v1003_v17 = vsel %vm982_vm12, %v8474_v32, %v4866_v33  ;;  %v739_v52 = vsel %vm725_vm8, %v4872_v48, %v8475_v19  ;;  %v1036_v62 = vmul.f32 %v6054_v11, %v1002_v42 }
  0xe9   : > { %v738_v1 = vsel %vm725_vm8, %v4871_v31, %v8476_v41  ;;  %1279 = vmatpush1.bf16.msra.mxu0 %v794_v25  ;;  %v8477_v33 = vcombine.high %v5287_v26, %v5290_v27  ;;  %1310 = vmatprep.mubr.bf16.mxu0 %v8437_v59  ;;  %v1035_v34 = vmul.f32 %v6071_v16, %v1004_v22  ;;  %v8479_v25 = vunpack.i.l.bf16 %v5619_v58 }
  0xea   : > { %v1019_v55 = vmul.f32 %v6071_v16, %v1003_v17  ;;  %v741_v61 = vsel %vm725_vm8, %v8478_v63, %v4872_v48  ;;  %v1052_v51 = vpack.c.bf16 %v1036_v62, %v1020_v46  ;;  %1548 = vmatpush1.bf16.msra.mxu1 %v1061_v35  ;;  %v767_v0 = vmul.f32 %v5507_v29, %v738_v1  ;;  %v4880_v48 = vpop.permute.xlu0 %4879 }
  0xeb   : > { %1280 = vmatprep.subr.bf16.mxu0 %v8477_v33  ;;  %v740_v42 = vsel %vm725_vm8, %v8479_v25, %v4871_v31  ;;  %v783_v20 = vmul.f32 %v5507_v29, %v739_v52  ;;  %v4877_v10 = vunpack.i.h.bf16 %v4875_v47  ;;  %v4876_v22 = vunpack.i.l.bf16 %v4875_v47 }
  0xec   : > { %v8480_v32 = vcombine.low %v5287_v26, %v5290_v27  ;;  %v782_v17 = vmul.f32 %v5479_v57, %v741_v61  ;;  %v766_v58 = vmul.f32 %v5479_v57, %v740_v42  ;;  %v1051_v19 = vpack.c.bf16 %v1035_v34, %v1019_v55 }
  0xed   : > { %4043 = vmatmul.mubr.msk.bf16.vlgmr.msra.gmra.mrb[24].mxu1 %vm1165_vm1, %v5695_v60  ;;  %v799_v31 = vpack.c.bf16 %v783_v20, %v767_v0  ;;  %v8481_v46 = vunpack.i.h.bf16 %v5851_v13  ;;  %v8482_v41 = vunpack.i.l.bf16 %v5851_v13  ;;  %v4882_v62 = vunpack.i.h.bf16 %v4880_v48 }
  0xee   : > { %1281 = vmatpush1.bf16.msra.mxu0 %v8480_v32  ;;  %1585 = vmatprep.mubr.bf16.mxu1 %v8437_v59  ;;  %v4881_v47 = vunpack.i.l.bf16 %v4880_v48  ;;  %v4020_v33 = vcombine.high %v5343_v44, %v5346_v45  ;;  %v798_v35 = vpack.c.bf16 %v782_v17, %v766_v58  ;;  %v8483_v34 = vunpack.i.h.bf16 %v5690_v56  ;;  %v4885_v58 = vpop.permute.xlu1 %4884 }
  0xef   : > { %1282 = vmatprep.subr.bf16.mxu0 %v1052_v51  ;;  %v994_v52 = vsel %vm982_vm12, %v4877_v10, %v8481_v46  ;;  %v993_v1 = vsel %vm982_vm12, %v4876_v22, %v8482_v41  ;;  %v8484_v63 = vunpack.i.l.bf16 %v5690_v56  ;;  %v8485_v42 = vunpack.i.h.bf16 %v5920_v3 }
  0xf0   : > { %v996_v55 = vsel %vm982_vm12, %v8483_v34, %v4877_v10  ;;  %v1024_v61 = vmul.f32 %v5510_v37, %v993_v1  ;;  %v1040_v25 = vmul.f32 %v5510_v37, %v994_v52  ;;  %v8486_v0 = vunpack.i.l.bf16 %v5920_v3 }
  0xf1   : > { %v995_v13 = vsel %vm982_vm12, %v8484_v63, %v4876_v22  ;;  %v731_v51 = vsel %vm725_vm8, %v4882_v62, %v8485_v42  ;;  %v4019_v20 = vcombine.low %v5343_v44, %v5346_v45  ;;  %v1039_v10 = vmul.f32 %v5476_v30, %v996_v55 }
  0xf2   : > { %1283 = vmatpush1.bf16.msra.mxu0 %v1051_v19  ;;  %v730_v56 = vsel %vm725_vm8, %v4881_v47, %v8486_v0  ;;  %v1023_v22 = vmul.f32 %v5476_v30, %v995_v13  ;;  %v1056_v32 = vpack.c.bf16 %v1040_v25, %v1024_v61  ;;  %v787_v48 = vmul.f32 %v5516_v5, %v731_v51  ;;  %v8490_v13 = vld [vmem:[#allocation32_spill] sm:$0xff] }
  0xf3   : > { %1384 = vmatprep.subr.bf16.mxu0 %v799_v31  ;;  %v771_v3 = vmul.f32 %v5516_v5, %v730_v56  ;;  %v8487_v19 = vunpack.i.h.bf16 %v5736_v54  ;;  %v8488_v46 = vunpack.i.l.bf16 %v5736_v54  ;;  %v4887_v1 = vunpack.i.h.bf16 %v4885_v58  ;;  %v8494_v56 = vld [vmem:[#allocation13_spill] sm:$0xff] }
  0xf4   : > { %v1055_v17 = vpack.c.bf16 %v1039_v10, %v1023_v22  ;;  %v8491_v61 = vunpack.i.h.bf16 %v8490_v13  ;;  %v8492_v42 = vunpack.i.l.bf16 %v8490_v13  ;;  %v8498_v37 = vunpack.c.l.bf16 %v8497_v14 }
  0xf5   : > { %4033 = vmatmul.mubr.msk.bf16.vlgmr.msra.gmra.mrb[8].mxu0 %vm1165_vm1, %v5695_v60  ;;  %4044 = vmatmul.mubr.msk.bf16.gmra.mrb[28].mxu1 %vm1165_vm1, %v5785_v9  ;;  %v733_v31 = vsel %vm725_vm8, %v8487_v19, %v4882_v62  ;;  %v732_v52 = vsel %vm725_vm8, %v8488_v46, %v4881_v47  ;;  %v803_v41 = vpack.c.bf16 %v787_v48, %v771_v3  ;;  %v8489_v47 = vld [vmem:[#allocation9_spill] sm:$0xff]  ;;  %v6213_v19 = vpop.permute.xlu0 %1147 }
  0xf6   : > { %1385 = vmatpush1.bf16.msra.mxu0 %v798_v35  ;;  %1320 = vmatprep.mubr.bf16.mxu0 %v8437_v59  ;;  %v786_v35 = vmul.f32 %v5495_v38, %v733_v31  ;;  %v770_v34 = vmul.f32 %v5495_v38, %v732_v52  ;;  %v986_v62 = vsel %vm982_vm12, %v4887_v1, %v4857_v40  ;;  %v6216_v52 = vpop.permute.xlu1 %1152  ;;  %v8495_v38 = vld [vmem:[#allocation5_spill] sm:$0xff] }
  0xf7   : > { %1386 = vmatprep.subr.bf16.mxu0 %v4020_v33  ;;  %2415 = vmatprep.mubr.bf16.mxu1 %v8437_v59  ;;  %v4886_v33 = vunpack.i.l.bf16 %v4885_v58  ;;  %v4024_v55 = vcombine.high %v8489_v47, %v5406_v2  ;;  %v988_v25 = vsel %vm982_vm12, %v8491_v61, %v4887_v1  ;;  %v1044_v40 = vmul.f32 %v8493_v24, %v986_v62 }
  0xf8   : > { %v802_v63 = vpack.c.bf16 %v786_v35, %v770_v34  ;;  %v4023_v0 = vcombine.low %v8489_v47, %v5406_v2 }
  0xf9   : > { %v985_v54 = vsel %vm982_vm12, %v4886_v33, %v4856_v43  ;;  %v987_v51 = vsel %vm982_vm12, %v8492_v42, %v4886_v33 }
  0xfa   : > { %1387 = vmatpush1.bf16.msra.mxu0 %v4019_v20  ;;  %v1028_v43 = vmul.f32 %v8493_v24, %v985_v54  ;;  %v1043_v20 = vmul.f32 %v8494_v56, %v988_v25  ;;  %v1027_v10 = vmul.f32 %v8494_v56, %v987_v51 }
  0xfb   : > { %1388 = vmatprep.subr.bf16.mxu0 %v1056_v32 }
  0xfc   : > { %v1060_v22 = vpack.c.bf16 %v1044_v40, %v1028_v43  ;;  %v1059_v32 = vpack.c.bf16 %v1043_v20, %v1027_v10 }
  0xfd   : > { %4034 = vmatmul.mubr.msk.bf16.gmra.mrb[12].mxu0 %vm1165_vm1, %v5785_v9 }
  0xfe   : > { %1389 = vmatpush1.bf16.msra.mxu0 %v1055_v17  ;;  %1416 = vmatprep.mubr.bf16.mxu0 %v8437_v59 }
  0xff   : > { %1490 = vmatprep.subr.bf16.mxu0 %v803_v41 }
 0x105   : > { %4037 = vmatmul.mubr.msk.bf16.vlgmr.msra.gmra.mrb[16].mxu0 %vm1165_vm1, %v5695_v60 }
 0x106   : > { %1491 = vmatpush1.bf16.msra.mxu0 %v802_v63  ;;  %1426 = vmatprep.mubr.bf16.mxu0 %v8437_v59 }
 0x107   : > { %1492 = vmatprep.subr.bf16.mxu0 %v4024_v55 }
 0x10a   : > { %1493 = vmatpush1.bf16.msra.mxu0 %v4023_v0 }
 0x10b   : > { %1494 = vmatprep.subr.bf16.mxu0 %v1060_v22 }
 0x10d   : > { %4038 = vmatmul.mubr.msk.bf16.gmra.mrb[20].mxu0 %vm1165_vm1, %v5785_v9 }
 0x10e   : > { %1495 = vmatpush1.bf16.msra.mxu0 %v1059_v32  ;;  %1522 = vmatprep.mubr.bf16.mxu0 %v8437_v59 }
 0x115   : > { %4041 = vmatmul.mubr.msk.bf16.vlgmr.msra.gmra.mrb[24].mxu0 %vm1165_vm1, %v5695_v60 }
 0x116   : > { %1532 = vmatprep.mubr.bf16.mxu0 %v8437_v59 }
 0x11d   : > { %4042 = vmatmul.mubr.msk.bf16.gmra.mrb[28].mxu0 %vm1165_vm1, %v5785_v9 }
 0x11e   : > { %2362 = vmatprep.mubr.bf16.mxu0 %v8437_v59 }
 0x18e   : > { %v6205_v3 = vpop.f32.mrb[0].mxu1 }
 0x18f   : > { %v6207_v48 = vpop.f32.mrb[1].mxu1 }
 0x190   : > { %v6209_v17 = vpop.f32.mrb[2].mxu1 }
 0x191   : > { %v6211_v58 = vpop.f32.mrb[3].mxu1 }
 0x196   : > { %v1269_v31 = vpop.f32.mrb[4].mxu1 }
 0x197   : > { %v1270_v60 = vadd.f32 %v1269_v31, %v6213_v19  ;;  %v1271_v46 = vpop.f32.mrb[5].mxu1 }
 0x198   : > { %v1272_v9 = vadd.f32 %v1271_v46, %v6213_v19  ;;  %v1273_v41 = vpop.f32.mrb[6].mxu1 }
 0x199   : > { %v4047_v1 = vmul.f32 -1.442695, %v1270_v60  ;;  %v1274_v33 = vadd.f32 %v1273_v41, %v6216_v52  ;;  %v1275_v35 = vpop.f32.mrb[7].mxu1 }
 0x19a   : > { %v4048_v34 = vmul.f32 -1.442695, %v1272_v9  ;;  %v1276_v54 = vadd.f32 %v1275_v35, %v6216_v52 }
 0x19b   : > { %4894 = vpow2.f32 %v4047_v1  ;;  %v4063_v62 = vmul.f32 -1.442695, %v1274_v33 }
 0x19c   : > { %4896 = vpow2.f32 %v4048_v34  ;;  %v4064_v55 = vmul.f32 -1.442695, %v1276_v54 }
 0x19d   : > { %4898 = vpow2.f32 %v4063_v62 }
 0x19e   : > { %4900 = vpow2.f32 %v4064_v55  ;;  %v6221_v63 = vpop.f32.mrb[8].mxu1  ;;  %v6233_v55 = vpop.permute.xlu1 %1137 }
 0x19f   : > { %v6223_v13 = vpop.f32.mrb[9].mxu1 }
 0x1a0   : > { %v6225_v61 = vpop.f32.mrb[10].mxu1 }
 0x1a1   : > { %v6227_v25 = vpop.f32.mrb[11].mxu1 }
 0x1a5   : > { %v4895_v42 = vpop.eup %4894 }
 0x1a6   : > { %v4897_v51 = vpop.eup %4896  ;;  %v1694_v43 = vadd.f32 1.0, %v4895_v42  ;;  %v6235_v42 = vpop.permute.xlu0 %1142 }
 0x1a7   : > { %v1375_v40 = vpop.f32.mrb[12].mxu1  ;;  %v4899_v0 = vpop.eup %4898  ;;  %v1695_v20 = vadd.f32 1.0, %v4897_v51 }
 0x1a8   : > { %v1376_v10 = vadd.f32 %v1375_v40, %v6213_v19  ;;  %v1377_v22 = vpop.f32.mrb[13].mxu1  ;;  %v4901_v32 = vpop.eup %4900  ;;  %4902 = vrcp.f32 %v1694_v43  ;;  %v1710_v31 = vadd.f32 1.0, %v4899_v0 }
 0x1a9   : > { %v1378_v60 = vadd.f32 %v1377_v22, %v6213_v19  ;;  %v1379_v46 = vpop.f32.mrb[14].mxu1  ;;  %4904 = vrcp.f32 %v1695_v20  ;;  %v1711_v9 = vadd.f32 1.0, %v4901_v32  ;;  %v1260_v32 = vadd.f32 %v6205_v3, %v6233_v55 }
 0x1aa   : > { %v4051_v41 = vmul.f32 -1.442695, %v1376_v10  ;;  %v1380_v1 = vadd.f32 %v1379_v46, %v6216_v52  ;;  %v1381_v33 = vpop.f32.mrb[15].mxu1  ;;  %4906 = vrcp.f32 %v1710_v31  ;;  %v1262_v46 = vadd.f32 %v6207_v48, %v6233_v55 }
 0x1ab   : > { %v4052_v35 = vmul.f32 -1.442695, %v1378_v60  ;;  %v1382_v34 = vadd.f32 %v1381_v33, %v6216_v52  ;;  %4908 = vrcp.f32 %v1711_v9 }
 0x1ac   : > { %v4067_v54 = vmul.f32 -1.442695, %v1380_v1  ;;  %4910 = vpow2.f32 %v4051_v41  ;;  %v1264_v1 = vadd.f32 %v6209_v17, %v6235_v42 }
 0x1ad   : > { %v4068_v62 = vmul.f32 -1.442695, %v1382_v34  ;;  %4912 = vpow2.f32 %v4052_v35  ;;  %v1266_v34 = vadd.f32 %v6211_v58, %v6235_v42 }
 0x1ae   : > { %4914 = vpow2.f32 %v4067_v54 }
 0x1af   : > { %v6237_v51 = vpop.f32.mrb[16].mxu1  ;;  %4916 = vpow2.f32 %v4068_v62 }
 0x1b0   : > { %v6241_v40 = vpop.f32.mrb[17].mxu1 }
 0x1b1   : > { %v6245_v20 = vpop.f32.mrb[18].mxu1 }
 0x1b2   : > { %v6249_v22 = vpop.f32.mrb[19].mxu1  ;;  %v4903_v31 = vpop.eup %4902 }
 0x1b3   : > { %v6239_v43 = vpop.f32.mrb[0].mxu0  ;;  %v4905_v9 = vpop.eup %4904  ;;  %v1790_v41 = vmul.f32 %v4903_v31, %v1260_v32 }
 0x1b4   : > { %v6243_v0 = vpop.f32.mrb[1].mxu0  ;;  %v4907_v33 = vpop.eup %4906  ;;  %v6259_v35 = vmul.f32 %v4905_v9, %v1262_v46 }
 0x1b5   : > { %v6247_v10 = vpop.f32.mrb[2].mxu0  ;;  %v4909_v54 = vpop.eup %4908  ;;  %v1806_v62 = vmul.f32 %v4907_v33, %v1264_v1  ;;  %v8496_v1 = vunpack.c.l.bf16 %v8495_v38 }
 0x1b6   : > { %v6253_v60 = vpop.f32.mrb[3].mxu0  ;;  %v4911_v3 = vpop.eup %4910  ;;  %v6263_v53 = vmul.f32 %v4909_v54, %v1266_v34 }
 0x1b7   : > { %v1481_v23 = vpop.f32.mrb[20].mxu1  ;;  %v4913_v24 = vpop.eup %4912  ;;  %v1698_v56 = vadd.f32 1.0, %v4911_v3  ;;  %v6270_v33 = vadd.f32 %v1790_v41, %v8496_v1 }
 0x1b8   : > { %v1482_v32 = vadd.f32 %v1481_v23, %v6213_v19  ;;  %v1483_v31 = vpop.f32.mrb[21].mxu1  ;;  %v4915_v28 = vpop.eup %4914  ;;  %v1699_v17 = vadd.f32 1.0, %v4913_v24  ;;  %v6275_v24 = vadd.f32 %v1806_v62, %v8498_v37 }
 0x1b9   : > { %v1484_v5 = vadd.f32 %v1483_v31, %v6213_v19  ;;  %v1485_v58 = vpop.f32.mrb[22].mxu1  ;;  %v4917_v34 = vpop.eup %4916  ;;  %4918 = vrcp.f32 %v1698_v56  ;;  %v1714_v54 = vadd.f32 1.0, %v4915_v28 }
 0x1ba   : > { %v1487_v23 = vpop.f32.mrb[23].mxu1  ;;  %4920 = vrcp.f32 %v1699_v17  ;;  %v4055_v31 = vmul.f32 -1.442695, %v1482_v32  ;;  %v1486_v56 = vadd.f32 %v1485_v58, %v6216_v52 }
 0x1bb   : > { %v1216_v48 = vpop.f32.mrb[4].mxu0  ;;  %4922 = vrcp.f32 %v1714_v54  ;;  %v4056_v28 = vmul.f32 -1.442695, %v1484_v5  ;;  %v1488_v1 = vadd.f32 %v1487_v23, %v6216_v52 }
 0x1bc   : > { %v1217_v46 = vadd.f32 %v1216_v48, %v6213_v19  ;;  %v1218_v9 = vpop.f32.mrb[5].mxu0  ;;  %v1715_v48 = vadd.f32 1.0, %v4917_v34  ;;  %v4071_v32 = vmul.f32 -1.442695, %v1486_v56 }
 0x1bd   : > { %v1219_v3 = vadd.f32 %v1218_v9, %v6213_v19  ;;  %v1220_v36 = vpop.f32.mrb[6].mxu0 }
 0x1be   : > { %v4045_v30 = vmul.f32 -1.442695, %v1217_v46  ;;  %v1222_v29 = vpop.f32.mrb[7].mxu0  ;;  %v1221_v41 = vadd.f32 %v1220_v36, %v6216_v52  ;;  %4924 = vrcp.f32 %v1715_v48  ;;  %v4072_v36 = vmul.f32 -1.442695, %v1488_v1 }
 0x1bf   : > { %v4046_v57 = vmul.f32 -1.442695, %v1219_v3  ;;  %v1223_v9 = vadd.f32 %v1222_v29, %v6216_v52  ;;  %v1370_v3 = vadd.f32 %v6225_v61, %v6235_v42 }
 0x1c0   : > { %4926 = vpow2.f32 %v4045_v30  ;;  %v4061_v37 = vmul.f32 -1.442695, %v1221_v41  ;;  %v6283_v46 = vpop.f32.mrb[24].mxu1  ;;  %v1366_v30 = vadd.f32 %v6221_v63, %v6233_v55  ;;  %v1372_v63 = vadd.f32 %v6227_v25, %v6235_v42 }
 0x1c1   : > { %4928 = vpow2.f32 %v4055_v31  ;;  %v4062_v17 = vmul.f32 -1.442695, %v1223_v9  ;;  %v6285_v58 = vpop.f32.mrb[25].mxu1 }
 0x1c2   : > { %4930 = vpow2.f32 %v4046_v57  ;;  %v6287_v5 = vpop.f32.mrb[26].mxu1  ;;  %v1368_v57 = vadd.f32 %v6223_v13, %v6233_v55 }
 0x1c3   : > { %4932 = vpow2.f32 %v4056_v28  ;;  %v6291_v29 = vpop.f32.mrb[27].mxu1  ;;  %v4919_v34 = vpop.eup %4918 }
 0x1c4   : > { %4934 = vpow2.f32 %v4061_v37  ;;  %v4921_v54 = vpop.eup %4920  ;;  %v6299_v48 = vmul.f32 %v4919_v34, %v1366_v30 }
 0x1c5   : > { %4936 = vpow2.f32 %v4071_v32  ;;  %v4923_v31 = vpop.eup %4922  ;;  %v6305_v56 = vmul.f32 %v4921_v54, %v1368_v57 }
 0x1c6   : > { %4938 = vpow2.f32 %v4062_v17  ;;  %v6309_v9 = vmul.f32 %v4923_v31, %v1370_v3 }
 0x1c7   : > { %4940 = vpow2.f32 %v4072_v36 }
 0x1c8   : > { %v6297_v23 = vpop.f32.mrb[8].mxu0  ;;  %v4925_v28 = vpop.eup %4924 }
 0x1c9   : > { %v6303_v41 = vpop.f32.mrb[9].mxu0  ;;  %v1587_v37 = vpop.f32.mrb[28].mxu1  ;;  %v6313_v32 = vmul.f32 %v4925_v28, %v1372_v63 }
 0x1ca   : > { %v6307_v13 = vpop.f32.mrb[10].mxu0  ;;  %v4927_v1 = vpop.eup %4926  ;;  %v1588_v62 = vadd.f32 %v1587_v37, %v6213_v19 }
 0x1cb   : > { %v6311_v61 = vpop.f32.mrb[11].mxu0  ;;  %v4929_v17 = vpop.eup %4928  ;;  %v1692_v36 = vadd.f32 1.0, %v4927_v1 }
 0x1cc   : > { %v1589_v30 = vpop.f32.mrb[29].mxu1  ;;  %v4931_v34 = vpop.eup %4930  ;;  %v1702_v25 = vadd.f32 1.0, %v4929_v17  ;;  %v4059_v37 = vmul.f32 -1.442695, %v1588_v62 }
 0x1cd   : > { %v1591_v57 = vpop.f32.mrb[30].mxu1  ;;  %v4933_v54 = vpop.eup %4932  ;;  %4942 = vrcp.f32 %v1692_v36  ;;  %v1693_v11 = vadd.f32 1.0, %v4931_v34  ;;  %v1590_v28 = vadd.f32 %v1589_v30, %v6213_v19 }
 0x1ce   : > { %v1593_v16 = vpop.f32.mrb[31].mxu1  ;;  %v4935_v3 = vpop.eup %4934  ;;  %4944 = vrcp.f32 %v1702_v25  ;;  %v1703_v31 = vadd.f32 1.0, %v4933_v54  ;;  %v1592_v54 = vadd.f32 %v1591_v57, %v6216_v52  ;;  %v1472_v57 = vadd.f32 %v6237_v51, %v6233_v55 }
 0x1cf   : > { %v4937_v15 = vpop.eup %4936  ;;  %4946 = vrcp.f32 %v1693_v11  ;;  %v1708_v8 = vadd.f32 1.0, %v4935_v3  ;;  %v4060_v62 = vmul.f32 -1.442695, %v1590_v28  ;;  %v1209_v28 = vadd.f32 %v6243_v0, %v6233_v55 }
 0x1d0   : > { %v1322_v63 = vpop.f32.mrb[12].mxu0  ;;  %v4939_v1 = vpop.eup %4938  ;;  %4948 = vrcp.f32 %v1703_v31  ;;  %v1718_v59 = vadd.f32 1.0, %v4937_v15 }
 0x1d1   : > { %v1323_v17 = vadd.f32 %v1322_v63, %v6213_v19  ;;  %v1324_v12 = vpop.f32.mrb[13].mxu0  ;;  %v4941_v4 = vpop.eup %4940  ;;  %4950 = vrcp.f32 %v1708_v8  ;;  %v1709_v36 = vadd.f32 1.0, %v4939_v1  ;;  %v1594_v8 = vadd.f32 %v1593_v16, %v6216_v52 }
 0x1d2   : > { %v1325_v34 = vadd.f32 %v1324_v12, %v6213_v19  ;;  %v1326_v25 = vpop.f32.mrb[14].mxu0  ;;  %4952 = vrcp.f32 %v1718_v59  ;;  %v1719_v11 = vadd.f32 1.0, %v4941_v4  ;;  %v1207_v12 = vadd.f32 %v6239_v43, %v6233_v55 }
 0x1d3   : > { %v4049_v3 = vmul.f32 -1.442695, %v1323_v17  ;;  %v1327_v30 = vadd.f32 %v1326_v25, %v6216_v52  ;;  %v1328_v39 = vpop.f32.mrb[15].mxu0  ;;  %4954 = vrcp.f32 %v1709_v36  ;;  %v4075_v59 = vmul.f32 -1.442695, %v1592_v54 }
 0x1d4   : > { %v4050_v15 = vmul.f32 -1.442695, %v1325_v34  ;;  %v1329_v31 = vadd.f32 %v1328_v39, %v6216_v52  ;;  %4956 = vrcp.f32 %v1719_v11  ;;  %v4076_v16 = vmul.f32 -1.442695, %v1594_v8 }
 0x1d5   : > { %4958 = vpow2.f32 %v4049_v3  ;;  %v4065_v63 = vmul.f32 -1.442695, %v1327_v30  ;;  %v1211_v11 = vadd.f32 %v6247_v10, %v6235_v42  ;;  %v8499_v3 = vunpack.c.l.bf16 %v5275_v18 }
 0x1d6   : > { %4960 = vpow2.f32 %v4059_v37  ;;  %v4066_v1 = vmul.f32 -1.442695, %v1329_v31  ;;  %v1474_v37 = vadd.f32 %v6241_v40, %v6233_v55  ;;  %v1476_v40 = vadd.f32 %v6245_v20, %v6235_v42 }
 0x1d7   : > { %v4943_v4 = vpop.eup %4942  ;;  %4962 = vpow2.f32 %v4050_v15  ;;  %v8500_v20 = vunpack.c.l.bf16 %v5280_v21 }
 0x1d8   : > { %v6327_v17 = vpop.f32.mrb[16].mxu0  ;;  %v4945_v39 = vpop.eup %4944  ;;  %4964 = vpow2.f32 %v4060_v62  ;;  %v1788_v34 = vmul.f32 %v4943_v4, %v1207_v12 }
 0x1d9   : > { %v6331_v36 = vpop.f32.mrb[17].mxu0  ;;  %v4947_v43 = vpop.eup %4946  ;;  %4966 = vpow2.f32 %v4065_v63  ;;  %v6337_v51 = vmul.f32 %v4945_v39, %v1472_v57  ;;  %v1213_v63 = vadd.f32 %v6253_v60, %v6235_v42 }
 0x1da   : > { %v6335_v25 = vpop.f32.mrb[18].mxu0  ;;  %v4949_v54 = vpop.eup %4948  ;;  %4968 = vpow2.f32 %v4075_v59  ;;  %v6345_v30 = vadd.f32 %v1788_v34, %v8499_v3  ;;  %v1789_v15 = vmul.f32 %v4947_v43, %v1209_v28  ;;  %v1478_v59 = vadd.f32 %v6249_v22, %v6235_v42 }
 0x1db   : > { %v6341_v0 = vpop.f32.mrb[19].mxu0  ;;  %v4951_v31 = vpop.eup %4950  ;;  %4970 = vpow2.f32 %v4066_v1  ;;  %v6349_v62 = vmul.f32 %v4949_v54, %v1474_v37  ;;  %v8501_v22 = vunpack.c.h.bf16 %v5280_v21 }
 0x1dc   : > { %v4953_v8 = vpop.eup %4952  ;;  %4972 = vpow2.f32 %v4076_v16  ;;  %1884 = vrot.lane.b32.xlu1 %v6345_v30, %s5174_s8  ;;  %v1804_v10 = vmul.f32 %v4951_v31, %v1211_v11 }
 0x1dd   : > { %v4955_v12 = vpop.eup %4954  ;;  %v6357_v4 = vmul.f32 %v4953_v8, %v1476_v40 }
 0x1de   : > { %v4957_v57 = vpop.eup %4956  ;;  %v6361_v1 = vadd.f32 %v1804_v10, %v8500_v20  ;;  %v1805_v39 = vmul.f32 %v4955_v12, %v1213_v63 }
 0x1df   : > { %v4959_v28 = vpop.eup %4958  ;;  %v6363_v60 = vmul.f32 %v4957_v57, %v1478_v59  ;;  %v8502_v59 = vunpack.c.h.bf16 %v5275_v18 }
 0x1e0   : > { %v1428_v34 = vpop.f32.mrb[20].mxu0  ;;  %v4961_v16 = vpop.eup %4960  ;;  %v1696_v43 = vadd.f32 1.0, %v4959_v28  ;;  %1886 = vrot.lane.b32.xlu0 %v6361_v1, %s5174_s8  ;;  %1892 = vrot.lane.b32.xlu1 %v6270_v33, %s5174_s8  ;;  %v6371_v54 = vadd.f32 %v1805_v39, %v8501_v22 }
 0x1e1   : > { %v1430_v37 = vpop.f32.mrb[21].mxu0  ;;  %v4963_v3 = vpop.eup %4962  ;;  %v1706_v31 = vadd.f32 1.0, %v4961_v16  ;;  %v1429_v10 = vadd.f32 %v1428_v34, %v6213_v19  ;;  %v6378_v57 = vadd.f32 %v1789_v15, %v8502_v59 }
 0x1e2   : > { %v1432_v40 = vpop.f32.mrb[22].mxu0  ;;  %v4965_v8 = vpop.eup %4964  ;;  %4974 = vrcp.f32 %v1696_v43  ;;  %v1697_v63 = vadd.f32 1.0, %v4963_v3  ;;  %v1431_v39 = vadd.f32 %v1430_v37, %v6213_v19 }
 0x1e3   : > { %v1434_v12 = vpop.f32.mrb[23].mxu0  ;;  %v4967_v20 = vpop.eup %4966  ;;  %4976 = vrcp.f32 %v1706_v31  ;;  %v1707_v21 = vadd.f32 1.0, %v4965_v8  ;;  %v1433_v16 = vadd.f32 %v1432_v40, %v6216_v52  ;;  %v4053_v31 = vmul.f32 -1.442695, %v1429_v10 }
 0x1e4   : > { %v4969_v28 = vpop.eup %4968  ;;  %4978 = vrcp.f32 %v1697_v63  ;;  %v1712_v22 = vadd.f32 1.0, %v4967_v20  ;;  %1894 = vrot.lane.b32.xlu0 %v6275_v24, %s5174_s8  ;;  %2084 = vrot.lane.b32.xlu1 %v6270_v33, %s5175_s9  ;;  %v1435_v43 = vadd.f32 %v1434_v12, %v6216_v52  ;;  %v4054_v8 = vmul.f32 -1.442695, %v1431_v39 }
 0x1e5   : > { %v4971_v15 = vpop.eup %4970  ;;  %4980 = vrcp.f32 %v1707_v21  ;;  %v1722_v34 = vadd.f32 1.0, %v4969_v28  ;;  %v4069_v59 = vmul.f32 -1.442695, %v1433_v16  ;;  %v8503_v39 = vunpack.c.h.bf16 %v8495_v38 }
 0x1e6   : > { %v4973_v37 = vpop.eup %4972  ;;  %4982 = vrcp.f32 %v1712_v22  ;;  %v1713_v3 = vadd.f32 1.0, %v4971_v15  ;;  %v4070_v12 = vmul.f32 -1.442695, %v1435_v43  ;;  %v1313_v22 = vadd.f32 %v6297_v23, %v6233_v55 }
 0x1e7   : > { %4984 = vrcp.f32 %v1722_v34  ;;  %v1723_v40 = vadd.f32 1.0, %v4973_v37  ;;  %v6404_v28 = vadd.f32 %v6259_v35, %v8503_v39  ;;  %v1578_v15 = vadd.f32 %v6283_v46, %v6233_v55 }
 0x1e8   : > { %v6389_v63 = vpop.f32.mrb[24].mxu0  ;;  %4986 = vrcp.f32 %v1713_v3  ;;  %2086 = vrot.lane.b32.xlu0 %v6275_v24, %s5175_s9  ;;  %1888 = vrot.lane.b32.xlu1 %v6378_v57, %s5174_s8  ;;  %v1315_v38 = vadd.f32 %v6303_v41, %v6233_v55  ;;  %v1580_v23 = vadd.f32 %v6285_v58, %v6233_v55  ;;  %v8504_v37 = vunpack.c.h.bf16 %v8497_v14 }
 0x1e9   : > { %v6391_v20 = vpop.f32.mrb[25].mxu0  ;;  %4988 = vrcp.f32 %v1723_v40  ;;  %v1317_v40 = vadd.f32 %v6307_v13, %v6235_v42  ;;  %v1319_v13 = vadd.f32 %v6311_v61, %v6235_v42 }
 0x1ea   : > { %v6397_v21 = vpop.f32.mrb[26].mxu0  ;;  %4990 = vpow2.f32 %v4053_v31  ;;  %v6421_v46 = vadd.f32 %v6263_v53, %v8504_v37 }
 0x1eb   : > { %v6399_v10 = vpop.f32.mrb[27].mxu0  ;;  %4992 = vpow2.f32 %v4054_v8 }
 0x1ec   : > { %v4975_v16 = vpop.eup %4974  ;;  %4994 = vpow2.f32 %v4069_v59  ;;  %1890 = vrot.lane.b32.xlu0 %v6371_v54, %s5174_s8  ;;  %1896 = vrot.lane.b32.xlu1 %v6404_v28, %s5174_s8 }
 0x1ed   : > { %v4977_v34 = vpop.eup %4976  ;;  %4996 = vpow2.f32 %v4070_v12  ;;  %v1792_v35 = vmul.f32 %v4975_v16, %v1313_v22  ;;  %v1582_v12 = vadd.f32 %v6287_v5, %v6235_v42  ;;  %v1584_v22 = vadd.f32 %v6291_v29, %v6235_v42 }
 0x1ee   : > { %v4979_v43 = vpop.eup %4978  ;;  %v6423_v3 = vmul.f32 %v4977_v34, %v1578_v15  ;;  %v8507_v29 = vunpack.c.l.bf16 %v5290_v27 }
 0x1ef   : > { %v4981_v31 = vpop.eup %4980  ;;  %v1793_v59 = vmul.f32 %v4979_v43, %v1315_v38 }
 0x1f0   : > { %v1534_v8 = vpop.f32.mrb[28].mxu0  ;;  %v4983_v41 = vpop.eup %4982  ;;  %1898 = vrot.lane.b32.xlu0 %v6421_v46, %s5174_s8  ;;  %2080 = vrot.lane.b32.xlu1 %v6378_v57, %s5175_s9  ;;  %v1803_v14 = vmul.f32 %v4981_v31, %v1580_v23 }
 0x1f1   : > { %v1535_v39 = vadd.f32 %v1534_v8, %v6213_v19  ;;  %v1536_v58 = vpop.f32.mrb[29].mxu0  ;;  %v4985_v53 = vpop.eup %4984  ;;  %v1808_v15 = vmul.f32 %v4983_v41, %v1317_v40  ;;  %v8505_v8 = vunpack.c.h.bf16 %v5419_v6 }
 0x1f2   : > { %v1537_v16 = vadd.f32 %v1536_v58, %v6213_v19  ;;  %v1538_v5 = vpop.f32.mrb[30].mxu0  ;;  %v4987_v34 = vpop.eup %4986  ;;  %v6444_v23 = vmul.f32 %v4985_v53, %v1582_v12  ;;  %v8508_v58 = vunpack.c.l.bf16 %v5287_v26 }
 0x1f3   : > { %v4057_v38 = vmul.f32 -1.442695, %v1535_v39  ;;  %v1539_v43 = vadd.f32 %v1538_v5, %v6216_v52  ;;  %v1540_v37 = vpop.f32.mrb[31].mxu0  ;;  %v6442_v11 = vadd.f32 %v1803_v14, %v8505_v8  ;;  %v4989_v31 = vpop.eup %4988  ;;  %v6449_v19 = vadd.f32 %v1808_v15, %v8507_v29 }
 0x1f4   : > { %v4058_v61 = vmul.f32 -1.442695, %v1537_v16  ;;  %v1541_v18 = vadd.f32 %v1540_v37, %v6216_v52  ;;  %v1809_v40 = vmul.f32 %v4987_v34, %v1319_v13  ;;  %v4991_v41 = vpop.eup %4990  ;;  %2082 = vrot.lane.b32.xlu0 %v6371_v54, %s5175_s9  ;;  %v1819_v12 = vmul.f32 %v4989_v31, %v1584_v22 }
 0x1f5   : > { %8506 = vst [vmem:[#allocation9_spill] sm:$0xff] %v6442_v11  ;;  %4998 = vpow2.f32 %v4057_v38  ;;  %v4073_v39 = vmul.f32 -1.442695, %v1539_v43  ;;  %1944 = vrot.lane.b32.xlu1 %v6442_v11, %s5174_s8  ;;  %v6457_v14 = vadd.f32 %v1792_v35, %v8508_v58  ;;  %v4993_v52 = vpop.eup %4992  ;;  %v1700_v53 = vadd.f32 1.0, %v4991_v41 }
 0x1f6   : > { %5000 = vpow2.f32 %v4058_v61  ;;  %v8509_v16 = vunpack.c.h.bf16 %v5287_v26  ;;  %v8510_v5 = vunpack.c.h.bf16 %v5290_v27  ;;  %v4995_v34 = vpop.eup %4994  ;;  %v1701_v38 = vadd.f32 1.0, %v4993_v52 }
 0x1f7   : > { %5002 = vpow2.f32 %v4073_v39  ;;  %v8511_v22 = vunpack.c.h.bf16 %v5422_v7  ;;  %v2048_v35 = vpack.c.bf16 %v6449_v19, %v6457_v14  ;;  %v4997_v37 = vpop.eup %4996  ;;  %v1716_v8 = vadd.f32 1.0, %v4995_v34 }
 0x1f8   : > { %v6461_v13 = vadd.f32 %v1793_v59, %v8509_v16  ;;  %v6465_v15 = vadd.f32 %v1809_v40, %v8510_v5  ;;  %5004 = vrcp.f32 %v1700_v53  ;;  %v4074_v26 = vmul.f32 -1.442695, %v1541_v18 }
 0x1f9   : > { %v6469_v43 = vadd.f32 %v1819_v12, %v8511_v22  ;;  %5006 = vrcp.f32 %v1701_v38  ;;  %v1717_v27 = vadd.f32 1.0, %v4997_v37  ;;  %2076 = vrot.lane.b32.xlu1 %v6345_v30, %s5175_s9  ;;  %v1419_v40 = vadd.f32 %v6327_v17, %v6233_v55 }
 0x1fa   : > { %v2049_v59 = vpack.c.bf16 %v6465_v15, %v6461_v13  ;;  %5008 = vrcp.f32 %v1716_v8  ;;  %v1421_v12 = vadd.f32 %v6331_v36, %v6233_v55  ;;  %v1423_v53 = vadd.f32 %v6335_v25, %v6235_v42 }
 0x1fb   : > { %8512 = vst [vmem:[#allocation32_spill] sm:$0xff] %v6469_v43  ;;  %1946 = vrot.lane.b32.xlu0 %v6469_v43, %s5174_s8  ;;  %5010 = vrcp.f32 %v1717_v27  ;;  %v1425_v5 = vadd.f32 %v6341_v0, %v6235_v42  ;;  %v8513_v25 = vunpack.c.l.bf16 %v5343_v44  ;;  %v8514_v27 = vunpack.c.l.bf16 %v5346_v45 }
 0x1fc   : > { %5012 = vpow2.f32 %v4074_v26 }
 0x1fd   : > { %2088 = vrot.lane.b32.xlu1 %v6404_v28, %s5175_s9 }
 0x1ff   : > { %2078 = vrot.lane.b32.xlu0 %v6361_v1, %s5175_s9  ;;  %v4999_v18 = vpop.eup %4998 }
 0x200   : > { %v5001_v31 = vpop.eup %5000  ;;  %v1704_v61 = vadd.f32 1.0, %v4999_v18  ;;  %v8515_v18 = vunpack.c.h.bf16 %v5343_v44  ;;  %v1525_v44 = vadd.f32 %v6389_v63, %v6233_v55 }
 0x201   : > { %v5003_v29 = vpop.eup %5002  ;;  %v1705_v41 = vadd.f32 1.0, %v5001_v31  ;;  %2092 = vrot.lane.b32.xlu1 %v6457_v14, %s5175_s9 }
 0x202   : > { %v5005_v39 = vpop.eup %5004  ;;  %5014 = vrcp.f32 %v1704_v61  ;;  %v1720_v58 = vadd.f32 1.0, %v5003_v29  ;;  %v8516_v61 = vunpack.c.h.bf16 %v5346_v45 }
 0x203   : > { %2090 = vrot.lane.b32.xlu0 %v6421_v46, %s5175_s9  ;;  %v5007_v52 = vpop.eup %5006  ;;  %5016 = vrcp.f32 %v1705_v41  ;;  %v1796_v16 = vmul.f32 %v5005_v39, %v1419_v40  ;;  %v8517_v39 = vld [vmem:[#allocation7_spill] sm:$0xff] }
 0x204   : > { %v5009_v17 = vpop.eup %5008  ;;  %5018 = vrcp.f32 %v1720_v58  ;;  %v1797_v34 = vmul.f32 %v5007_v52, %v1421_v12  ;;  %v8518_v45 = vunpack.c.l.bf16 %v8517_v39  ;;  %v1527_v52 = vadd.f32 %v6391_v20, %v6233_v55 }
 0x205   : > { %v5011_v38 = vpop.eup %5010  ;;  %1900 = vrot.lane.b32.xlu1 %v6457_v14, %s5174_s8  ;;  %v1812_v36 = vmul.f32 %v5009_v17, %v1423_v53  ;;  %v6501_v26 = vadd.f32 %v1796_v16, %v8513_v25  ;;  %v1529_v16 = vadd.f32 %v6397_v21, %v6235_v42  ;;  %v8521_v55 = vunpack.c.h.bf16 %v8517_v39 }
 0x206   : > { %v5013_v22 = vpop.eup %5012  ;;  %v1813_v37 = vmul.f32 %v5011_v38, %v1425_v5  ;;  %v6509_v31 = vadd.f32 %v1797_v34, %v8515_v18  ;;  %v6528_v12 = vadd.f32 %v6299_v48, %v8518_v45  ;;  %v8519_v34 = vld [vmem:[#allocation8_spill] sm:$0xff]  ;;  %v8528_v39 = vunpack.c.h.bf16 %v5359_v49 }
 0x207   : > { %2094 = vrot.lane.b32.xlu0 %v6449_v19, %s5175_s9  ;;  %v1721_v8 = vadd.f32 1.0, %v5013_v22  ;;  %v6505_v0 = vadd.f32 %v1812_v36, %v8514_v27  ;;  %v8520_v48 = vunpack.c.l.bf16 %v8519_v34  ;;  %v6546_v20 = vadd.f32 %v6305_v56, %v8521_v55  ;;  %v4084_v55 = vld [vmem:[%s8226_s2 + $0x38] sm:$0xff] }
 0x208   : > { %v6513_v29 = vadd.f32 %v1813_v37, %v8516_v61  ;;  %v8522_v36 = vunpack.c.l.bf16 %v8489_v47  ;;  %v8523_v37 = vunpack.c.l.bf16 %v5406_v2  ;;  %v8525_v25 = vunpack.c.h.bf16 %v8519_v34 }
 0x209   : > { %5020 = vrcp.f32 %v1721_v8  ;;  %1904 = vrot.lane.b32.xlu1 %v6461_v13, %s5174_s8  ;;  %v2052_v40 = vpack.c.bf16 %v6505_v0, %v6501_v26  ;;  %v6541_v38 = vadd.f32 %v6309_v9, %v8520_v48  ;;  %v1531_v8 = vadd.f32 %v6399_v10, %v6235_v42  ;;  %v4081_v48 = vld [vmem:[%s8226_s2 + $0x20] sm:$0xff] }
 0x20a   : > { %v2053_v41 = vpack.c.bf16 %v6513_v29, %v6509_v31  ;;  %v6565_v27 = vadd.f32 %v6313_v32, %v8525_v25  ;;  %v8526_v42 = vunpack.c.l.bf16 %v5359_v49  ;;  %v8527_v10 = vunpack.c.l.bf16 %v5362_v50 }
 0x20b   : > { %1902 = vrot.lane.b32.xlu0 %v6449_v19, %s5174_s8  ;;  %v6610_v45 = vadd.f32 %v6349_v62, %v8528_v39  ;;  %v8530_v49 = vunpack.c.h.bf16 %v8489_v47  ;;  %v8532_v62 = vunpack.c.l.bf16 %v5422_v7  ;;  %v8536_v47 = vunpack.c.h.bf16 %v5406_v2  ;;  %v4083_v2 = vld [vmem:[%s8226_s2 + $0x30] sm:$0xff] }
 0x20c   : > { %v5015_v58 = vpop.eup %5014  ;;  %v6596_v32 = vadd.f32 %v6337_v51, %v8526_v42  ;;  %v8529_v51 = vunpack.c.h.bf16 %v5362_v50 }
 0x20d   : > { %v5017_v53 = vpop.eup %5016  ;;  %1908 = vrot.lane.b32.xlu1 %v6528_v12, %s5174_s8  ;;  %v1800_v63 = vmul.f32 %v5015_v58, %v1525_v44  ;;  %v6605_v44 = vadd.f32 %v6357_v4, %v8527_v10  ;;  %v6652_v4 = vadd.f32 %v6444_v23, %v8532_v62  ;;  %v4082_v10 = vld [vmem:[%s8226_s2 + $0x28] sm:$0xff] }
 0x20e   : > { %v5019_v17 = vpop.eup %5018  ;;  %v1801_v5 = vmul.f32 %v5017_v53, %v1527_v52  ;;  %v6619_v58 = vadd.f32 %v6363_v60, %v8529_v51  ;;  %v8534_v60 = vunpack.c.l.bf16 %v5419_v6 }
 0x20f   : > { %1906 = vrot.lane.b32.xlu0 %v6465_v15, %s5174_s8  ;;  %v1816_v21 = vmul.f32 %v5019_v17, %v1529_v16  ;;  %v6554_v22 = vadd.f32 %v1800_v63, %v8522_v36  ;;  %8533 = vst [vmem:[#allocation7_spill] sm:$0xff] %v6652_v4 }
 0x210   : > { %v6643_v50 = vadd.f32 %v1801_v5, %v8530_v49  ;;  %v6657_v52 = vadd.f32 %v6423_v3, %v8534_v60  ;;  %v8540_v60 = vld [vmem:[#allocation19_spill] sm:$0xff]  ;;  %v3026_v5 = vld [vmem:[%s8227_s3 + $0x80] sm:$0xff] }
 0x211   : > { %1912 = vrot.lane.b32.xlu1 %v6546_v20, %s5174_s8  ;;  %v6558_v9 = vadd.f32 %v1816_v21, %v8523_v37 }
 0x212   : > { %8531 = vst [vmem:[#allocation6_spill] sm:$0xff] %v6643_v50  ;;  %8535 = vst [vmem:[#allocation8_spill] sm:$0xff] %v6657_v52 }
 0x213   : > { %1910 = vrot.lane.b32.xlu0 %v6541_v38, %s5174_s8  ;;  %8524 = vst [vmem:[#allocation5_spill] sm:$0xff] %v6558_v9  ;;  %v5021_v56 = vpop.eup %5020 }
 0x214   : > { %v1817_v61 = vmul.f32 %v5021_v56, %v1531_v8  ;;  %v8539_v8 = vld [vmem:[#allocation30_spill] sm:$0xff] }
 0x215   : > { %2096 = vrot.lane.b32.xlu1 %v6461_v13, %s5175_s9 }
 0x216   : > { %v6665_v53 = vadd.f32 %v1817_v61, %v8536_v47 }
 0x217   : > { %1914 = vrot.lane.b32.xlu0 %v6565_v27, %s5174_s8 }
 0x218   : > { %8537 = vst [vmem:[#allocation44_spill] sm:$0xff] %v6665_v53 }
 0x219   : > { %2100 = vrot.lane.b32.xlu1 %v6528_v12, %s5175_s9 }
 0x21b   : > { %2098 = vrot.lane.b32.xlu0 %v6465_v15, %s5175_s9 }
 0x21d   : > { %2104 = vrot.lane.b32.xlu1 %v6546_v20, %s5175_s9 }
 0x21f   : > { %2102 = vrot.lane.b32.xlu0 %v6541_v38, %s5175_s9 }
 0x221   : > { %2108 = vrot.lane.b32.xlu1 %v6501_v26, %s5175_s9 }
 0x223   : > { %2106 = vrot.lane.b32.xlu0 %v6565_v27, %s5175_s9 }
 0x225   : > { %1916 = vrot.lane.b32.xlu1 %v6501_v26, %s5174_s8 }
 0x227   : > { %2110 = vrot.lane.b32.xlu0 %v6505_v0, %s5175_s9 }
 0x229   : > { %1920 = vrot.lane.b32.xlu1 %v6509_v31, %s5174_s8 }
 0x22b   : > { %1918 = vrot.lane.b32.xlu0 %v6505_v0, %s5174_s8 }
 0x22d   : > { %1924 = vrot.lane.b32.xlu1 %v6596_v32, %s5174_s8 }
 0x22f   : > { %1922 = vrot.lane.b32.xlu0 %v6513_v29, %s5174_s8 }
 0x231   : > { %1928 = vrot.lane.b32.xlu1 %v6610_v45, %s5174_s8 }
 0x233   : > { %1926 = vrot.lane.b32.xlu0 %v6605_v44, %s5174_s8 }
 0x235   : > { %2112 = vrot.lane.b32.xlu1 %v6509_v31, %s5175_s9 }
 0x237   : > { %1930 = vrot.lane.b32.xlu0 %v6619_v58, %s5174_s8 }
 0x239   : > { %2116 = vrot.lane.b32.xlu1 %v6596_v32, %s5175_s9 }
 0x23b   : > { %2114 = vrot.lane.b32.xlu0 %v6513_v29, %s5175_s9 }
 0x23d   : > { %2120 = vrot.lane.b32.xlu1 %v6610_v45, %s5175_s9 }
 0x23f   : > { %2118 = vrot.lane.b32.xlu0 %v6605_v44, %s5175_s9 }
 0x241   : > { %2124 = vrot.lane.b32.xlu1 %v6554_v22, %s5175_s9 }
 0x243   : > { %2122 = vrot.lane.b32.xlu0 %v6619_v58, %s5175_s9 }
 0x245   : > { %1932 = vrot.lane.b32.xlu1 %v6554_v22, %s5174_s8 }
 0x247   : > { %2126 = vrot.lane.b32.xlu0 %v6558_v9, %s5175_s9 }
 0x249   : > { %1936 = vrot.lane.b32.xlu1 %v6643_v50, %s5174_s8 }
 0x24b   : > { %1934 = vrot.lane.b32.xlu0 %v6558_v9, %s5174_s8 }
 0x24d   : > { %1940 = vrot.lane.b32.xlu1 %v6657_v52, %s5174_s8 }
 0x24e   : > { %v1885_v16 = vpop.permute.xlu1 %1884 }
 0x24f   : > { %1942 = vrot.lane.b32.xlu0 %v6652_v4, %s5174_s8 }
 0x251   : > { %2128 = vrot.lane.b32.xlu1 %v6643_v50, %s5175_s9 }
 0x252   : > { %v1887_v6 = vpop.permute.xlu0 %1886  ;;  %v1893_v7 = vpop.permute.xlu1 %1892 }
 0x253   : > { %1938 = vrot.lane.b32.xlu0 %v6665_v53, %s5174_s8  ;;  %s4136_s8 = sshll.u32 (%p5233_p5), %s3969_s18, 3 }
 0x254   : > { %s3876_s10 = scalar_lea.vmem (%p5233_p5), %s8228_s4, %s4136_s8 }
 0x255   : > { %2132 = vrot.lane.b32.xlu1 %v6657_v52, %s5175_s9 }
 0x256   : > { %v1895_v3 = vpop.permute.xlu0 %1894  ;;  %v6675_v23 = vpop.permute.xlu1 %2084 }
 0x257   : > { %2134 = vrot.lane.b32.xlu0 %v6652_v4, %s5175_s9 }
 0x259   : > { %2136 = vrot.lane.b32.xlu1 %v6442_v11, %s5175_s9 }
 0x25a   : > { %v2087_v63 = vpop.permute.xlu0 %2086  ;;  %v1889_v17 = vpop.permute.xlu1 %1888 }
 0x25b   : > { %2130 = vrot.lane.b32.xlu0 %v6665_v53, %s5175_s9  ;;  %v1976_v34 = vsel %vm725_vm8, %v1885_v16, %v1889_v17  ;;  %v1974_v39 = vsel %vm725_vm8, %v1889_v17, %v1893_v7  ;;  %v2047_v17 = vpack.c.bf16 %v6421_v46, %v6404_v28 }
 0x25c   : > { %v1981_v56 = vmul.f32 %v8539_v8, %v1976_v34  ;;  %v8541_v34 = vld [vmem:[#allocation20_spill] sm:$0xff] }
 0x25d   : > { %2306 = vperm.xlu1 %4889, %v4083_v2  }
 0x25e   : > { %v1891_v21 = vpop.permute.xlu0 %1890  ;;  %v6694_v36 = vpop.permute.xlu1 %1896 }
 0x25f   : > { %2138 = vrot.lane.b32.xlu0 %v6469_v43, %s5175_s9  ;;  %v1977_v37 = vsel %vm725_vm8, %v1887_v6, %v1891_v21  ;;  %v1975_v25 = vsel %vm725_vm8, %v1891_v21, %v1895_v3  ;;  %v1972_v42 = vsel %vm725_vm8, %v1893_v7, %v6694_v36  ;;  %v1982_v21 = vmul.f32 %v8540_v60, %v1974_v39 }
 0x260   : > { %v1997_v61 = vmul.f32 %v8539_v8, %v1977_v37  ;;  %v1998_v47 = vmul.f32 %v8540_v60, %v1975_v25 }
 0x261   : > { %2311 = vperm.xlu1 %4889, %v4084_v55  }
 0x262   : > { %v1899_v51 = vpop.permute.xlu0 %1898  ;;  %v2013_v49 = vpack.c.bf16 %v1997_v61, %v1981_v56  ;;  %v2081_v62 = vpop.permute.xlu1 %2080  ;;  %v2014_v7 = vpack.c.bf16 %v1998_v47, %v1982_v21 }
 0x263   : > { %2296 = vperm.xlu0 %4888, %v4081_v48   ;;  %v1973_v2 = vsel %vm725_vm8, %v1895_v3, %v1899_v51  ;;  %v1983_v48 = vmul.f32 %v8541_v34, %v1972_v42  ;;  %v2166_v60 = vsel %vm982_vm12, %v2081_v62, %v6675_v23 }
 0x264   : > { %v1999_v55 = vmul.f32 %v8541_v34, %v1973_v2  ;;  %2330 = vmatprep.subr.bf16.mxu0 %v2013_v49 }
 0x266   : > { %v2083_v37 = vpop.permute.xlu0 %2082  ;;  %v2015_v8 = vpack.c.bf16 %v1999_v55, %v1983_v48 }
 0x267   : > { %2301 = vperm.xlu0 %4888, %v4082_v10   ;;  %v6716_v18 = vpop.permute.xlu1 %1944  ;;  %v2167_v42 = vsel %vm982_vm12, %v2083_v37, %v2087_v63  ;;  %v8542_v10 = vld [vmem:[#allocation31_spill] sm:$0xff] }
 0x268   : > { %2383 = vmatprep.subr.bf16.mxu1 %v2015_v8  ;;  %v1978_v3 = vsel %vm725_vm8, %v6716_v18, %v1885_v16  ;;  %v8543_v16 = vpack.c.bf16 %v6275_v24, %v6270_v33 }
 0x269   : > { %2384 = vmatpush1.bf16.msra.mxu1 %v2014_v7  ;;  %v1980_v39 = vmul.f32 %v8542_v10, %v1978_v3  ;;  %v8545_v7 = vpack.c.bf16 %v6371_v54, %v6378_v57 }
 0x26a   : > { %2385 = vmatprep.subr.bf16.mxu1 %v2047_v17  ;;  %v8546_v17 = vld [vmem:[#allocation37_spill] sm:$0xff] }
 0x26b   : > { %v6725_v25 = vpop.permute.xlu1 %2076 }
 0x26c   : > { %v2168_v8 = vsel %vm982_vm12, %v6725_v25, %v2081_v62 }
 0x26d   : > { %v6723_v56 = vpop.permute.xlu0 %1946  ;;  %2386 = vmatpush1.bf16.msra.mxu1 %v8543_v16 }
 0x26e   : > { %v1979_v61 = vsel %vm725_vm8, %v6723_v56, %v1887_v6  ;;  %v8544_v6 = vld [vmem:[#allocation36_spill] sm:$0xff] }
 0x26f   : > { %v1996_v49 = vmul.f32 %v8542_v10, %v1979_v61  ;;  %v2089_v34 = vpop.permute.xlu1 %2088  ;;  %v2189_v48 = vmul.f32 %v8544_v6, %v2167_v42  ;;  %v2173_v21 = vmul.f32 %v8544_v6, %v2166_v60 }
 0x270   : > { %v2164_v60 = vsel %vm982_vm12, %v6675_v23, %v2089_v34 }
 0x271   : > { %v2012_v47 = vpack.c.bf16 %v1996_v49, %v1980_v39  ;;  %v6740_v2 = vpop.permute.xlu0 %2078  ;;  %v2205_v42 = vpack.c.bf16 %v2189_v48, %v2173_v21  ;;  %v2172_v39 = vmul.f32 %v8546_v17, %v2168_v8  ;;  %v8547_v49 = vpack.c.bf16 %v6361_v1, %v6345_v30  ;;  %v8548_v48 = vld [vmem:[#allocation22_spill] sm:$0xff]  ;;  %v6774_v21 = vld [vmem:[%s8225_s1 + $0x10] sm:$0xff]   ;;  %v8549_v8 = vld [vmem:[#allocation21_spill] sm:$0xff] }
 0x272   : > { %v2169_v55 = vsel %vm982_vm12, %v6740_v2, %v2083_v37 }
 0x273   : > { %2331 = vmatpush1.bf16.msra.mxu0 %v2012_v47  ;;  %v2188_v3 = vmul.f32 %v8546_v17, %v2169_v55  ;;  %v6754_v10 = vpop.permute.xlu1 %2092 }
 0x274   : > { %2332 = vmatprep.subr.bf16.mxu0 %v8545_v7  ;;  %v2162_v62 = vsel %vm982_vm12, %v2089_v34, %v6754_v10 }
 0x275   : > { %v2091_v61 = vpop.permute.xlu0 %2090  ;;  %v2204_v16 = vpack.c.bf16 %v2188_v3, %v2172_v39  ;;  %v2175_v7 = vmul.f32 %v8549_v8, %v2162_v62  ;;  %v2174_v3 = vmul.f32 %v8548_v48, %v2164_v60 }
 0x276   : > { %v2165_v37 = vsel %vm982_vm12, %v2087_v63, %v2091_v61 }
 0x277   : > { %2333 = vmatpush1.bf16.msra.mxu0 %v8547_v49  ;;  %v1901_v6 = vpop.permute.xlu1 %1900  ;;  %v2190_v55 = vmul.f32 %v8548_v48, %v2165_v37  ;;  %v8550_v37 = vmov 0   ;;  %v8551_v48 = vld [vmem:[#allocation39_spill] sm:$0xff] }
 0x278   : > { %2334 = vmatprep.subr.bf16.mxu0 %v2205_v42  ;;  %v1970_v62 = vsel %vm725_vm8, %v6694_v36, %v1901_v6 }
 0x279   : > { %v2095_v47 = vpop.permute.xlu0 %2094  ;;  %v2206_v39 = vpack.c.bf16 %v2190_v55, %v2174_v3  ;;  %v1984_v36 = vmul.f32 %v8551_v48, %v1970_v62 }
 0x27a   : > { %v2163_v63 = vsel %vm982_vm12, %v2091_v61, %v2095_v47 }
 0x27b   : > { %v2191_v17 = vmul.f32 %v8549_v8, %v2163_v63  ;;  %2335 = vmatpush1.bf16.msra.mxu0 %v2204_v16  ;;  %v1905_v42 = vpop.permute.xlu1 %1904  ;;  %v8552_v8 = vld [vmem:[#allocation40_spill] sm:$0xff] }
 0x27c   : > { %v1968_v49 = vsel %vm725_vm8, %v1901_v6, %v1905_v42 }
 0x27d   : > { %v1903_v23 = vpop.permute.xlu0 %1902  ;;  %v2207_v34 = vpack.c.bf16 %v2191_v17, %v2175_v7  ;;  %v1985_v7 = vmul.f32 %v8552_v8, %v1968_v49 }
 0x27e   : > { %4087 = vmatmul.mubr.msk.bf16.vlgmr.msra.gmra.mrb[32].mxu0 %vm1165_vm1, %v6774_v21  ;;  %v1971_v61 = vsel %vm725_vm8, %v1899_v51, %v1903_v23  ;;  %v6795_v51 = vld [vmem:[%s8225_s1 + $0x18] sm:$0xff]  }
 0x27f   : > { %2387 = vmatprep.subr.bf16.mxu1 %v2207_v34  ;;  %2372 = vmatprep.mubr.bf16.mxu0 %v8550_v37  ;;  %v1909_v60 = vpop.permute.xlu1 %1908  ;;  %v2000_v55 = vmul.f32 %v8551_v48, %v1971_v61 }
 0x280   : > { %2388 = vmatpush1.bf16.msra.mxu1 %v2206_v39  ;;  %v1966_v49 = vsel %vm725_vm8, %v1905_v42, %v1909_v60 }
 0x281   : > { %v1907_v16 = vpop.permute.xlu0 %1906  ;;  %v2016_v34 = vpack.c.bf16 %v2000_v55, %v1984_v36  ;;  %v8553_v55 = vld [vmem:[#allocation24_spill] sm:$0xff] }
 0x282   : > { %v1969_v63 = vsel %vm725_vm8, %v1903_v23, %v1907_v16  ;;  %v1986_v42 = vmul.f32 %v8553_v55, %v1966_v49 }
 0x283   : > { %v2001_v17 = vmul.f32 %v8552_v8, %v1969_v63  ;;  %4089 = vmatmul.mubr.msk.bf16.vlgmr.msra.gmra.mrb[32].mxu1 %vm1165_vm1, %v6774_v21  ;;  %v6803_v3 = vpop.permute.xlu1 %1912  ;;  %v8554_v8 = vld [vmem:[#allocation23_spill] sm:$0xff] }
 0x284   : > { %2425 = vmatprep.mubr.bf16.mxu1 %v8550_v37  ;;  %v1964_v61 = vsel %vm725_vm8, %v1909_v60, %v6803_v3 }
 0x285   : > { %v1911_v6 = vpop.permute.xlu0 %1910  ;;  %v2017_v23 = vpack.c.bf16 %v2001_v17, %v1985_v7  ;;  %v1987_v7 = vmul.f32 %v8554_v8, %v1964_v61 }
 0x286   : > { %4088 = vmatmul.mubr.msk.bf16.gmra.mrb[36].mxu0 %vm1165_vm1, %v6795_v51  ;;  %v1967_v39 = vsel %vm725_vm8, %v1907_v16, %v1911_v6 }
 0x287   : > { %2436 = vmatprep.subr.bf16.mxu0 %v2017_v23  ;;  %2468 = vmatprep.mubr.bf16.mxu0 %v8550_v37  ;;  %v2097_v48 = vpop.permute.xlu1 %2096  ;;  %v2002_v63 = vmul.f32 %v8553_v55, %v1967_v39  ;;  %v8555_v55 = vld [vmem:[#allocation43_spill] sm:$0xff] }
 0x288   : > { %2437 = vmatpush1.bf16.msra.mxu0 %v2016_v34  ;;  %v2051_v34 = vpack.c.bf16 %v6565_v27, %v6546_v20 }
 0x289   : > { %v1915_v62 = vpop.permute.xlu0 %1914  ;;  %2438 = vmatprep.subr.bf16.mxu0 %v2049_v59  ;;  %v2018_v23 = vpack.c.bf16 %v2002_v63, %v1986_v42 }
 0x28a   : > { %v1965_v16 = vsel %vm725_vm8, %v1911_v6, %v1915_v62 }
 0x28b   : > { %v2003_v17 = vmul.f32 %v8554_v8, %v1965_v16  ;;  %4090 = vmatmul.mubr.msk.bf16.gmra.mrb[36].mxu1 %vm1165_vm1, %v6795_v51  ;;  %v2101_v36 = vpop.permute.xlu1 %2100  ;;  %v2050_v16 = vpack.c.bf16 %v6541_v38, %v6528_v12  ;;  %v8556_v8 = vld [vmem:[#allocation42_spill] sm:$0xff] }
 0x28c   : > { %2439 = vmatpush1.bf16.msra.mxu0 %v2048_v35  ;;  %2521 = vmatprep.mubr.bf16.mxu1 %v8550_v37  ;;  %v2158_v39 = vsel %vm982_vm12, %v2097_v48, %v2101_v36  ;;  %v2160_v35 = vsel %vm982_vm12, %v6754_v10, %v2097_v48 }
 0x28d   : > { %v2099_v59 = vpop.permute.xlu0 %2098  ;;  %v2019_v60 = vpack.c.bf16 %v2003_v17, %v1987_v7  ;;  %v2177_v7 = vmul.f32 %v8556_v8, %v2158_v39  ;;  %v2176_v42 = vmul.f32 %v8555_v55, %v2160_v35 }
 0x28e   : > { %v2161_v6 = vsel %vm982_vm12, %v2095_v47, %v2099_v59 }
 0x28f   : > { %2489 = vmatprep.subr.bf16.mxu1 %v2019_v60  ;;  %v2105_v49 = vpop.permute.xlu1 %2104  ;;  %v2192_v63 = vmul.f32 %v8555_v55, %v2161_v6  ;;  %v8557_v55 = vld [vmem:[#allocation25_spill] sm:$0xff] }
 0x290   : > { %2490 = vmatpush1.bf16.msra.mxu1 %v2018_v23 }
 0x291   : > { %v2103_v61 = vpop.permute.xlu0 %2102  ;;  %2491 = vmatprep.subr.bf16.mxu1 %v2051_v34  ;;  %v2208_v23 = vpack.c.bf16 %v2192_v63, %v2176_v42  ;;  %v2156_v34 = vsel %vm982_vm12, %v2101_v36, %v2105_v49  ;;  %v8558_v63 = vld [vmem:[#allocation26_spill] sm:$0xff] }
 0x292   : > { %v2159_v47 = vsel %vm982_vm12, %v2099_v59, %v2103_v61 }
 0x293   : > { %v2193_v17 = vmul.f32 %v8556_v8, %v2159_v47  ;;  %v6847_v10 = vpop.permute.xlu1 %2108 }
 0x294   : > { %2492 = vmatpush1.bf16.msra.mxu1 %v2050_v16  ;;  %v2154_v59 = vsel %vm982_vm12, %v2105_v49, %v6847_v10 }
 0x295   : > { %v2107_v60 = vpop.permute.xlu0 %2106  ;;  %v2209_v48 = vpack.c.bf16 %v2193_v17, %v2177_v7  ;;  %v2179_v8 = vmul.f32 %v8558_v63, %v2154_v59  ;;  %v2178_v7 = vmul.f32 %v8557_v55, %v2156_v34  ;;  %v8559_v34 = vld [vmem:[#allocation12_spill] sm:$0xff] }
 0x296   : > { %v2157_v6 = vsel %vm982_vm12, %v2103_v61, %v2107_v60 }
 0x297   : > { %2440 = vmatprep.subr.bf16.mxu0 %v2209_v48  ;;  %v1917_v35 = vpop.permute.xlu1 %1916  ;;  %v2194_v47 = vmul.f32 %v8557_v55, %v2157_v6 }
 0x298   : > { %2441 = vmatpush1.bf16.msra.mxu0 %v2208_v23  ;;  %v1962_v23 = vsel %vm725_vm8, %v6803_v3, %v1917_v35 }
 0x299   : > { %v2111_v39 = vpop.permute.xlu0 %2110  ;;  %v2210_v42 = vpack.c.bf16 %v2194_v47, %v2178_v7  ;;  %v8560_v47 = vld [vmem:[#allocation15_spill] sm:$0xff] }
 0x29a   : > { %v2155_v16 = vsel %vm982_vm12, %v2107_v60, %v2111_v39 }
 0x29b   : > { %v2195_v61 = vmul.f32 %v8558_v63, %v2155_v16  ;;  %4091 = vmatmul.mubr.msk.bf16.vlgmr.msra.gmra.mrb[40].mxu0 %vm1165_vm1, %v6774_v21  ;;  %v1921_v49 = vpop.permute.xlu1 %1920 }
 0x29c   : > { %2478 = vmatprep.mubr.bf16.mxu0 %v8550_v37  ;;  %v1960_v60 = vsel %vm725_vm8, %v1917_v35, %v1921_v49 }
 0x29d   : > { %v1919_v17 = vpop.permute.xlu0 %1918  ;;  %v2211_v36 = vpack.c.bf16 %v2195_v61, %v2179_v8  ;;  %v1989_v63 = vmul.f32 %v8560_v47, %v1960_v60  ;;  %v1988_v8 = vmul.f32 %v8559_v34, %v1962_v23  ;;  %v8561_v23 = vld [vmem:[#allocation28_spill] sm:$0xff] }
 0x29e   : > { %v1963_v48 = vsel %vm725_vm8, %v1915_v62, %v1919_v17 }
 0x29f   : > { %2493 = vmatprep.subr.bf16.mxu1 %v2211_v36  ;;  %v1925_v59 = vpop.permute.xlu1 %1924  ;;  %v2004_v55 = vmul.f32 %v8559_v34, %v1963_v48 }
 0x2a0   : > { %2494 = vmatpush1.bf16.msra.mxu1 %v2210_v42  ;;  %v1958_v42 = vsel %vm725_vm8, %v1921_v49, %v1925_v59 }
 0x2a1   : > { %v1923_v6 = vpop.permute.xlu0 %1922  ;;  %v2020_v7 = vpack.c.bf16 %v2004_v55, %v1988_v8  ;;  %v8562_v55 = vld [vmem:[#allocation27_spill] sm:$0xff]  ;;  %v1990_v49 = vmul.f32 %v8561_v23, %v1958_v42 }
 0x2a2   : > { %v1961_v16 = vsel %vm725_vm8, %v1919_v17, %v1923_v6 }
 0x2a3   : > { %v2005_v62 = vmul.f32 %v8560_v47, %v1961_v16  ;;  %4093 = vmatmul.mubr.msk.bf16.vlgmr.msra.gmra.mrb[40].mxu1 %vm1165_vm1, %v6774_v21  ;;  %4092 = vmatmul.mubr.msk.bf16.gmra.mrb[44].mxu0 %vm1165_vm1, %v6795_v51  ;;  %v6884_v35 = vpop.permute.xlu1 %1928 }
 0x2a4   : > { %2531 = vmatprep.mubr.bf16.mxu1 %v8550_v37  ;;  %2574 = vmatprep.mubr.bf16.mxu0 %v8550_v37  ;;  %v1956_v36 = vsel %vm725_vm8, %v1925_v59, %v6884_v35 }
 0x2a5   : > { %v1927_v3 = vpop.permute.xlu0 %1926  ;;  %v2021_v61 = vpack.c.bf16 %v2005_v62, %v1989_v63  ;;  %v1991_v16 = vmul.f32 %v8562_v55, %v1956_v36  ;;  %v8563_v36 = vld [vmem:[#allocation11_spill] sm:$0xff] }
 0x2a6   : > { %v1959_v17 = vsel %vm725_vm8, %v1923_v6, %v1927_v3 }
 0x2a7   : > { %2542 = vmatprep.subr.bf16.mxu0 %v2021_v61  ;;  %v2113_v60 = vpop.permute.xlu1 %2112  ;;  %v2006_v34 = vmul.f32 %v8561_v23, %v1959_v17  ;;  %v2054_v23 = vpack.c.bf16 %v6605_v44, %v6596_v32 }
 0x2a8   : > { %2543 = vmatpush1.bf16.msra.mxu0 %v2020_v7 }
 0x2a9   : > { %v1931_v48 = vpop.permute.xlu0 %1930  ;;  %2544 = vmatprep.subr.bf16.mxu0 %v2053_v41  ;;  %v2022_v62 = vpack.c.bf16 %v2006_v34, %v1990_v49  ;;  %v8564_v34 = vld [vmem:[#allocation16_spill] sm:$0xff] }
 0x2aa   : > { %v1957_v6 = vsel %vm725_vm8, %v1927_v3, %v1931_v48  ;;  %v2055_v3 = vpack.c.bf16 %v6619_v58, %v6610_v45 }
 0x2ab   : > { %v2007_v47 = vmul.f32 %v8562_v55, %v1957_v6  ;;  %4094 = vmatmul.mubr.msk.bf16.gmra.mrb[44].mxu1 %vm1165_vm1, %v6795_v51  ;;  %v2117_v63 = vpop.permute.xlu1 %2116 }
 0x2ac   : > { %2545 = vmatpush1.bf16.msra.mxu0 %v2052_v40  ;;  %2627 = vmatprep.mubr.bf16.mxu1 %v8550_v37  ;;  %v2150_v61 = vsel %vm982_vm12, %v2113_v60, %v2117_v63  ;;  %v2152_v40 = vsel %vm982_vm12, %v6847_v10, %v2113_v60 }
 0x2ad   : > { %v2115_v41 = vpop.permute.xlu0 %2114  ;;  %v2023_v59 = vpack.c.bf16 %v2007_v47, %v1991_v16  ;;  %v2181_v6 = vmul.f32 %v8564_v34, %v2150_v61  ;;  %v2180_v16 = vmul.f32 %v8563_v36, %v2152_v40  ;;  %v8565_v61 = vld [vmem:[#allocation29_spill] sm:$0xff] }
 0x2ae   : > { %v2153_v8 = vsel %vm982_vm12, %v2111_v39, %v2115_v41 }
 0x2af   : > { %2595 = vmatprep.subr.bf16.mxu1 %v2023_v59  ;;  %v2121_v17 = vpop.permute.xlu1 %2120  ;;  %v2196_v42 = vmul.f32 %v8563_v36, %v2153_v8 }
 0x2b0   : > { %2596 = vmatpush1.bf16.msra.mxu1 %v2022_v62  ;;  %v2148_v62 = vsel %vm982_vm12, %v2117_v63, %v2121_v17 }
 0x2b1   : > { %v2119_v7 = vpop.permute.xlu0 %2118  ;;  %2597 = vmatprep.subr.bf16.mxu1 %v2055_v3  ;;  %v2212_v49 = vpack.c.bf16 %v2196_v42, %v2180_v16 }
 0x2b2   : > { %v2151_v39 = vsel %vm982_vm12, %v2115_v41, %v2119_v7 }
 0x2b3   : > { %v2197_v55 = vmul.f32 %v8564_v34, %v2151_v39  ;;  %v2125_v10 = vpop.permute.xlu1 %2124  ;;  %v8566_v39 = vld [vmem:[#allocation34_spill] sm:$0xff] }
 0x2b4   : > { %2598 = vmatpush1.bf16.msra.mxu1 %v2054_v23  ;;  %v2146_v41 = vsel %vm982_vm12, %v2121_v17, %v2125_v10 }
 0x2b5   : > { %v2123_v47 = vpop.permute.xlu0 %2122  ;;  %v2213_v60 = vpack.c.bf16 %v2197_v55, %v2181_v6  ;;  %v2183_v42 = vmul.f32 %v8566_v39, %v2146_v41 }
 0x2b6   : > { %v2149_v59 = vsel %vm982_vm12, %v2119_v7, %v2123_v47  ;;  %v2182_v7 = vmul.f32 %v8565_v61, %v2148_v62 }
 0x2b7   : > { %2546 = vmatprep.subr.bf16.mxu0 %v2213_v60  ;;  %v1933_v3 = vpop.permute.xlu1 %1932  ;;  %v2198_v40 = vmul.f32 %v8565_v61, %v2149_v59  ;;  %v8567_v59 = vld [vmem:[#allocation35_spill] sm:$0xff] }
 0x2b8   : > { %2547 = vmatpush1.bf16.msra.mxu0 %v2212_v49 }
 0x2b9   : > { %v2127_v8 = vpop.permute.xlu0 %2126  ;;  %v2214_v6 = vpack.c.bf16 %v2198_v40, %v2182_v7 }
 0x2ba   : > { %v2147_v36 = vsel %vm982_vm12, %v2123_v47, %v2127_v8 }
 0x2bb   : > { %v2199_v23 = vmul.f32 %v8566_v39, %v2147_v36  ;;  %4095 = vmatmul.mubr.msk.bf16.vlgmr.msra.gmra.mrb[48].mxu0 %vm1165_vm1, %v6774_v21  ;;  %v1937_v17 = vpop.permute.xlu1 %1936  ;;  %v8568_v39 = vld [vmem:[#allocation14_spill] sm:$0xff] }
 0x2bc   : > { %2584 = vmatprep.mubr.bf16.mxu0 %v8550_v37 }
 0x2bd   : > { %v1935_v34 = vpop.permute.xlu0 %1934  ;;  %v2215_v63 = vpack.c.bf16 %v2199_v23, %v2183_v42 }
 0x2be   : > { %v1955_v49 = vsel %vm725_vm8, %v1931_v48, %v1935_v34 }
 0x2bf   : > { %2599 = vmatprep.subr.bf16.mxu1 %v2215_v63  ;;  %v1941_v16 = vpop.permute.xlu1 %1940  ;;  %v2008_v42 = vmul.f32 %v8568_v39, %v1955_v49  ;;  %v8569_v63 = vld [vmem:[#allocation17_spill] sm:$0xff] }
 0x2c0   : > { %2600 = vmatpush1.bf16.msra.mxu1 %v2214_v6  ;;  %v1948_v60 = vsel %vm725_vm8, %v1941_v16, %v6716_v18  ;;  %v1950_v61 = vsel %vm725_vm8, %v1937_v17, %v1941_v16  ;;  %v1954_v18 = vsel %vm725_vm8, %v6884_v35, %v1933_v3  ;;  %v8570_v6 = vld [vmem:[#allocation33_spill] sm:$0xff] }
 0x2c1   : > { %v1943_v55 = vpop.permute.xlu0 %1942  ;;  %v1995_v62 = vmul.f32 %v8567_v59, %v1948_v60  ;;  %v1994_v16 = vmul.f32 %v8570_v6, %v1950_v61  ;;  %v1992_v35 = vmul.f32 %v8568_v39, %v1954_v18 }
 0x2c2   : > { %v1949_v47 = vsel %vm725_vm8, %v1943_v55, %v6723_v56  ;;  %v1952_v56 = vsel %vm725_vm8, %v1933_v3, %v1937_v17 }
 0x2c3   : > { %v2011_v41 = vmul.f32 %v8567_v59, %v1949_v47  ;;  %4097 = vmatmul.mubr.msk.bf16.vlgmr.msra.gmra.mrb[48].mxu1 %vm1165_vm1, %v6774_v21  ;;  %4096 = vmatmul.mubr.msk.bf16.gmra.mrb[52].mxu0 %vm1165_vm1, %v6795_v51  ;;  %v2129_v40 = vpop.permute.xlu1 %2128  ;;  %v1993_v17 = vmul.f32 %v8569_v63, %v1952_v56 }
 0x2c4   : > { %2637 = vmatprep.mubr.bf16.mxu1 %v8550_v37  ;;  %2680 = vmatprep.mubr.bf16.mxu0 %v8550_v37  ;;  %v2144_v56 = vsel %vm982_vm12, %v2125_v10, %v2129_v40  ;;  %v8571_v10 = vld [vmem:[#allocation13_spill] sm:$0xff] }
 0x2c5   : > { %v1939_v48 = vpop.permute.xlu0 %1938  ;;  %v2027_v36 = vpack.c.bf16 %v2011_v41, %v1995_v62  ;;  %v2024_v62 = vpack.c.bf16 %v2008_v42, %v1992_v35  ;;  %v2058_v42 = vpack.c.bf16 %v6652_v4, %v6657_v52 }
 0x2c6   : > { %v1951_v23 = vsel %vm725_vm8, %v1939_v48, %v1943_v55  ;;  %v1953_v7 = vsel %vm725_vm8, %v1935_v34, %v1939_v48  ;;  %v2059_v34 = vpack.c.bf16 %v6469_v43, %v6442_v11  ;;  %v2057_v55 = vpack.c.bf16 %v6665_v53, %v6643_v50 }
 0x2c7   : > { %v2009_v47 = vmul.f32 %v8569_v63, %v1953_v7  ;;  %v2010_v60 = vmul.f32 %v8570_v6, %v1951_v23  ;;  %2701 = vmatprep.subr.bf16.mxu1 %v2027_v36  ;;  %v2133_v49 = vpop.permute.xlu1 %2132  ;;  %v2184_v23 = vmul.f32 %v8571_v10, %v2144_v56  ;;  %v8572_v7 = vld [vmem:[#allocation18_spill] sm:$0xff] }
 0x2c8   : > { %v2142_v61 = vsel %vm982_vm12, %v2129_v40, %v2133_v49 }
 0x2c9   : > { %v2026_v3 = vpack.c.bf16 %v2010_v60, %v1994_v16  ;;  %v2135_v59 = vpop.permute.xlu0 %2134  ;;  %v2025_v41 = vpack.c.bf16 %v2009_v47, %v1993_v17  ;;  %v2185_v40 = vmul.f32 %v8572_v7, %v2142_v61  ;;  %v8573_v16 = vpack.c.bf16 %v6558_v9, %v6554_v22 }
 0x2cb   : > { %4098 = vmatmul.mubr.msk.bf16.gmra.mrb[52].mxu1 %vm1165_vm1, %v6795_v51  ;;  %2648 = vmatprep.subr.bf16.mxu0 %v2025_v41  ;;  %v2137_v48 = vpop.permute.xlu1 %2136 }
 0x2cc   : > { %2702 = vmatpush1.bf16.msra.mxu1 %v2026_v3  ;;  %2649 = vmatpush1.bf16.msra.mxu0 %v2024_v62  ;;  %v2140_v6 = vsel %vm982_vm12, %v2133_v49, %v2137_v48  ;;  %v8574_v62 = vld [vmem:[#allocation41_spill] sm:$0xff] }
 0x2cd   : > { %2703 = vmatprep.subr.bf16.mxu1 %v2059_v34  ;;  %v2131_v18 = vpop.permute.xlu0 %2130  ;;  %2650 = vmatprep.subr.bf16.mxu0 %v2057_v55  ;;  %v2186_v49 = vmul.f32 %v8574_v62, %v2140_v6  ;;  %v8575_v34 = vld [vmem:[#allocation38_spill] sm:$0xff] }
 0x2ce   : > { %v2143_v36 = vsel %vm982_vm12, %v2131_v18, %v2135_v59  ;;  %v2145_v39 = vsel %vm982_vm12, %v2127_v8, %v2131_v18  ;;  %2733 = vmatprep.mubr.bf16.mxu1 %v8550_v37  ;;  %v2170_v8 = vsel %vm982_vm12, %v2137_v48, %v6725_v25  ;;  %v3010_v48 = vld [vmem:[%s8227_s3] sm:$0xff] }
 0x2cf   : > { %v2200_v63 = vmul.f32 %v8571_v10, %v2145_v39  ;;  %v2201_v17 = vmul.f32 %v8572_v7, %v2143_v36  ;;  %v2187_v55 = vmul.f32 %v8575_v34, %v2170_v8  ;;  %v3028_v36 = vld [vmem:[%s8227_s3 + $0x90] sm:$0xff]  ;;  %v3029_v39 = vld [vmem:[%s8227_s3 + $0x98] sm:$0xff] }
 0x2d0   : > { %2704 = vmatpush1.bf16.msra.mxu1 %v2058_v42  ;;  %2651 = vmatpush1.bf16.msra.mxu0 %v8573_v16  ;;  %v4448_v42 = vpack.c.bf16 %v3029_v39, %v3028_v36  ;;  %v3012_v10 = vld [vmem:[%s8227_s3 + $0x10] sm:$0xff]  ;;  %v3030_v16 = vld [vmem:[%s8227_s3 + $0xa0] sm:$0xff]  ;;  %v3047_v39 = vld [vmem:[%s8227_s3 + $0x128] sm:$0xff] }
 0x2d1   : > { %v2216_v47 = vpack.c.bf16 %v2200_v63, %v2184_v23  ;;  %v2139_v60 = vpop.permute.xlu0 %2138  ;;  %v2217_v35 = vpack.c.bf16 %v2201_v17, %v2185_v40  ;;  %v3013_v23 = vld [vmem:[%s8227_s3 + $0x18] sm:$0xff]  ;;  %v3059_v40 = vld [vmem:[%s8227_s3 + $0x188] sm:$0xff]  ;;  %v3042_v63 = vld [vmem:[%s8227_s3 + $0x100] sm:$0xff] }
 0x2d2   : > { %v2141_v3 = vsel %vm982_vm12, %v2135_v59, %v2139_v60  ;;  %v2171_v41 = vsel %vm982_vm12, %v2139_v60, %v6740_v2  ;;  %v3027_v2 = vld [vmem:[%s8227_s3 + $0x88] sm:$0xff]  ;;  %v4450_v7 = vpack.c.bf16 %v3013_v23, %v3012_v10  ;;  %v3046_v36 = vld [vmem:[%s8227_s3 + $0x120] sm:$0xff] }
 0x2d3   : > { %v2202_v25 = vmul.f32 %v8574_v62, %v2141_v3  ;;  %v2203_v56 = vmul.f32 %v8575_v34, %v2171_v41  ;;  %2652 = vmatprep.subr.bf16.mxu0 %v2217_v35  ;;  %v4444_v59 = vpack.c.bf16 %v3027_v2, %v3026_v5  ;;  %v3043_v17 = vld [vmem:[%s8227_s3 + $0x108] sm:$0xff]  ;;  %v3014_v35 = vld [vmem:[%s8227_s3 + $0x20] sm:$0xff]  ;;  %v3060_v41 = vld [vmem:[%s8227_s3 + $0x190] sm:$0xff]  ;;  %v4486_v10 = vpack.c.bf16 %v3047_v39, %v3046_v36 }
 0x2d4   : > { %2653 = vmatpush1.bf16.msra.mxu0 %v2216_v47  ;;  %v4478_v8 = vpack.c.bf16 %v3043_v17, %v3042_v63  ;;  %v3031_v47 = vld [vmem:[%s8227_s3 + $0xa8] sm:$0xff]  ;;  %v3044_v34 = vld [vmem:[%s8227_s3 + $0x110] sm:$0xff]  ;;  %v3034_v23 = vld [vmem:[%s8227_s3 + $0xc0] sm:$0xff] }
 0x2d5   : > { %v2218_v61 = vpack.c.bf16 %v2202_v25, %v2186_v49  ;;  %v2219_v18 = vpack.c.bf16 %v2203_v56, %v2187_v55  ;;  %4445 = vmatprep.subr.bf16.mxu0 %v4444_v59  ;;  %v4452_v60 = vpack.c.bf16 %v3031_v47, %v3030_v16  ;;  %v3015_v3 = vld [vmem:[%s8227_s3 + $0x28] sm:$0xff]  ;;  %v3061_v49 = vld [vmem:[%s8227_s3 + $0x198] sm:$0xff]  ;;  %v3016_v2 = vld [vmem:[%s8227_s3 + $0x30] sm:$0xff] }
 0x2d6   : > { %v4454_v62 = vpack.c.bf16 %v3015_v3, %v3014_v35  ;;  %v3045_v55 = vld [vmem:[%s8227_s3 + $0x118] sm:$0xff]  ;;  %v4480_v25 = vpack.c.bf16 %v3061_v49, %v3060_v41  ;;  %v3019_v63 = vld [vmem:[%s8227_s3 + $0x48] sm:$0xff]  ;;  %v3064_v17 = vld [vmem:[%s8227_s3 + $0x1b0] sm:$0xff] }
 0x2d7   : > { %4099 = vmatmul.mubr.msk.bf16.vlgmr.msra.gmra.mrb[56].mxu0 %vm1165_vm1, %v6774_v21  ;;  %2705 = vmatprep.subr.bf16.mxu1 %v2219_v18  ;;  %v4482_v56 = vpack.c.bf16 %v3045_v55, %v3044_v34  ;;  %v3033_v18 = vld [vmem:[%s8227_s3 + $0xb8] sm:$0xff]  ;;  %v3048_v16 = vld [vmem:[%s8227_s3 + $0x130] sm:$0xff]  ;;  %v3066_v55 = vld [vmem:[%s8227_s3 + $0x1c0] sm:$0xff] }
 0x2d8   : > { %2706 = vmatpush1.bf16.msra.mxu1 %v2218_v61  ;;  %2690 = vmatprep.mubr.bf16.mxu0 %v8550_v37  ;;  %v3032_v61 = vld [vmem:[%s8227_s3 + $0xb0] sm:$0xff]  ;;  %v3017_v59 = vld [vmem:[%s8227_s3 + $0x38] sm:$0xff] }
 0x2d9   : > { %v4456_v5 = vpack.c.bf16 %v3033_v18, %v3032_v61  ;;  %v3049_v47 = vld [vmem:[%s8227_s3 + $0x138] sm:$0xff]  ;;  %v3036_v3 = vld [vmem:[%s8227_s3 + $0xd0] sm:$0xff]  ;;  %v3050_v18 = vld [vmem:[%s8227_s3 + $0x140] sm:$0xff] }
 0x2da   : > { %v4490_v35 = vpack.c.bf16 %v3049_v47, %v3048_v16  ;;  %v3037_v41 = vld [vmem:[%s8227_s3 + $0xd8] sm:$0xff]  ;;  %v3068_v39 = vld [vmem:[%s8227_s3 + $0x1d0] sm:$0xff]  ;;  %v3070_v47 = vld [vmem:[%s8227_s3 + $0x1e0] sm:$0xff] }
 0x2db   : > { %4101 = vmatmul.mubr.msk.bf16.vlgmr.msra.gmra.mrb[56].mxu1 %vm1165_vm1, %v6774_v21  ;;  %v3011_v21 = vld [vmem:[%s8227_s3 + $0x8] sm:$0xff]  ;;  %v4464_v49 = vpack.c.bf16 %v3037_v41, %v3036_v3  ;;  %v3021_v34 = vld [vmem:[%s8227_s3 + $0x58] sm:$0xff]  ;;  %v3054_v3 = vld [vmem:[%s8227_s3 + $0x160] sm:$0xff] }
 0x2dc   : > { %2743 = vmatprep.mubr.bf16.mxu1 %v8550_v37  ;;  %v4446_v37 = vpack.c.bf16 %v3011_v21, %v3010_v48  ;;  %v3062_v48 = vld [vmem:[%s8227_s3 + $0x1a0] sm:$0xff]  ;;  %v4458_v21 = vpack.c.bf16 %v3017_v59, %v3016_v2  ;;  %v3025_v16 = vld [vmem:[%s8227_s3 + $0x78] sm:$0xff]  ;;  %v3055_v41 = vld [vmem:[%s8227_s3 + $0x168] sm:$0xff] }
 0x2dd   : > { %v3038_v2 = vld [vmem:[%s8227_s3 + $0xe0] sm:$0xff] }
 0x2de   : > { %4447 = vmatpush3.bf16.msra.mxu0 %v4446_v37  ;;  %v3063_v37 = vld [vmem:[%s8227_s3 + $0x1a8] sm:$0xff] }
 0x2df   : > { %4100 = vmatmul.mubr.msk.bf16.gmra.mrb[60].mxu0 %vm1165_vm1, %v6795_v51  ;;  %4449 = vmatprep.subr.bf16.mxu0 %v4448_v42  ;;  %v4484_v42 = vpack.c.bf16 %v3063_v37, %v3062_v48  ;;  %v3039_v48 = vld [vmem:[%s8227_s3 + $0xe8] sm:$0xff] }
 0x2e0   : > { %v3023_v37 = vld [vmem:[%s8227_s3 + $0x68] sm:$0xff]  ;;  %v4468_v36 = vpack.c.bf16 %v3039_v48, %v3038_v2  ;;  %v3057_v2 = vld [vmem:[%s8227_s3 + $0x178] sm:$0xff]  ;;  %v3122_v48 = vld [vmem:[%s8227_s3 + $0x380] sm:$0xff] }
 0x2e2   : > { %4451 = vmatpush3.bf16.msra.mxu0 %v4450_v7 }
 0x2e3   : > { %4102 = vmatmul.mubr.msk.bf16.gmra.mrb[60].mxu1 %vm1165_vm1, %v6795_v51  ;;  %v3058_v51 = vld [vmem:[%s8227_s3 + $0x180] sm:$0xff]  ;;  %4453 = vmatprep.subr.bf16.mxu0 %v4452_v60 }
 0x2e4   : > { %v4476_v6 = vpack.c.bf16 %v3059_v40, %v3058_v51  ;;  %v3035_v51 = vld [vmem:[%s8227_s3 + $0xc8] sm:$0xff]  ;;  %v3018_v40 = vld [vmem:[%s8227_s3 + $0x40] sm:$0xff] }
 0x2e5   : > { %v4460_v7 = vpack.c.bf16 %v3035_v51, %v3034_v23 }
 0x2e6   : > { %4477 = vmatprep.subr.bf16.mxu1 %v4476_v6  ;;  %4455 = vmatpush3.bf16.msra.mxu0 %v4454_v62  ;;  %v4462_v6 = vpack.c.bf16 %v3019_v63, %v3018_v40  ;;  %v3020_v62 = vld [vmem:[%s8227_s3 + $0x50] sm:$0xff] }
 0x2e7   : > { %4479 = vmatpush3.bf16.msra.mxu1 %v4478_v8  ;;  %4457 = vmatprep.subr.bf16.mxu0 %v4456_v5  ;;  %v3065_v8 = vld [vmem:[%s8227_s3 + $0x1b8] sm:$0xff]  ;;  %v3051_v5 = vld [vmem:[%s8227_s3 + $0x148] sm:$0xff]  ;;  %v3040_v63 = vld [vmem:[%s8227_s3 + $0xf0] sm:$0xff] }
 0x2e8   : > { %4481 = vmatprep.subr.bf16.mxu1 %v4480_v25  ;;  %v4488_v60 = vpack.c.bf16 %v3065_v8, %v3064_v17  ;;  %v3067_v25 = vld [vmem:[%s8227_s3 + $0x1c8] sm:$0xff]  ;;  %v4494_v59 = vpack.c.bf16 %v3051_v5, %v3050_v18  ;;  %v3041_v17 = vld [vmem:[%s8227_s3 + $0xf8] sm:$0xff]  ;;  %v3024_v8 = vld [vmem:[%s8227_s3 + $0x70] sm:$0xff] }
 0x2e9   : > { %v4492_v61 = vpack.c.bf16 %v3067_v25, %v3066_v55  ;;  %v3091_v55 = vld [vmem:[%s8227_s3 + $0x288] sm:$0xff]  ;;  %v3056_v5 = vld [vmem:[%s8227_s3 + $0x170] sm:$0xff] }
 0x2ea   : > { %4459 = vmatpush3.bf16.msra.mxu0 %v4458_v21  ;;  %v3022_v21 = vld [vmem:[%s8227_s3 + $0x60] sm:$0xff] }
 0x2eb   : > { %4483 = vmatpush3.bf16.msra.mxu1 %v4482_v56  ;;  %4461 = vmatprep.subr.bf16.mxu0 %v4460_v7  ;;  %v4466_v56 = vpack.c.bf16 %v3021_v34, %v3020_v62  ;;  %v4470_v23 = vpack.c.bf16 %v3023_v37, %v3022_v21  ;;  %v3053_v7 = vld [vmem:[%s8227_s3 + $0x158] sm:$0xff]  ;;  %v3090_v34 = vld [vmem:[%s8227_s3 + $0x280] sm:$0xff]  ;;  %v3123_v21 = vld [vmem:[%s8227_s3 + $0x388] sm:$0xff] }
 0x2ec   : > { %4485 = vmatprep.subr.bf16.mxu1 %v4484_v42  ;;  %v3069_v42 = vld [vmem:[%s8227_s3 + $0x1d8] sm:$0xff]  ;;  %v4508_v25 = vpack.c.bf16 %v3091_v55, %v3090_v34  ;;  %v4540_v37 = vpack.c.bf16 %v3123_v21, %v3122_v48 }
 0x2ed   : > { %v4496_v51 = vpack.c.bf16 %v3069_v42, %v3068_v39 }
 0x2ee   : > { %4463 = vmatpush3.bf16.msra.mxu0 %v4462_v6  ;;  %v4472_v6 = vpack.c.bf16 %v3041_v17, %v3040_v63 }
 0x2ef   : > { %4487 = vmatpush3.bf16.msra.mxu1 %v4486_v10  ;;  %4465 = vmatprep.subr.bf16.mxu0 %v4464_v49  ;;  %v3052_v10 = vld [vmem:[%s8227_s3 + $0x150] sm:$0xff]  ;;  %v4502_v49 = vpack.c.bf16 %v3055_v41, %v3054_v3 }
 0x2f0   : > { %4489 = vmatprep.subr.bf16.mxu1 %v4488_v60  ;;  %v4498_v40 = vpack.c.bf16 %v3053_v7, %v3052_v10  ;;  %v4474_v60 = vpack.c.bf16 %v3025_v16, %v3024_v8 }
 0x2f2   : > { %4467 = vmatpush3.bf16.msra.mxu0 %v4466_v56  ;;  %v3072_v56 = vld [vmem:[%s8227_s3 + $0x1f0] sm:$0xff] }
 0x2f3   : > { %4491 = vmatpush3.bf16.msra.mxu1 %v4490_v35  ;;  %4469 = vmatprep.subr.bf16.mxu0 %v4468_v36  ;;  %v3071_v35 = vld [vmem:[%s8227_s3 + $0x1e8] sm:$0xff] }
 0x2f4   : > { %4493 = vmatprep.subr.bf16.mxu1 %v4492_v61  ;;  %v4500_v62 = vpack.c.bf16 %v3071_v35, %v3070_v47  ;;  %v3073_v61 = vld [vmem:[%s8227_s3 + $0x1f8] sm:$0xff] }
 0x2f5   : > { %v4504_v18 = vpack.c.bf16 %v3073_v61, %v3072_v56 }
 0x2f6   : > { %4471 = vmatpush3.bf16.msra.mxu0 %v4470_v23  ;;  %v7233_v23 = vpop.permute.xlu1 %2306 }
 0x2f7   : > { %4495 = vmatpush3.bf16.msra.mxu1 %v4494_v59  ;;  %4473 = vmatprep.subr.bf16.mxu0 %v4472_v6  ;;  %v4506_v59 = vpack.c.bf16 %v3057_v2, %v3056_v5 }
 0x2f8   : > { %4497 = vmatprep.subr.bf16.mxu1 %v4496_v51 }
 0x2fa   : > { %4475 = vmatpush3.bf16.msra.mxu0 %v4474_v60  ;;  %v7244_v16 = vpop.permute.xlu1 %2311 }
 0x2fb   : > { %4499 = vmatpush3.bf16.msra.mxu1 %v4498_v40  ;;  %4509 = vmatprep.subr.bf16.mxu0 %v4508_v25 }
 0x2fc   : > { %4501 = vmatprep.subr.bf16.mxu1 %v4500_v62 }
 0x2ff   : > { %4503 = vmatpush3.bf16.msra.mxu1 %v4502_v49 }
 0x300   : > { %4505 = vmatprep.subr.bf16.mxu1 %v4504_v18 }
 0x303   : > { %4507 = vmatpush3.bf16.msra.mxu1 %v4506_v59 }
 0x304   : > { %4541 = vmatprep.subr.bf16.mxu1 %v4540_v37 }
 0x351   : > { %v7225_v36 = vpop.f32.mrb[32].mxu0 }
 0x352   : > { %v7227_v39 = vpop.f32.mrb[33].mxu0 }
 0x353   : > { %v7229_v42 = vpop.f32.mrb[34].mxu0 }
 0x354   : > { %v7231_v10 = vpop.f32.mrb[35].mxu0 }
 0x356   : > { %v7235_v51 = vpop.f32.mrb[32].mxu1 }
 0x357   : > { %v7237_v7 = vpop.f32.mrb[33].mxu1 }
 0x358   : > { %v7239_v40 = vpop.f32.mrb[34].mxu1 }
 0x359   : > { %v2374_v63 = vpop.f32.mrb[36].mxu0  ;;  %v7241_v17 = vpop.f32.mrb[35].mxu1 }
 0x35a   : > { %v2375_v6 = vadd.f32 %v2374_v63, %v7233_v23  ;;  %v2376_v8 = vpop.f32.mrb[37].mxu0 }
 0x35b   : > { %v2377_v47 = vadd.f32 %v2376_v8, %v7233_v23  ;;  %v2378_v60 = vpop.f32.mrb[38].mxu0 }
 0x35c   : > { %v4103_v35 = vmul.f32 -1.442695, %v2375_v6  ;;  %v2379_v3 = vadd.f32 %v2378_v60, %v7244_v16  ;;  %v2380_v41 = vpop.f32.mrb[39].mxu0 }
 0x35d   : > { %v4104_v62 = vmul.f32 -1.442695, %v2377_v47  ;;  %v2381_v49 = vadd.f32 %v2380_v41, %v7244_v16 }
 0x35e   : > { %5022 = vpow2.f32 %v4103_v35  ;;  %v4119_v34 = vmul.f32 -1.442695, %v2379_v3  ;;  %v2427_v55 = vpop.f32.mrb[36].mxu1 }
 0x35f   : > { %5024 = vpow2.f32 %v4104_v62  ;;  %v4120_v25 = vmul.f32 -1.442695, %v2381_v49  ;;  %v2428_v56 = vadd.f32 %v2427_v55, %v7233_v23  ;;  %v2429_v61 = vpop.f32.mrb[37].mxu1 }
 0x360   : > { %5026 = vpow2.f32 %v4119_v34  ;;  %v2430_v18 = vadd.f32 %v2429_v61, %v7233_v23  ;;  %v2431_v5 = vpop.f32.mrb[38].mxu1 }
 0x361   : > { %5028 = vpow2.f32 %v4120_v25  ;;  %v4105_v2 = vmul.f32 -1.442695, %v2428_v56  ;;  %v2432_v59 = vadd.f32 %v2431_v5, %v7244_v16  ;;  %v2433_v48 = vpop.f32.mrb[39].mxu1 }
 0x362   : > { %v4106_v21 = vmul.f32 -1.442695, %v2430_v18  ;;  %v2434_v37 = vadd.f32 %v2433_v48, %v7244_v16  ;;  %v7255_v18 = vpop.permute.xlu0 %2296 }
 0x363   : > { %5030 = vpow2.f32 %v4105_v2  ;;  %v4121_v63 = vmul.f32 -1.442695, %v2432_v59 }
 0x364   : > { %5032 = vpow2.f32 %v4106_v21  ;;  %v4122_v6 = vmul.f32 -1.442695, %v2434_v37 }
 0x365   : > { %5034 = vpow2.f32 %v4121_v63 }
 0x366   : > { %5036 = vpow2.f32 %v4122_v6  ;;  %v7266_v6 = vld [vmem:[%s8227_s3 + $0x200] sm:$0xff] }
 0x368   : > { %v5023_v8 = vpop.eup %5022 }
 0x369   : > { %v5025_v47 = vpop.eup %5024  ;;  %v2850_v60 = vadd.f32 1.0, %v5023_v8  ;;  %v7269_v8 = vmul.f32 0.70710677, %v6270_v33  ;;  %v2365_v33 = vadd.f32 %v7225_v36, %v7255_v18  ;;  %v1868_v36 = vmul.f32 0.70710677, %v6361_v1 }
 0x36a   : > { %v5027_v35 = vpop.eup %5026  ;;  %v2851_v3 = vadd.f32 1.0, %v5025_v47  ;;  %v7274_v47 = vld [vmem:[%s8227_s3 + $0x208] sm:$0xff]  ;;  %v2418_v1 = vadd.f32 %v7235_v51, %v7255_v18 }
 0x36b   : > { %v5029_v41 = vpop.eup %5028  ;;  %5038 = vrcp.f32 %v2850_v60  ;;  %v2866_v62 = vadd.f32 1.0, %v5027_v35  ;;  %v7279_v60 = vld [vmem:[%s8227_s3 + $0x290] sm:$0xff]  ;;  %v7284_v35 = vld [vmem:[%s8227_s3 + $0x298] sm:$0xff] }
 0x36c   : > { %5040 = vrcp.f32 %v2851_v3  ;;  %v2867_v49 = vadd.f32 1.0, %v5029_v41  ;;  %v7287_v3 = vmul.f32 0.70710677, %v6404_v28  ;;  %v1852_v41 = vmul.f32 0.70710677, %v6345_v30 }
 0x36d   : > { %v5031_v34 = vpop.eup %5030  ;;  %5042 = vrcp.f32 %v2866_v62  ;;  %v7293_v62 = vmul.f32 0.70710677, %v6421_v46  ;;  %v1853_v28 = vmul.f32 0.70710677, %v6378_v57 }
 0x36e   : > { %v5033_v55 = vpop.eup %5032  ;;  %5044 = vrcp.f32 %v2867_v49  ;;  %v2852_v25 = vadd.f32 1.0, %v5031_v34  ;;  %v7253_v56 = vpop.f32.mrb[40].mxu0  ;;  %v7296_v49 = vmul.f32 0.70710677, %v6275_v24 }
 0x36f   : > { %v5035_v61 = vpop.eup %5034  ;;  %v2853_v5 = vadd.f32 1.0, %v5033_v55  ;;  %v7257_v2 = vpop.f32.mrb[41].mxu0 }
 0x370   : > { %v5037_v59 = vpop.eup %5036  ;;  %5046 = vrcp.f32 %v2852_v25  ;;  %v2868_v48 = vadd.f32 1.0, %v5035_v61  ;;  %v7259_v21 = vpop.f32.mrb[42].mxu0  ;;  %v2367_v25 = vadd.f32 %v7227_v39, %v7255_v18  ;;  %v1869_v61 = vmul.f32 0.70710677, %v6371_v54 }
 0x371   : > { %5048 = vrcp.f32 %v2853_v5  ;;  %v2869_v37 = vadd.f32 1.0, %v5037_v59  ;;  %v7261_v63 = vpop.f32.mrb[43].mxu0  ;;  %v7298_v55 = vpop.permute.xlu0 %2301  ;;  %v4512_v39 = vpack.c.bf16 %v7284_v35, %v7279_v60 }
 0x372   : > { %5050 = vrcp.f32 %v2868_v48  ;;  %v2369_v30 = vadd.f32 %v7229_v42, %v7298_v55  ;;  %v4510_v48 = vpack.c.bf16 %v7274_v47, %v7266_v6  ;;  %v2371_v54 = vadd.f32 %v7231_v10, %v7298_v55 }
 0x373   : > { %5052 = vrcp.f32 %v2869_v37  ;;  %v2420_v6 = vadd.f32 %v7237_v7, %v7255_v18  ;;  %v2422_v51 = vadd.f32 %v7239_v40, %v7298_v55  ;;  %v2424_v7 = vadd.f32 %v7241_v17, %v7298_v55  ;;  %v3077_v40 = vld [vmem:[%s8227_s3 + $0x218] sm:$0xff]  ;;  %v3106_v17 = vld [vmem:[%s8227_s3 + $0x300] sm:$0xff] }
 0x375   : > { %v5039_v34 = vpop.eup %5038 }
 0x376   : > { %v5041_v5 = vpop.eup %5040  ;;  %v2480_v46 = vpop.f32.mrb[44].mxu0  ;;  %v2946_v24 = vmul.f32 %v5039_v34, %v2365_v33 }
 0x377   : > { %v7307_v59 = vpop.f32.mrb[40].mxu1  ;;  %v5043_v37 = vpop.eup %5042  ;;  %v2481_v57 = vadd.f32 %v2480_v46, %v7233_v23  ;;  %v2947_v43 = vmul.f32 %v5041_v5, %v2367_v25 }
 0x378   : > { %v2482_v42 = vpop.f32.mrb[45].mxu0  ;;  %v7318_v4 = vpop.f32.mrb[41].mxu1  ;;  %v2978_v34 = vadd.f32 %v2946_v24, %v1852_v41  ;;  %v2962_v10 = vmul.f32 %v5043_v37, %v2369_v30  ;;  %v3076_v41 = vld [vmem:[%s8227_s3 + $0x210] sm:$0xff]  ;;  %v3094_v37 = vld [vmem:[%s8227_s3 + $0x2a0] sm:$0xff] }
 0x379   : > { %v5045_v33 = vpop.eup %5044  ;;  %v2483_v47 = vadd.f32 %v2482_v42, %v7233_v23  ;;  %v2484_v60 = vpop.f32.mrb[46].mxu0  ;;  %v4107_v52 = vmul.f32 -1.442695, %v2481_v57  ;;  %v2979_v25 = vadd.f32 %v2947_v43, %v1853_v28 }
 0x37a   : > { %v7323_v35 = vpop.f32.mrb[42].mxu1  ;;  %v2485_v46 = vadd.f32 %v2484_v60, %v7244_v16  ;;  %v2486_v53 = vpop.f32.mrb[47].mxu0  ;;  %v2963_v50 = vmul.f32 %v5045_v33, %v2371_v54  ;;  %v2994_v43 = vadd.f32 %v2962_v10, %v1868_v36  ;;  %v3095_v36 = vld [vmem:[%s8227_s3 + $0x2a8] sm:$0xff]  ;;  %v4514_v10 = vpack.c.bf16 %v3077_v40, %v3076_v41  ;;  %v3096_v41 = vld [vmem:[%s8227_s3 + $0x2b0] sm:$0xff]  ;;  %v3097_v40 = vld [vmem:[%s8227_s3 + $0x2b8] sm:$0xff] }
 0x37b   : > { %v7328_v11 = vpop.f32.mrb[43].mxu1  ;;  %v5047_v5 = vpop.eup %5046  ;;  %v4108_v42 = vmul.f32 -1.442695, %v2483_v47  ;;  %v2487_v9 = vadd.f32 %v2486_v53, %v7244_v16  ;;  %5054 = vpow2.f32 %v4107_v52  ;;  %3330 = vmatprep.mubr.f32.mxu0 %v2979_v25  ;;  %v3107_v53 = vld [vmem:[%s8227_s3 + $0x308] sm:$0xff]  ;;  %v3125_v47 = vld [vmem:[%s8227_s3 + $0x398] sm:$0xff]  ;;  %v3078_v25 = vld [vmem:[%s8227_s3 + $0x220] sm:$0xff] }
 0x37c   : > { %v5049_v30 = vpop.eup %5048  ;;  %v4123_v24 = vmul.f32 -1.442695, %v2485_v46  ;;  %v2948_v28 = vmul.f32 %v5047_v5, %v2418_v1  ;;  %3331 = vmatmul.mubr.f32.vlgmr.msra.gmra.mrb[64].mxu0 %v2978_v34  ;;  %v2995_v52 = vadd.f32 %v2963_v50, %v1869_v61  ;;  %v3124_v1 = vld [vmem:[%s8227_s3 + $0x390] sm:$0xff]  ;;  %v4542_v34 = vpack.c.bf16 %v3107_v53, %v3106_v17  ;;  %v3127_v17 = vld [vmem:[%s8227_s3 + $0x3a8] sm:$0xff] }
 0x37d   : > { %v5051_v54 = vpop.eup %5050  ;;  %5056 = vpow2.f32 %v4108_v42  ;;  %v4124_v57 = vmul.f32 -1.442695, %v2487_v9  ;;  %v2949_v33 = vmul.f32 %v5049_v30, %v2420_v6  ;;  %4511 = vmatpush3.bf16.msra.mxu0 %v4510_v48  ;;  %v3079_v48 = vld [vmem:[%s8227_s3 + $0x228] sm:$0xff]  ;;  %v4544_v42 = vpack.c.bf16 %v3125_v47, %v3124_v1  ;;  %v3081_v1 = vld [vmem:[%s8227_s3 + $0x238] sm:$0xff]  ;;  %v3110_v47 = vld [vmem:[%s8227_s3 + $0x320] sm:$0xff] }
 0x37e   : > { %v5053_v60 = vpop.eup %5052  ;;  %5058 = vpow2.f32 %v4123_v24  ;;  %v2980_v9 = vadd.f32 %v2948_v28, %v7269_v8  ;;  %v2964_v50 = vmul.f32 %v5051_v54, %v2422_v51  ;;  %3335 = vmatprep.mubr.f32.mxu0 %v2995_v52  ;;  %v2533_v61 = vpop.f32.mrb[44].mxu1  ;;  %4513 = vmatprep.subr.bf16.mxu0 %v4512_v39  ;;  %v3108_v8 = vld [vmem:[%s8227_s3 + $0x310] sm:$0xff]  ;;  %v4516_v39 = vpack.c.bf16 %v3095_v36, %v3094_v37 }
 0x37f   : > { %5060 = vpow2.f32 %v4124_v57  ;;  %v2981_v6 = vadd.f32 %v2949_v33, %v7287_v3  ;;  %v2965_v46 = vmul.f32 %v5053_v60, %v2424_v7  ;;  %v2534_v51 = vadd.f32 %v2533_v61, %v7233_v23  ;;  %v2535_v5 = vpop.f32.mrb[45].mxu1  ;;  %v3109_v7 = vld [vmem:[%s8227_s3 + $0x318] sm:$0xff]  ;;  %v3080_v36 = vld [vmem:[%s8227_s3 + $0x230] sm:$0xff]  ;;  %v3099_v61 = vld [vmem:[%s8227_s3 + $0x2c8] sm:$0xff] }
 0x380   : > { %v2996_v3 = vadd.f32 %v2964_v50, %v7296_v49  ;;  %v2536_v30 = vadd.f32 %v2535_v5, %v7233_v23  ;;  %v2537_v24 = vpop.f32.mrb[46].mxu1  ;;  %3336 = vmatmul.mubr.f32.gmra.mrb[66].mxu0 %v2994_v43  ;;  %v3126_v49 = vld [vmem:[%s8227_s3 + $0x3a0] sm:$0xff]  ;;  %v4518_v57 = vpack.c.bf16 %v3079_v48, %v3078_v25  ;;  %v4520_v33 = vpack.c.bf16 %v3097_v40, %v3096_v41 }
 0x381   : > { %3405 = vmatprep.mubr.f32.mxu1 %v2981_v6  ;;  %v2997_v28 = vadd.f32 %v2965_v46, %v7293_v62  ;;  %v4109_v53 = vmul.f32 -1.442695, %v2534_v51  ;;  %v2538_v37 = vadd.f32 %v2537_v24, %v7244_v16  ;;  %4515 = vmatpush3.bf16.msra.mxu0 %v4514_v10  ;;  %v2539_v54 = vpop.f32.mrb[47].mxu1  ;;  %v4546_v62 = vpack.c.bf16 %v3109_v7, %v3108_v8  ;;  %v3098_v50 = vld [vmem:[%s8227_s3 + $0x2c0] sm:$0xff]  ;;  %v3129_v46 = vld [vmem:[%s8227_s3 + $0x3b8] sm:$0xff]  ;;  %v3083_v7 = vld [vmem:[%s8227_s3 + $0x248] sm:$0xff] }
 0x382   : > { %3406 = vmatmul.mubr.f32.vlgmr.msra.gmra.mrb[64].mxu1 %v2980_v9  ;;  %v4110_v52 = vmul.f32 -1.442695, %v2536_v30  ;;  %v2540_v43 = vadd.f32 %v2539_v54, %v7244_v16  ;;  %4517 = vmatprep.subr.bf16.mxu0 %v4516_v39  ;;  %v4548_v10 = vpack.c.bf16 %v3127_v17, %v3126_v49  ;;  %v3111_v9 = vld [vmem:[%s8227_s3 + $0x328] sm:$0xff]  ;;  %v4522_v48 = vpack.c.bf16 %v3081_v1, %v3080_v36  ;;  %v3113_v24 = vld [vmem:[%s8227_s3 + $0x338] sm:$0xff]  ;;  %v3114_v1 = vld [vmem:[%s8227_s3 + $0x340] sm:$0xff] }
 0x383   : > { %4543 = vmatpush3.bf16.msra.mxu1 %v4542_v34  ;;  %3410 = vmatprep.mubr.f32.mxu1 %v2997_v28  ;;  %5062 = vpow2.f32 %v4109_v53  ;;  %v4125_v60 = vmul.f32 -1.442695, %v2538_v37  ;;  %v3128_v34 = vld [vmem:[%s8227_s3 + $0x3b0] sm:$0xff]  ;;  %v4550_v5 = vpack.c.bf16 %v3111_v9, %v3110_v47  ;;  %v4524_v39 = vpack.c.bf16 %v3099_v61, %v3098_v50  ;;  %v3101_v49 = vld [vmem:[%s8227_s3 + $0x2d8] sm:$0xff]  ;;  %v3130_v37 = vld [vmem:[%s8227_s3 + $0x3c0] sm:$0xff] }
 0x384   : > { %4545 = vmatprep.subr.bf16.mxu1 %v4544_v42  ;;  %5064 = vpow2.f32 %v4110_v52  ;;  %v4126_v6 = vmul.f32 -1.442695, %v2540_v43  ;;  %v3082_v42 = vld [vmem:[%s8227_s3 + $0x240] sm:$0xff]  ;;  %v4552_v30 = vpack.c.bf16 %v3129_v46, %v3128_v34  ;;  %v3100_v28 = vld [vmem:[%s8227_s3 + $0x2d0] sm:$0xff]  ;;  %v3131_v54 = vld [vmem:[%s8227_s3 + $0x3c8] sm:$0xff] }
 0x385   : > { %v5055_v25 = vpop.eup %5054  ;;  %5066 = vpow2.f32 %v4125_v60  ;;  %4519 = vmatpush3.bf16.msra.mxu0 %v4518_v57  ;;  %v4526_v52 = vpack.c.bf16 %v3083_v7, %v3082_v42  ;;  %v3085_v36 = vld [vmem:[%s8227_s3 + $0x258] sm:$0xff]  ;;  %v4556_v47 = vpack.c.bf16 %v3131_v54, %v3130_v37  ;;  %v3115_v60 = vld [vmem:[%s8227_s3 + $0x348] sm:$0xff]  ;;  %v3132_v50 = vld [vmem:[%s8227_s3 + $0x3d0] sm:$0xff]  ;;  %v7462_v46 = vmul.f32 0.70710677, %v6457_v14 }
 0x386   : > { %3411 = vmatmul.mubr.f32.gmra.mrb[66].mxu1 %v2996_v3  ;;  %v2854_v51 = vadd.f32 1.0, %v5055_v25  ;;  %5068 = vpow2.f32 %v4126_v6  ;;  %4521 = vmatprep.subr.bf16.mxu0 %v4520_v33  ;;  %v3112_v3 = vld [vmem:[%s8227_s3 + $0x330] sm:$0xff]  ;;  %v3103_v9 = vld [vmem:[%s8227_s3 + $0x2e8] sm:$0xff]  ;;  %v3133_v61 = vld [vmem:[%s8227_s3 + $0x3d8] sm:$0xff]  ;;  %v7465_v25 = vmul.f32 0.70710677, %v6546_v20 }
 0x387   : > { %v5057_v8 = vpop.eup %5056  ;;  %4547 = vmatpush3.bf16.msra.mxu1 %v4546_v62  ;;  %v4554_v43 = vpack.c.bf16 %v3113_v24, %v3112_v3  ;;  %v4528_v62 = vpack.c.bf16 %v3101_v49, %v3100_v28  ;;  %v3084_v33 = vld [vmem:[%s8227_s3 + $0x250] sm:$0xff]  ;;  %v3086_v42 = vld [vmem:[%s8227_s3 + $0x260] sm:$0xff]  ;;  %v3087_v14 = vld [vmem:[%s8227_s3 + $0x268] sm:$0xff]  ;;  %v1857_v37 = vmul.f32 0.70710677, %v6461_v13 }
 0x388   : > { %v5059_v41 = vpop.eup %5058  ;;  %v2855_v40 = vadd.f32 1.0, %v5057_v8  ;;  %4549 = vmatprep.subr.bf16.mxu1 %v4548_v10  ;;  %5070 = vrcp.f32 %v2854_v51  ;;  %v3102_v10 = vld [vmem:[%s8227_s3 + $0x2e0] sm:$0xff]  ;;  %v4530_v34 = vpack.c.bf16 %v3085_v36, %v3084_v33  ;;  %v3116_v20 = vld [vmem:[%s8227_s3 + $0x350] sm:$0xff]  ;;  %v3105_v28 = vld [vmem:[%s8227_s3 + $0x2f8] sm:$0xff]  ;;  %v4534_v33 = vpack.c.bf16 %v3087_v14, %v3086_v42 }
 0x389   : > { %v5061_v17 = vpop.eup %5060  ;;  %v2870_v53 = vadd.f32 1.0, %v5059_v41  ;;  %4523 = vmatpush3.bf16.msra.mxu0 %v4522_v48  ;;  %v3104_v24 = vld [vmem:[%s8227_s3 + $0x2f0] sm:$0xff]  ;;  %v3134_v54 = vld [vmem:[%s8227_s3 + $0x3e0] sm:$0xff]  ;;  %v3137_v42 = vld [vmem:[%s8227_s3 + $0x3f8] sm:$0xff] }
 0x38a   : > { %5072 = vrcp.f32 %v2855_v40  ;;  %v2871_v57 = vadd.f32 1.0, %v5061_v17  ;;  %4525 = vmatprep.subr.bf16.mxu0 %v4524_v39  ;;  %v4532_v39 = vpack.c.bf16 %v3103_v9, %v3102_v10  ;;  %v4560_v40 = vpack.c.bf16 %v3133_v61, %v3132_v50  ;;  %v7505_v13 = vld [vmem:[%s8227_s3 + $0x270] sm:$0xff]  ;;  %v7515_v10 = vld [vmem:[%s8227_s3 + $0x360] sm:$0xff]  ;;  %v3119_v9 = vld [vmem:[%s8227_s3 + $0x368] sm:$0xff] }
 0x38b   : > { %5074 = vrcp.f32 %v2870_v53  ;;  %4551 = vmatpush3.bf16.msra.mxu1 %v4550_v5  ;;  %v4558_v5 = vpack.c.bf16 %v3115_v60, %v3114_v1  ;;  %v2473_v1 = vadd.f32 %v7257_v2, %v7255_v18  ;;  %v3089_v60 = vld [vmem:[%s8227_s3 + $0x278] sm:$0xff]  ;;  %v2475_v2 = vadd.f32 %v7259_v21, %v7298_v55  ;;  %v3136_v21 = vld [vmem:[%s8227_s3 + $0x3f0] sm:$0xff]  ;;  %v7539_v14 = vld [vmem:[%s8227_s3 + $0x400] sm:$0xff] }
 0x38c   : > { %5076 = vrcp.f32 %v2871_v57  ;;  %4553 = vmatprep.subr.bf16.mxu1 %v4552_v30  ;;  %v3117_v30 = vld [vmem:[%s8227_s3 + $0x358] sm:$0xff]  ;;  %v3135_v57 = vld [vmem:[%s8227_s3 + $0x3e8] sm:$0xff] }
 0x38d   : > { %v5063_v6 = vpop.eup %5062  ;;  %4527 = vmatpush3.bf16.msra.mxu0 %v4526_v52  ;;  %v2471_v52 = vadd.f32 %v7253_v56, %v7255_v18  ;;  %v4536_v56 = vpack.c.bf16 %v3105_v28, %v3104_v24  ;;  %v4564_v61 = vpack.c.bf16 %v3135_v57, %v3134_v54  ;;  %v7553_v24 = vld [vmem:[%s8227_s3 + $0x370] sm:$0xff]  ;;  %v1873_v57 = vmul.f32 0.70710677, %v6465_v15  ;;  %v7577_v15 = vld [vmem:[%s8227_s3 + $0x580] sm:$0xff] }
 0x38e   : > { %v5065_v48 = vpop.eup %5064  ;;  %v2856_v8 = vadd.f32 1.0, %v5063_v6  ;;  %v7467_v51 = vpop.f32.mrb[48].mxu0  ;;  %4529 = vmatprep.subr.bf16.mxu0 %v4528_v62 }
 0x38f   : > { %4555 = vmatpush3.bf16.msra.mxu1 %v4554_v43  ;;  %v5067_v7 = vpop.eup %5066  ;;  %v2857_v3 = vadd.f32 1.0, %v5065_v48  ;;  %v7478_v41 = vpop.f32.mrb[49].mxu0  ;;  %v3155_v48 = vld [vmem:[%s8227_s3 + $0x488] sm:$0xff] }
 0x390   : > { %4557 = vmatprep.subr.bf16.mxu1 %v4556_v47  ;;  %v5069_v49 = vpop.eup %5068  ;;  %5078 = vrcp.f32 %v2856_v8  ;;  %v2872_v17 = vadd.f32 1.0, %v5067_v7  ;;  %v7489_v53 = vpop.f32.mrb[50].mxu0  ;;  %v4562_v47 = vpack.c.bf16 %v3117_v30, %v3116_v20  ;;  %v1872_v20 = vmul.f32 0.70710677, %v6449_v19  ;;  %v7548_v30 = vld [vmem:[%s8227_s3 + $0x408] sm:$0xff]  ;;  %v7558_v19 = vld [vmem:[%s8227_s3 + $0x378] sm:$0xff] }
 0x391   : > { %5080 = vrcp.f32 %v2857_v3  ;;  %v2873_v43 = vadd.f32 1.0, %v5069_v49  ;;  %4531 = vmatpush3.bf16.msra.mxu0 %v4530_v34  ;;  %v7500_v62 = vpop.f32.mrb[51].mxu0  ;;  %v3154_v34 = vld [vmem:[%s8227_s3 + $0x480] sm:$0xff]  ;;  %v4566_v3 = vpack.c.bf16 %v3119_v9, %v7515_v10 }
 0x392   : > { %v5071_v36 = vpop.eup %5070  ;;  %5082 = vrcp.f32 %v2872_v17  ;;  %4533 = vmatprep.subr.bf16.mxu0 %v4532_v39  ;;  %v4572_v54 = vpack.c.bf16 %v3155_v48, %v3154_v34  ;;  %v2524_v34 = vadd.f32 %v7307_v59, %v7255_v18  ;;  %v3140_v59 = vld [vmem:[%s8227_s3 + $0x410] sm:$0xff] }
 0x393   : > { %4559 = vmatpush3.bf16.msra.mxu1 %v4558_v5  ;;  %5084 = vrcp.f32 %v2873_v43  ;;  %v2950_v6 = vmul.f32 %v5071_v36, %v2471_v52  ;;  %v2477_v5 = vadd.f32 %v7261_v63, %v7298_v55  ;;  %v4538_v63 = vpack.c.bf16 %v3089_v60, %v7505_v13  ;;  %v3156_v43 = vld [vmem:[%s8227_s3 + $0x490] sm:$0xff] }
 0x394   : > { %v5073_v50 = vpop.eup %5072  ;;  %4561 = vmatprep.subr.bf16.mxu1 %v4560_v40  ;;  %v1858_v60 = vmul.f32 0.70710677, %v6528_v12 }
 0x395   : > { %v5075_v8 = vpop.eup %5074  ;;  %v2951_v39 = vmul.f32 %v5073_v50, %v2473_v1  ;;  %4535 = vmatpush3.bf16.msra.mxu0 %v4534_v33  ;;  %v2982_v40 = vadd.f32 %v2950_v6, %v7462_v46  ;;  %v3157_v33 = vld [vmem:[%s8227_s3 + $0x498] sm:$0xff]  ;;  %v4570_v6 = vpack.c.bf16 %v7558_v19, %v7553_v24  ;;  %v2528_v24 = vadd.f32 %v7323_v35, %v7298_v55 }
 0x396   : > { %v5077_v7 = vpop.eup %5076  ;;  %v2966_v28 = vmul.f32 %v5075_v8, %v2475_v2  ;;  %v2586_v49 = vpop.f32.mrb[52].mxu0  ;;  %4537 = vmatprep.subr.bf16.mxu0 %v4536_v56  ;;  %v3187_v56 = vld [vmem:[%s8227_s3 + $0x588] sm:$0xff]  ;;  %v2530_v35 = vadd.f32 %v7328_v11, %v7298_v55 }
 0x397   : > { %4563 = vmatpush3.bf16.msra.mxu1 %v4562_v47  ;;  %v7560_v17 = vpop.f32.mrb[48].mxu1  ;;  %v2983_v46 = vadd.f32 %v2951_v39, %v1857_v37  ;;  %v2967_v52 = vmul.f32 %v5077_v7, %v2477_v5  ;;  %v2587_v13 = vadd.f32 %v2586_v49, %v7233_v23  ;;  %v2588_v36 = vpop.f32.mrb[53].mxu0  ;;  %v4568_v47 = vpack.c.bf16 %v3137_v42, %v3136_v21  ;;  %v3141_v7 = vld [vmem:[%s8227_s3 + $0x418] sm:$0xff]  ;;  %v3158_v49 = vld [vmem:[%s8227_s3 + $0x4a0] sm:$0xff] }
 0x398   : > { %v7570_v1 = vpop.f32.mrb[49].mxu1  ;;  %4565 = vmatprep.subr.bf16.mxu1 %v4564_v61  ;;  %v7572_v37 = vadd.f32 %v2966_v28, %v1872_v20  ;;  %v2589_v10 = vadd.f32 %v2588_v36, %v7233_v23  ;;  %v2590_v9 = vpop.f32.mrb[54].mxu0  ;;  %v4574_v61 = vpack.c.bf16 %v7548_v30, %v7539_v14  ;;  %v4576_v39 = vpack.c.bf16 %v3157_v33, %v3156_v43  ;;  %v3171_v28 = vld [vmem:[%s8227_s3 + $0x508] sm:$0xff]  ;;  %v3188_v43 = vld [vmem:[%s8227_s3 + $0x590] sm:$0xff]  ;;  %v3189_v33 = vld [vmem:[%s8227_s3 + $0x598] sm:$0xff] }
 0x399   : > { %v7584_v50 = vpop.f32.mrb[50].mxu1  ;;  %3480 = vmatprep.mubr.f32.mxu0 %v2983_v46  ;;  %v2999_v2 = vadd.f32 %v2967_v52, %v1873_v57  ;;  %v4111_v48 = vmul.f32 -1.442695, %v2587_v13  ;;  %v2591_v8 = vadd.f32 %v2590_v9, %v7244_v16  ;;  %4539 = vmatpush3.bf16.msra.mxu0 %v4538_v63  ;;  %v2592_v12 = vpop.f32.mrb[55].mxu0  ;;  %v2526_v42 = vadd.f32 %v7318_v4, %v7255_v18  ;;  %v3159_v52 = vld [vmem:[%s8227_s3 + $0x4a8] sm:$0xff]  ;;  %v3142_v9 = vld [vmem:[%s8227_s3 + $0x420] sm:$0xff] }
 0x39a   : > { %v7593_v5 = vpop.f32.mrb[51].mxu1  ;;  %v5079_v21 = vpop.eup %5078  ;;  %v4112_v20 = vmul.f32 -1.442695, %v2589_v10  ;;  %v2593_v14 = vadd.f32 %v2592_v12, %v7244_v16  ;;  %4573 = vmatprep.subr.bf16.mxu0 %v4572_v54  ;;  %v4604_v63 = vpack.c.bf16 %v3187_v56, %v7577_v15  ;;  %v4578_v11 = vpack.c.bf16 %v3141_v7, %v3140_v59  ;;  %v3160_v12 = vld [vmem:[%s8227_s3 + $0x4b0] sm:$0xff] }
 0x39b   : > { %4567 = vmatpush3.bf16.msra.mxu1 %v4566_v3  ;;  %v5081_v30 = vpop.eup %5080  ;;  %5086 = vpow2.f32 %v4111_v48  ;;  %v4127_v4 = vmul.f32 -1.442695, %v2591_v8  ;;  %v2952_v19 = vmul.f32 %v5079_v21, %v2524_v34  ;;  %v3170_v3 = vld [vmem:[%s8227_s3 + $0x500] sm:$0xff]  ;;  %v4608_v48 = vpack.c.bf16 %v3189_v33, %v3188_v43  ;;  %v3173_v8 = vld [vmem:[%s8227_s3 + $0x518] sm:$0xff]  ;;  %v3163_v43 = vld [vmem:[%s8227_s3 + $0x4c8] sm:$0xff] }
 0x39c   : > { %4569 = vmatprep.subr.bf16.mxu1 %v4568_v47  ;;  %v5083_v46 = vpop.eup %5082  ;;  %5088 = vpow2.f32 %v4112_v20  ;;  %v4128_v54 = vmul.f32 -1.442695, %v2593_v14  ;;  %3481 = vmatmul.mubr.f32.vlgmr.msra.gmra.mrb[68].mxu0 %v2982_v40  ;;  %v2953_v57 = vmul.f32 %v5081_v30, %v2526_v42  ;;  %v1875_v40 = vmul.f32 0.70710677, %v6565_v27  ;;  %v3172_v27 = vld [vmem:[%s8227_s3 + $0x510] sm:$0xff]  ;;  %v3190_v20 = vld [vmem:[%s8227_s3 + $0x5a0] sm:$0xff] }
 0x39d   : > { %v5085_v13 = vpop.eup %5084  ;;  %5090 = vpow2.f32 %v4127_v4  ;;  %3485 = vmatprep.mubr.f32.mxu0 %v2999_v2  ;;  %4575 = vmatpush3.bf16.msra.mxu0 %v4574_v61  ;;  %v2968_v36 = vmul.f32 %v5083_v46, %v2528_v24  ;;  %v4606_v56 = vpack.c.bf16 %v3171_v28, %v3170_v3  ;;  %v3143_v2 = vld [vmem:[%s8227_s3 + $0x428] sm:$0xff]  ;;  %v2984_v34 = vadd.f32 %v2952_v19, %v1858_v60  ;;  %v3144_v28 = vld [vmem:[%s8227_s3 + $0x430] sm:$0xff]  ;;  %v3174_v46 = vld [vmem:[%s8227_s3 + $0x520] sm:$0xff] }
 0x39e   : > { %5092 = vpow2.f32 %v4128_v54  ;;  %v2639_v47 = vpop.f32.mrb[52].mxu1  ;;  %4577 = vmatprep.subr.bf16.mxu0 %v4576_v39  ;;  %v2985_v15 = vadd.f32 %v2953_v57, %v7465_v25  ;;  %v2969_v10 = vmul.f32 %v5085_v13, %v2530_v35  ;;  %v4580_v25 = vpack.c.bf16 %v3159_v52, %v3158_v49  ;;  %v3161_v39 = vld [vmem:[%s8227_s3 + $0x4b8] sm:$0xff]  ;;  %v3191_v14 = vld [vmem:[%s8227_s3 + $0x5a8] sm:$0xff]  ;;  %v3162_v52 = vld [vmem:[%s8227_s3 + $0x4c0] sm:$0xff] }
 0x39f   : > { %4571 = vmatpush3.bf16.msra.mxu1 %v4570_v6  ;;  %v2640_v61 = vadd.f32 %v2639_v47, %v7233_v23  ;;  %v2641_v6 = vpop.f32.mrb[53].mxu1  ;;  %v4582_v30 = vpack.c.bf16 %v3143_v2, %v3142_v9  ;;  %v4610_v19 = vpack.c.bf16 %v3173_v8, %v3172_v27  ;;  %v4584_v3 = vpack.c.bf16 %v3161_v39, %v3160_v12  ;;  %v3145_v49 = vld [vmem:[%s8227_s3 + $0x438] sm:$0xff]  ;;  %v3175_v57 = vld [vmem:[%s8227_s3 + $0x528] sm:$0xff]  ;;  %v3192_v13 = vld [vmem:[%s8227_s3 + $0x5b0] sm:$0xff] }
 0x3a0   : > { %4605 = vmatprep.subr.bf16.mxu1 %v4604_v63  ;;  %v2642_v21 = vadd.f32 %v2641_v6, %v7233_v23  ;;  %3486 = vmatmul.mubr.f32.gmra.mrb[70].mxu0 %v7572_v37  ;;  %v2643_v42 = vpop.f32.mrb[54].mxu1  ;;  %v3001_v60 = vadd.f32 %v2969_v10, %v1875_v40  ;;  %v1874_v37 = vmul.f32 0.70710677, %v6541_v38  ;;  %v4612_v54 = vpack.c.bf16 %v3191_v14, %v3190_v20  ;;  %v7686_v47 = vld [vmem:[%s8227_s3 + $0x440] sm:$0xff]  ;;  %v7696_v27 = vld [vmem:[%s8227_s3 + $0x530] sm:$0xff]  ;;  %v3165_v8 = vld [vmem:[%s8227_s3 + $0x4d8] sm:$0xff] }
 0x3a1   : > { %3555 = vmatprep.mubr.f32.mxu1 %v2985_v15  ;;  %v4113_v59 = vmul.f32 -1.442695, %v2640_v61  ;;  %v2644_v7 = vadd.f32 %v2643_v42, %v7244_v16  ;;  %4579 = vmatpush3.bf16.msra.mxu0 %v4578_v11  ;;  %v2645_v63 = vpop.f32.mrb[55].mxu1  ;;  %v3193_v11 = vld [vmem:[%s8227_s3 + $0x5b8] sm:$0xff]  ;;  %v7691_v15 = vld [vmem:[%s8227_s3 + $0x448] sm:$0xff]  ;;  %v4614_v9 = vpack.c.bf16 %v3175_v57, %v3174_v46  ;;  %v4588_v2 = vpack.c.bf16 %v3163_v43, %v3162_v52  ;;  %v7706_v6 = vld [vmem:[%s8227_s3 + $0x4d0] sm:$0xff] }
 0x3a2   : > { %3556 = vmatmul.mubr.f32.vlgmr.msra.gmra.mrb[68].mxu1 %v2984_v34  ;;  %v4114_v24 = vmul.f32 -1.442695, %v2642_v21  ;;  %v2646_v4 = vadd.f32 %v2645_v63, %v7244_v16  ;;  %4581 = vmatprep.subr.bf16.mxu0 %v4580_v25  ;;  %v3000_v35 = vadd.f32 %v2968_v36, %v1874_v37  ;;  %v4586_v36 = vpack.c.bf16 %v3145_v49, %v3144_v28  ;;  %v7701_v61 = vld [vmem:[%s8227_s3 + $0x538] sm:$0xff]  ;;  %v7714_v12 = vld [vmem:[%s8227_s3 + $0x5c0] sm:$0xff]  ;;  %v7719_v39 = vld [vmem:[%s8227_s3 + $0x5c8] sm:$0xff] }
 0x3a3   : > { %4607 = vmatpush3.bf16.msra.mxu1 %v4606_v56  ;;  %3560 = vmatprep.mubr.f32.mxu1 %v3001_v60  ;;  %5094 = vpow2.f32 %v4113_v59  ;;  %v4129_v38 = vmul.f32 -1.442695, %v2644_v7  ;;  %v7722_v21 = vmul.f32 0.70710677, %v6596_v32  ;;  %v7727_v20 = vld [vmem:[%s8227_s3 + $0x450] sm:$0xff]  ;;  %v7732_v14 = vld [vmem:[%s8227_s3 + $0x458] sm:$0xff] }
 0x3a4   : > { %4609 = vmatprep.subr.bf16.mxu1 %v4608_v48  ;;  %5096 = vpow2.f32 %v4114_v24  ;;  %v4130_v33 = vmul.f32 -1.442695, %v2646_v4  ;;  %v4616_v48 = vpack.c.bf16 %v3193_v11, %v3192_v13  ;;  %v7737_v59 = vld [vmem:[%s8227_s3 + $0x540] sm:$0xff]  ;;  %v7742_v32 = vld [vmem:[%s8227_s3 + $0x548] sm:$0xff]  ;;  %v7765_v24 = vmul.f32 0.70710677, %v6610_v45 }
 0x3a5   : > { %v5087_v40 = vpop.eup %5086  ;;  %5098 = vpow2.f32 %v4129_v38  ;;  %4583 = vmatpush3.bf16.msra.mxu0 %v4582_v30  ;;  %v7747_v7 = vld [vmem:[%s8227_s3 + $0x4e0] sm:$0xff]  ;;  %v7752_v63 = vld [vmem:[%s8227_s3 + $0x4e8] sm:$0xff]  ;;  %v7777_v28 = vld [vmem:[%s8227_s3 + $0x5d8] sm:$0xff]  ;;  %v7790_v46 = vmul.f32 0.70710677, %v6501_v26  ;;  %v4620_v13 = vpack.c.bf16 %v7719_v39, %v7714_v12 }
 0x3a6   : > { %3561 = vmatmul.mubr.f32.gmra.mrb[70].mxu1 %v3000_v35  ;;  %v5089_v56 = vpop.eup %5088  ;;  %v2858_v10 = vadd.f32 1.0, %v5087_v40  ;;  %5100 = vpow2.f32 %v4130_v33  ;;  %4585 = vmatprep.subr.bf16.mxu0 %v4584_v3  ;;  %v7757_v30 = vld [vmem:[%s8227_s3 + $0x460] sm:$0xff]  ;;  %v7762_v37 = vld [vmem:[%s8227_s3 + $0x468] sm:$0xff]  ;;  %v7772_v3 = vld [vmem:[%s8227_s3 + $0x5d0] sm:$0xff]  ;;  %v4618_v35 = vpack.c.bf16 %v7701_v61, %v7696_v27  ;;  %v7813_v43 = vmul.f32 0.70710677, %v6509_v31 }
 0x3a7   : > { %4611 = vmatpush3.bf16.msra.mxu1 %v4610_v19  ;;  %v5091_v34 = vpop.eup %5090  ;;  %v2859_v25 = vadd.f32 1.0, %v5089_v56  ;;  %v4590_v19 = vpack.c.bf16 %v7691_v15, %v7686_v47  ;;  %v7782_v45 = vld [vmem:[%s8227_s3 + $0x550] sm:$0xff]  ;;  %v7787_v49 = vld [vmem:[%s8227_s3 + $0x558] sm:$0xff]  ;;  %v7827_v40 = vld [vmem:[%s8227_s3 + $0x5e0] sm:$0xff]  ;;  %v4594_v27 = vpack.c.bf16 %v7732_v14, %v7727_v20  ;;  %v4622_v61 = vpack.c.bf16 %v7742_v32, %v7737_v59 }
 0x3a8   : > { %4613 = vmatprep.subr.bf16.mxu1 %v4612_v54  ;;  %v5093_v42 = vpop.eup %5092  ;;  %5102 = vrcp.f32 %v2858_v10  ;;  %v2874_v60 = vadd.f32 1.0, %v5091_v34  ;;  %v4592_v54 = vpack.c.bf16 %v3165_v8, %v7706_v6  ;;  %v7800_v57 = vld [vmem:[%s8227_s3 + $0x4f0] sm:$0xff]  ;;  %v7805_v26 = vld [vmem:[%s8227_s3 + $0x4f8] sm:$0xff]  ;;  %v7832_v31 = vld [vmem:[%s8227_s3 + $0x5e8] sm:$0xff]  ;;  %v4596_v6 = vpack.c.bf16 %v7752_v63, %v7747_v7 }
 0x3a9   : > { %5104 = vrcp.f32 %v2859_v25  ;;  %v2875_v4 = vadd.f32 1.0, %v5093_v42  ;;  %4587 = vmatpush3.bf16.msra.mxu0 %v4586_v36  ;;  %v7810_v52 = vld [vmem:[%s8227_s3 + $0x470] sm:$0xff]  ;;  %v7822_v11 = vld [vmem:[%s8227_s3 + $0x478] sm:$0xff]  ;;  %v7835_v36 = vmul.f32 0.70710677, %v6505_v0  ;;  %v7842_v15 = vld [vmem:[%s8227_s3 + $0x560] sm:$0xff]  ;;  %v4624_v42 = vpack.c.bf16 %v7777_v28, %v7772_v3 }
 0x3aa   : > { %5106 = vrcp.f32 %v2874_v60  ;;  %v7792_v38 = vpop.f32.mrb[56].mxu0  ;;  %4589 = vmatprep.subr.bf16.mxu0 %v4588_v2  ;;  %v7847_v56 = vld [vmem:[%s8227_s3 + $0x568] sm:$0xff]  ;;  %v7852_v10 = vld [vmem:[%s8227_s3 + $0x680] sm:$0xff]  ;;  %v7855_v0 = vmul.f32 0.70710677, %v6513_v29  ;;  %v7875_v25 = vld [vmem:[%s8227_s3 + $0x5f0] sm:$0xff]  ;;  %v4626_v60 = vpack.c.bf16 %v7787_v49, %v7782_v45  ;;  %v4600_v20 = vpack.c.bf16 %v7805_v26, %v7800_v57 }
 0x3ab   : > { %4615 = vmatpush3.bf16.msra.mxu1 %v4614_v9  ;;  %5108 = vrcp.f32 %v2875_v4  ;;  %v7815_v33 = vpop.f32.mrb[57].mxu0  ;;  %v7870_v29 = vld [vmem:[%s8227_s3 + $0x688] sm:$0xff]  ;;  %v7893_v14 = vld [vmem:[%s8227_s3 + $0x600] sm:$0xff]  ;;  %v7903_v32 = vld [vmem:[%s8227_s3 + $0x570] sm:$0xff]  ;;  %v4628_v3 = vpack.c.bf16 %v7832_v31, %v7827_v40  ;;  %v2577_v31 = vadd.f32 %v7467_v51, %v7255_v18  ;;  %v2579_v51 = vadd.f32 %v7478_v41, %v7255_v18 }
 0x3ac   : > { %4617 = vmatprep.subr.bf16.mxu1 %v4616_v48  ;;  %v7837_v47 = vpop.f32.mrb[58].mxu0  ;;  %v7880_v48 = vld [vmem:[%s8227_s3 + $0x5f8] sm:$0xff]  ;;  %v7898_v59 = vld [vmem:[%s8227_s3 + $0x608] sm:$0xff]  ;;  %v7921_v49 = vld [vmem:[%s8227_s3 + $0x690] sm:$0xff]  ;;  %v2581_v28 = vadd.f32 %v7489_v53, %v7298_v55 }
 0x3ad   : > { %v5095_v9 = vpop.eup %5094  ;;  %4591 = vmatpush3.bf16.msra.mxu0 %v4590_v19  ;;  %v7857_v2 = vpop.f32.mrb[59].mxu0  ;;  %v7916_v45 = vld [vmem:[%s8227_s3 + $0x578] sm:$0xff]  ;;  %v7948_v40 = vld [vmem:[%s8227_s3 + $0x788] sm:$0xff] }
 0x3ae   : > { %v5097_v8 = vpop.eup %5096  ;;  %v2860_v12 = vadd.f32 1.0, %v5095_v9  ;;  %v7882_v39 = vpop.f32.mrb[56].mxu1  ;;  %4593 = vmatprep.subr.bf16.mxu0 %v4592_v54 }
 0x3af   : > { %4619 = vmatpush3.bf16.msra.mxu1 %v4618_v35  ;;  %v5099_v7 = vpop.eup %5098  ;;  %v2861_v63 = vadd.f32 1.0, %v5097_v8  ;;  %v7905_v4 = vpop.f32.mrb[57].mxu1  ;;  %v7926_v35 = vld [vmem:[%s8227_s3 + $0x698] sm:$0xff] }
 0x3b0   : > { %8576 = vst [vmem:[#allocation10_spill] sm:$0xff] %v7905_v4  ;;  %4621 = vmatprep.subr.bf16.mxu1 %v4620_v13  ;;  %v5101_v54 = vpop.eup %5100  ;;  %5110 = vrcp.f32 %v2860_v12  ;;  %v2876_v57 = vadd.f32 1.0, %v5099_v7  ;;  %v7928_v26 = vpop.f32.mrb[58].mxu1  ;;  %v7943_v7 = vld [vmem:[%s8227_s3 + $0x780] sm:$0xff] }
 0x3b1   : > { %8577 = vst [vmem:[#allocation30_spill] sm:$0xff] %v7928_v26  ;;  %5112 = vrcp.f32 %v2861_v63  ;;  %v2877_v9 = vadd.f32 1.0, %v5101_v54  ;;  %4595 = vmatpush3.bf16.msra.mxu0 %v4594_v27  ;;  %v7936_v8 = vpop.f32.mrb[59].mxu1 }
 0x3b2   : > { %8578 = vst [vmem:[#allocation19_spill] sm:$0xff] %v7936_v8  ;;  %v5103_v13 = vpop.eup %5102  ;;  %5114 = vrcp.f32 %v2876_v57  ;;  %v2692_v27 = vpop.f32.mrb[60].mxu0  ;;  %4597 = vmatprep.subr.bf16.mxu0 %v4596_v6 }
 0x3b3   : > { %4623 = vmatpush3.bf16.msra.mxu1 %v4622_v61  ;;  %v5105_v12 = vpop.eup %5104  ;;  %5116 = vrcp.f32 %v2877_v9  ;;  %v2693_v19 = vadd.f32 %v2692_v27, %v7233_v23  ;;  %v2694_v34 = vpop.f32.mrb[61].mxu0  ;;  %v2954_v41 = vmul.f32 %v5103_v13, %v2577_v31  ;;  %v2583_v61 = vadd.f32 %v7500_v62, %v7298_v55 }
 0x3b4   : > { %4625 = vmatprep.subr.bf16.mxu1 %v4624_v42  ;;  %v5107_v57 = vpop.eup %5106  ;;  %v2695_v6 = vadd.f32 %v2694_v34, %v7233_v23  ;;  %v2696_v63 = vpop.f32.mrb[62].mxu0  ;;  %v2955_v8 = vmul.f32 %v5105_v12, %v2579_v51  ;;  %v8579_v9 = vpack.c.bf16 %v7762_v37, %v7757_v30 }
 0x3b5   : > { %v5109_v26 = vpop.eup %5108  ;;  %v4115_v4 = vmul.f32 -1.442695, %v2693_v19  ;;  %v2697_v53 = vadd.f32 %v2696_v63, %v7244_v16  ;;  %v2698_v42 = vpop.f32.mrb[63].mxu0  ;;  %v2986_v13 = vadd.f32 %v2954_v41, %v7790_v46  ;;  %v2970_v31 = vmul.f32 %v5107_v57, %v2581_v28  ;;  %v3222_v57 = vld [vmem:[%s8227_s3 + $0x6a0] sm:$0xff] }
 0x3b6   : > { %4599 = vmatpush3.bf16.msra.mxu0 %v8579_v9  ;;  %v4116_v62 = vmul.f32 -1.442695, %v2695_v6  ;;  %v2699_v34 = vadd.f32 %v2698_v42, %v7244_v16  ;;  %v2745_v12 = vpop.f32.mrb[60].mxu1  ;;  %v2987_v51 = vadd.f32 %v2955_v8, %v7813_v43  ;;  %v2971_v27 = vmul.f32 %v5109_v26, %v2583_v61  ;;  %v3223_v6 = vld [vmem:[%s8227_s3 + $0x6a8] sm:$0xff]  ;;  %v3253_v9 = vld [vmem:[%s8227_s3 + $0x798] sm:$0xff] }
 0x3b7   : > { %4627 = vmatpush3.bf16.msra.mxu1 %v4626_v60  ;;  %4601 = vmatprep.subr.bf16.mxu0 %v4600_v20  ;;  %5118 = vpow2.f32 %v4115_v4  ;;  %v4131_v19 = vmul.f32 -1.442695, %v2697_v53  ;;  %v2746_v63 = vadd.f32 %v2745_v12, %v7233_v23  ;;  %v2747_v54 = vpop.f32.mrb[61].mxu1  ;;  %v3002_v30 = vadd.f32 %v2970_v31, %v7835_v36  ;;  %v3252_v53 = vld [vmem:[%s8227_s3 + $0x790] sm:$0xff] }
 0x3b8   : > { %4629 = vmatprep.subr.bf16.mxu1 %v4628_v3  ;;  %5120 = vpow2.f32 %v4116_v62  ;;  %v4132_v37 = vmul.f32 -1.442695, %v2699_v34  ;;  %v2748_v46 = vadd.f32 %v2747_v54, %v7233_v23  ;;  %v2749_v28 = vpop.f32.mrb[62].mxu1  ;;  %3630 = vmatprep.mubr.f32.mxu0 %v2987_v51  ;;  %v3003_v60 = vadd.f32 %v2971_v27, %v7855_v0 }
 0x3b9   : > { %v2630_v43 = vadd.f32 %v7560_v17, %v7255_v18  ;;  %5122 = vpow2.f32 %v4131_v19  ;;  %v4117_v20 = vmul.f32 -1.442695, %v2746_v63  ;;  %v2750_v4 = vadd.f32 %v2749_v28, %v7244_v16  ;;  %v2751_v36 = vpop.f32.mrb[63].mxu1  ;;  %v3224_v63 = vld [vmem:[%s8227_s3 + $0x6b0] sm:$0xff] }
 0x3ba   : > { %v8580_v3 = vpack.c.bf16 %v7822_v11, %v7810_v52  ;;  %v5111_v26 = vpop.eup %5110  ;;  %v2632_v23 = vadd.f32 %v7570_v1, %v7255_v18  ;;  %5124 = vpow2.f32 %v4132_v37  ;;  %v4118_v8 = vmul.f32 -1.442695, %v2748_v46  ;;  %v3204_v52 = vld [vmem:[%s8227_s3 + $0x610] sm:$0xff]  ;;  %v3205_v1 = vld [vmem:[%s8227_s3 + $0x618] sm:$0xff] }
 0x3bb   : > { %v2752_v0 = vadd.f32 %v2751_v36, %v7244_v16  ;;  %v8581_v17 = vpack.c.bf16 %v7847_v56, %v7842_v15  ;;  %v8582_v54 = vpack.c.bf16 %v7870_v29, %v7852_v10  ;;  %v5113_v11 = vpop.eup %5112  ;;  %v2634_v16 = vadd.f32 %v7584_v50, %v7298_v55  ;;  %v3234_v10 = vld [vmem:[%s8227_s3 + $0x700] sm:$0xff]  ;;  %v3235_v29 = vld [vmem:[%s8227_s3 + $0x708] sm:$0xff]  ;;  %v3225_v37 = vld [vmem:[%s8227_s3 + $0x6b8] sm:$0xff] }
 0x3bc   : > { %4603 = vmatpush3.bf16.msra.mxu0 %v8580_v3  ;;  %5126 = vpow2.f32 %v4117_v20  ;;  %v4133_v41 = vmul.f32 -1.442695, %v2750_v4  ;;  %v8583_v15 = vpack.c.bf16 %v7880_v48, %v7875_v25  ;;  %v2956_v56 = vmul.f32 %v5111_v26, %v2630_v43  ;;  %v5115_v50 = vpop.eup %5114  ;;  %v3208_v3 = vld [vmem:[%s8227_s3 + $0x630] sm:$0xff]  ;;  %v3209_v36 = vld [vmem:[%s8227_s3 + $0x638] sm:$0xff]  ;;  %v3238_v26 = vld [vmem:[%s8227_s3 + $0x720] sm:$0xff] }
 0x3bd   : > { %4631 = vmatpush3.bf16.msra.mxu1 %v8581_v17  ;;  %4637 = vmatprep.subr.bf16.mxu0 %v8582_v54  ;;  %v2636_v61 = vadd.f32 %v7593_v5, %v7298_v55  ;;  %5128 = vpow2.f32 %v4118_v8  ;;  %v4134_v25 = vmul.f32 -1.442695, %v2752_v0  ;;  %v2957_v48 = vmul.f32 %v5113_v11, %v2632_v23  ;;  %v5117_v42 = vpop.eup %5116  ;;  %v3239_v17 = vld [vmem:[%s8227_s3 + $0x728] sm:$0xff]  ;;  %v3226_v54 = vld [vmem:[%s8227_s3 + $0x6c0] sm:$0xff] }
 0x3be   : > { %4633 = vmatprep.subr.bf16.mxu1 %v8583_v15  ;;  %5130 = vpow2.f32 %v4133_v41  ;;  %v8584_v5 = vpack.c.bf16 %v7898_v59, %v7893_v14  ;;  %v1879_v31 = vmul.f32 0.70710677, %v6619_v58  ;;  %v2972_v62 = vmul.f32 %v5115_v50, %v2634_v16  ;;  %v3206_v14 = vld [vmem:[%s8227_s3 + $0x620] sm:$0xff]  ;;  %v3207_v58 = vld [vmem:[%s8227_s3 + $0x628] sm:$0xff]  ;;  %v3236_v59 = vld [vmem:[%s8227_s3 + $0x710] sm:$0xff] }
 0x3bf   : > { %3631 = vmatmul.mubr.f32.vlgmr.msra.gmra.mrb[72].mxu0 %v2986_v13  ;;  %v4642_v13 = vpack.c.bf16 %v3205_v1, %v3204_v52  ;;  %5132 = vpow2.f32 %v4134_v25  ;;  %v8585_v34 = vpack.c.bf16 %v7916_v45, %v7903_v32  ;;  %v8586_v12 = vpack.c.bf16 %v7926_v35, %v7921_v49  ;;  %v3237_v35 = vld [vmem:[%s8227_s3 + $0x718] sm:$0xff]  ;;  %v3227_v52 = vld [vmem:[%s8227_s3 + $0x6c8] sm:$0xff]  ;;  %v3256_v16 = vld [vmem:[%s8227_s3 + $0x7b0] sm:$0xff] }
 0x3c0   : > { %3635 = vmatprep.mubr.f32.mxu0 %v3003_v60  ;;  %4639 = vmatpush3.bf16.msra.mxu0 %v8584_v5  ;;  %v2989_v51 = vadd.f32 %v2957_v48, %v7765_v24  ;;  %v4670_v27 = vpack.c.bf16 %v3235_v29, %v3234_v10  ;;  %v2973_v19 = vmul.f32 %v5117_v42, %v2636_v61  ;;  %v1878_v60 = vmul.f32 0.70710677, %v6605_v44  ;;  %v3257_v41 = vld [vmem:[%s8227_s3 + $0x7b8] sm:$0xff]  ;;  %v3210_v25 = vld [vmem:[%s8227_s3 + $0x640] sm:$0xff]  ;;  %v3211_v48 = vld [vmem:[%s8227_s3 + $0x648] sm:$0xff] }
 0x3c1   : > { %4635 = vmatpush3.bf16.msra.mxu1 %v8585_v34  ;;  %4641 = vmatprep.subr.bf16.mxu0 %v8586_v12  ;;  %v8587_v32 = vpack.c.bf16 %v7948_v40, %v7943_v7  ;;  %v2988_v24 = vadd.f32 %v2956_v56, %v7722_v21  ;;  %v4644_v45 = vpack.c.bf16 %v3223_v6, %v3222_v57  ;;  %v3254_v21 = vld [vmem:[%s8227_s3 + $0x7a0] sm:$0xff]  ;;  %v3255_v7 = vld [vmem:[%s8227_s3 + $0x7a8] sm:$0xff]  ;;  %v5119_v46 = vpop.eup %5118  ;;  %v3240_v6 = vld [vmem:[%s8227_s3 + $0x730] sm:$0xff] }
 0x3c2   : > { %v4672_v49 = vpack.c.bf16 %v3253_v9, %v3252_v53  ;;  %3705 = vmatprep.mubr.f32.mxu1 %v2989_v51  ;;  %v3005_v40 = vadd.f32 %v2973_v19, %v1879_v31  ;;  %v4646_v28 = vpack.c.bf16 %v3207_v58, %v3206_v14  ;;  %v5121_v43 = vpop.eup %5120  ;;  %v2862_v20 = vadd.f32 1.0, %v5119_v46  ;;  %v3241_v5 = vld [vmem:[%s8227_s3 + $0x738] sm:$0xff]  ;;  %v3258_v12 = vld [vmem:[%s8227_s3 + $0x7c0] sm:$0xff]  ;;  %v3259_v51 = vld [vmem:[%s8227_s3 + $0x7c8] sm:$0xff] }
 0x3c3   : > { %4669 = vmatprep.subr.bf16.mxu1 %v8587_v32  ;;  %3636 = vmatmul.mubr.f32.gmra.mrb[74].mxu0 %v3002_v30  ;;  %v4674_v30 = vpack.c.bf16 %v3237_v35, %v3236_v59  ;;  %v4648_v4 = vpack.c.bf16 %v3225_v37, %v3224_v63  ;;  %v5123_v23 = vpop.eup %5122  ;;  %v2863_v44 = vadd.f32 1.0, %v5121_v43  ;;  %v3004_v8 = vadd.f32 %v2972_v62, %v1878_v60  ;;  %v3229_v31 = vld [vmem:[%s8227_s3 + $0x6d8] sm:$0xff]  ;;  %v3212_v59 = vld [vmem:[%s8227_s3 + $0x650] sm:$0xff]  ;;  %v3230_v35 = vld [vmem:[%s8227_s3 + $0x6e0] sm:$0xff] }
 0x3c4   : > { %4643 = vmatpush3.bf16.msra.mxu0 %v4642_v13  ;;  %3706 = vmatmul.mubr.f32.vlgmr.msra.gmra.mrb[72].mxu1 %v2988_v24  ;;  %v4676_v0 = vpack.c.bf16 %v3255_v7, %v3254_v21  ;;  %v5125_v1 = vpop.eup %5124  ;;  %5134 = vrcp.f32 %v2862_v20  ;;  %v2878_v11 = vadd.f32 1.0, %v5123_v23  ;;  %v4650_v10 = vpack.c.bf16 %v3209_v36, %v3208_v3  ;;  %v3228_v13 = vld [vmem:[%s8227_s3 + $0x6d0] sm:$0xff]  ;;  %v3213_v32 = vld [vmem:[%s8227_s3 + $0x658] sm:$0xff]  ;;  %v3242_v24 = vld [vmem:[%s8227_s3 + $0x740] sm:$0xff] }
 0x3c5   : > { %4671 = vmatpush3.bf16.msra.mxu1 %v4670_v27  ;;  %3710 = vmatprep.mubr.f32.mxu1 %v3005_v40  ;;  %5136 = vrcp.f32 %v2863_v44  ;;  %v2879_v56 = vadd.f32 1.0, %v5125_v1  ;;  %v4678_v50 = vpack.c.bf16 %v3239_v17, %v3238_v26  ;;  %v4652_v61 = vpack.c.bf16 %v3227_v52, %v3226_v54  ;;  %v3231_v63 = vld [vmem:[%s8227_s3 + $0x6e8] sm:$0xff]  ;;  %v3214_v37 = vld [vmem:[%s8227_s3 + $0x660] sm:$0xff]  ;;  %v3260_v40 = vld [vmem:[%s8227_s3 + $0x7d0] sm:$0xff] }
 0x3c6   : > { %4645 = vmatprep.subr.bf16.mxu0 %v4644_v45  ;;  %4673 = vmatprep.subr.bf16.mxu1 %v4672_v49  ;;  %v5127_v15 = vpop.eup %5126  ;;  %5138 = vrcp.f32 %v2878_v11  ;;  %v4680_v42 = vpack.c.bf16 %v3257_v41, %v3256_v16  ;;  %v4654_v19 = vpack.c.bf16 %v3211_v48, %v3210_v25  ;;  %v4682_v14 = vpack.c.bf16 %v3241_v5, %v3240_v6  ;;  %v3243_v49 = vld [vmem:[%s8227_s3 + $0x748] sm:$0xff]  ;;  %v3261_v21 = vld [vmem:[%s8227_s3 + $0x7d8] sm:$0xff]  ;;  %v3244_v60 = vld [vmem:[%s8227_s3 + $0x750] sm:$0xff] }
 0x3c7   : > { %v5129_v29 = vpop.eup %5128  ;;  %v2864_v57 = vadd.f32 1.0, %v5127_v15  ;;  %5140 = vrcp.f32 %v2879_v56  ;;  %v4656_v58 = vpack.c.bf16 %v3229_v31, %v3228_v13  ;;  %v4684_v45 = vpack.c.bf16 %v3259_v51, %v3258_v12  ;;  %v3245_v43 = vld [vmem:[%s8227_s3 + $0x758] sm:$0xff]  ;;  %v8588_v36 = vld [vmem:[#allocation6_spill] sm:$0xff]  ;;  %v3232_v23 = vld [vmem:[%s8227_s3 + $0x6f0] sm:$0xff] }
 0x3c8   : > { %4647 = vmatpush3.bf16.msra.mxu0 %v4646_v28  ;;  %3711 = vmatmul.mubr.f32.gmra.mrb[74].mxu1 %v3004_v8  ;;  %v5131_v53 = vpop.eup %5130  ;;  %v2865_v9 = vadd.f32 1.0, %v5129_v29  ;;  %v2683_v7 = vadd.f32 %v7792_v38, %v7255_v18  ;;  %v4658_v46 = vpack.c.bf16 %v3213_v32, %v3212_v59  ;;  %v3215_v28 = vld [vmem:[%s8227_s3 + $0x668] sm:$0xff]  ;;  %v1864_v20 = vmul.f32 0.70710677, %v6554_v22  ;;  %v3233_v44 = vld [vmem:[%s8227_s3 + $0x6f8] sm:$0xff]  ;;  %v8589_v17 = vld [vmem:[#allocation5_spill] sm:$0xff] }
 0x3c9   : > { %4675 = vmatpush3.bf16.msra.mxu1 %v4674_v30  ;;  %4649 = vmatprep.subr.bf16.mxu0 %v4648_v4  ;;  %v5133_v62 = vpop.eup %5132  ;;  %5142 = vrcp.f32 %v2864_v57  ;;  %v2880_v34 = vadd.f32 1.0, %v5131_v53  ;;  %v2685_v38 = vadd.f32 %v7815_v33, %v7255_v18  ;;  %v4686_v4 = vpack.c.bf16 %v3243_v49, %v3242_v24  ;;  %v3262_v15 = vld [vmem:[%s8227_s3 + $0x7e0] sm:$0xff]  ;;  %v3216_v6 = vld [vmem:[%s8227_s3 + $0x670] sm:$0xff]  ;;  %v3217_v53 = vld [vmem:[%s8227_s3 + $0x678] sm:$0xff] }
 0x3ca   : > { %4677 = vmatprep.subr.bf16.mxu1 %v4676_v0  ;;  %5144 = vrcp.f32 %v2865_v9  ;;  %v2881_v27 = vadd.f32 1.0, %v5133_v62  ;;  %v4660_v3 = vpack.c.bf16 %v3231_v63, %v3230_v35  ;;  %v1865_v26 = vmul.f32 0.70710677, %v8588_v36  ;;  %v3247_v31 = vld [vmem:[%s8227_s3 + $0x768] sm:$0xff]  ;;  %v8592_v51 = vld [vmem:[#allocation19_spill] sm:$0xff]  ;;  %v3265_v32 = vld [vmem:[%s8227_s3 + $0x7f8] sm:$0xff] }
 0x3cb   : > { %5146 = vrcp.f32 %v2880_v34  ;;  %v2687_v22 = vadd.f32 %v7837_v47, %v7298_v55  ;;  %v4688_v33 = vpack.c.bf16 %v3261_v21, %v3260_v40  ;;  %v1880_v54 = vmul.f32 0.70710677, %v8589_v17  ;;  %v3263_v47 = vld [vmem:[%s8227_s3 + $0x7e8] sm:$0xff]  ;;  %v3264_v59 = vld [vmem:[%s8227_s3 + $0x7f0] sm:$0xff]  ;;  %v3249_v21 = vld [vmem:[%s8227_s3 + $0x778] sm:$0xff] }
 0x3cc   : > { %4651 = vmatpush3.bf16.msra.mxu0 %v4650_v10  ;;  %5148 = vrcp.f32 %v2881_v27  ;;  %v2689_v1 = vadd.f32 %v7857_v2, %v7298_v55  ;;  %v4662_v11 = vpack.c.bf16 %v3215_v28, %v3214_v37  ;;  %v4690_v41 = vpack.c.bf16 %v3245_v43, %v3244_v60  ;;  %v3248_v40 = vld [vmem:[%s8227_s3 + $0x770] sm:$0xff]  ;;  %v8595_v43 = vld [vmem:[#allocation8_spill] sm:$0xff] }
 0x3cd   : > { %4679 = vmatpush3.bf16.msra.mxu1 %v4678_v50  ;;  %4653 = vmatprep.subr.bf16.mxu0 %v4652_v61  ;;  %v2736_v10 = vadd.f32 %v7882_v39, %v7255_v18  ;;  %v4664_v29 = vpack.c.bf16 %v3233_v44, %v3232_v23  ;;  %v8590_v61 = vld [vmem:[#allocation10_spill] sm:$0xff]  ;;  %v4692_v13 = vpack.c.bf16 %v3263_v47, %v3262_v15  ;;  %v8597_v36 = vld [vmem:[#allocation7_spill] sm:$0xff] }
 0x3ce   : > { %4681 = vmatprep.subr.bf16.mxu1 %v4680_v42  ;;  %v5135_v30 = vpop.eup %5134  ;;  %v2738_v25 = vadd.f32 %v8590_v61, %v7255_v18  ;;  %v8591_v42 = vld [vmem:[#allocation30_spill] sm:$0xff]  ;;  %v3246_v18 = vld [vmem:[%s8227_s3 + $0x760] sm:$0xff]  ;;  %v2742_v27 = vadd.f32 %v8592_v51, %v7298_v55  ;;  %v4696_v37 = vpack.c.bf16 %v3265_v32, %v3264_v59  ;;  %v4698_v28 = vpack.c.bf16 %v3249_v21, %v3248_v40 }
 0x3cf   : > { %v5137_v8 = vpop.eup %5136  ;;  %v2958_v0 = vmul.f32 %v5135_v30, %v2683_v7  ;;  %v2740_v5 = vadd.f32 %v8591_v42, %v7298_v55  ;;  %v4694_v55 = vpack.c.bf16 %v3247_v31, %v3246_v18  ;;  %v8594_v7 = vld [vmem:[#allocation44_spill] sm:$0xff] }
 0x3d0   : > { %4655 = vmatpush3.bf16.msra.mxu0 %v4654_v19  ;;  %v5139_v52 = vpop.eup %5138  ;;  %v2959_v16 = vmul.f32 %v5137_v8, %v2685_v38  ;;  %v8593_v19 = vld [vmem:[#allocation9_spill] sm:$0xff]  ;;  %v8596_v30 = vld [vmem:[#allocation32_spill] sm:$0xff] }
 0x3d1   : > { %4683 = vmatpush3.bf16.msra.mxu1 %v4682_v14  ;;  %4657 = vmatprep.subr.bf16.mxu0 %v4656_v58  ;;  %v5141_v56 = vpop.eup %5140  ;;  %v2990_v57 = vadd.f32 %v2958_v0, %v1864_v20  ;;  %v2974_v50 = vmul.f32 %v5139_v52, %v2687_v22  ;;  %v1867_v14 = vmul.f32 0.70710677, %v8593_v19  ;;  %v1866_v20 = vmul.f32 0.70710677, %v8595_v43 }
 0x3d2   : > { %4685 = vmatprep.subr.bf16.mxu1 %v4684_v45  ;;  %v2991_v48 = vadd.f32 %v2959_v16, %v1865_v26  ;;  %v2975_v39 = vmul.f32 %v5141_v56, %v2689_v1  ;;  %v4666_v45 = vpack.c.bf16 %v3217_v53, %v3216_v6  ;;  %v1883_v38 = vmul.f32 0.70710677, %v8596_v30 }
 0x3d3   : > { %v5143_v2 = vpop.eup %5142  ;;  %v3006_v62 = vadd.f32 %v2974_v50, %v1880_v54  ;;  %v1882_v26 = vmul.f32 0.70710677, %v8597_v36 }
 0x3d4   : > { %4659 = vmatpush3.bf16.msra.mxu0 %v4658_v46  ;;  %v5145_v9 = vpop.eup %5144  ;;  %v2960_v34 = vmul.f32 %v5143_v2, %v2736_v10  ;;  %3780 = vmatprep.mubr.f32.mxu0 %v2991_v48  ;;  %v1881_v46 = vmul.f32 0.70710677, %v8594_v7 }
 0x3d5   : > { %4687 = vmatpush3.bf16.msra.mxu1 %v4686_v4  ;;  %4661 = vmatprep.subr.bf16.mxu0 %v4660_v3  ;;  %v5147_v12 = vpop.eup %5146  ;;  %v2961_v58 = vmul.f32 %v5145_v9, %v2738_v25 }
 0x3d6   : > { %4689 = vmatprep.subr.bf16.mxu1 %v4688_v33  ;;  %v5149_v24 = vpop.eup %5148  ;;  %v2976_v49 = vmul.f32 %v5147_v12, %v2740_v5  ;;  %v3007_v60 = vadd.f32 %v2975_v39, %v1881_v46  ;;  %v2992_v4 = vadd.f32 %v2960_v34, %v1866_v20 }
 0x3d7   : > { %v2993_v35 = vadd.f32 %v2961_v58, %v1867_v14  ;;  %v2977_v63 = vmul.f32 %v5149_v24, %v2742_v27 }
 0x3d8   : > { %4663 = vmatpush3.bf16.msra.mxu0 %v4662_v11  ;;  %v3008_v23 = vadd.f32 %v2976_v49, %v1882_v26 }
 0x3d9   : > { %4691 = vmatpush3.bf16.msra.mxu1 %v4690_v41  ;;  %4665 = vmatprep.subr.bf16.mxu0 %v4664_v29  ;;  %v3009_v3 = vadd.f32 %v2977_v63, %v1883_v38 }
 0x3da   : > { %4693 = vmatprep.subr.bf16.mxu1 %v4692_v13  ;;  %3855 = vmatprep.mubr.f32.mxu1 %v2993_v35 }
 0x3dc   : > { %4667 = vmatpush3.bf16.msra.mxu0 %v4666_v45 }
 0x3dd   : > { %4695 = vmatpush3.bf16.msra.mxu1 %v4694_v55 }
 0x3de   : > { %4697 = vmatprep.subr.bf16.mxu1 %v4696_v37 }
 0x3df   : > { %3781 = vmatmul.mubr.f32.vlgmr.msra.gmra.mrb[76].mxu0 %v2990_v57 }
 0x3e0   : > { %3785 = vmatprep.mubr.f32.mxu0 %v3007_v60 }
 0x3e1   : > { %4699 = vmatpush3.bf16.msra.mxu1 %v4698_v28 }
 0x3e3   : > { %3786 = vmatmul.mubr.f32.gmra.mrb[78].mxu0 %v3006_v62 }
 0x3e4   : > { %3856 = vmatmul.mubr.f32.vlgmr.msra.gmra.mrb[76].mxu1 %v2992_v4 }
 0x3e5   : > { %3860 = vmatprep.mubr.f32.mxu1 %v3009_v3 }
 0x3e8   : > { %3861 = vmatmul.mubr.f32.gmra.mrb[78].mxu1 %v3008_v23 }
 0x44f   : > { %v4172_v44 = vpop.f32.mrb[64].mxu0 }
 0x450   : > { %v4173_v8 = vpop.f32.mrb[65].mxu0 }
 0x451   : > { %v4174_v22 = vadd.f32 %v4173_v8, %v4172_v44 }
 0x453   : > { %v4175_v33 = vpop.f32.mrb[66].mxu0 }
 0x454   : > { %v4176_v0 = vpop.f32.mrb[67].mxu0 }
 0x455   : > { %v4210_v17 = vpop.f32.mrb[64].mxu1  ;;  %v4177_v54 = vadd.f32 %v4176_v0, %v4175_v33 }
 0x456   : > { %v4211_v52 = vpop.f32.mrb[65].mxu1 }
 0x457   : > { %v4212_v1 = vadd.f32 %v4211_v52, %v4210_v17 }
 0x459   : > { %v3408_v11 = vadd.f32 %v4212_v1, %v4174_v22  ;;  %v4213_v16 = vpop.f32.mrb[66].mxu1 }
 0x45a   : > { %v4214_v41 = vpop.f32.mrb[67].mxu1 }
 0x45b   : > { %v4215_v15 = vadd.f32 %v4214_v41, %v4213_v16 }
 0x45d   : > { %v3413_v47 = vadd.f32 %v4215_v15, %v4177_v54 }
 0x46f   : > { %v4248_v56 = vpop.f32.mrb[68].mxu0 }
 0x470   : > { %v4249_v10 = vpop.f32.mrb[69].mxu0 }
 0x471   : > { %v4250_v29 = vadd.f32 %v4249_v10, %v4248_v56 }
 0x473   : > { %v3483_v57 = vadd.f32 %v4250_v29, %v3408_v11  ;;  %v4251_v50 = vpop.f32.mrb[70].mxu0 }
 0x474   : > { %v4252_v2 = vpop.f32.mrb[71].mxu0 }
 0x475   : > { %v4286_v61 = vpop.f32.mrb[68].mxu1  ;;  %v4253_v25 = vadd.f32 %v4252_v2, %v4251_v50 }
 0x476   : > { %v4287_v48 = vpop.f32.mrb[69].mxu1 }
 0x477   : > { %v4288_v6 = vadd.f32 %v4287_v48, %v4286_v61  ;;  %v3488_v53 = vadd.f32 %v4253_v25, %v3413_v47 }
 0x479   : > { %v3558_v39 = vadd.f32 %v4288_v6, %v3483_v57  ;;  %v4289_v9 = vpop.f32.mrb[70].mxu1 }
 0x47a   : > { %v4290_v42 = vpop.f32.mrb[71].mxu1 }
 0x47b   : > { %v4291_v5 = vadd.f32 %v4290_v42, %v4289_v9 }
 0x47d   : > { %v3563_v13 = vadd.f32 %v4291_v5, %v3488_v53 }
 0x492   : > { %v4324_v18 = vpop.f32.mrb[72].mxu0 }
 0x493   : > { %v4325_v31 = vpop.f32.mrb[73].mxu0 }
 0x494   : > { %v4326_v62 = vadd.f32 %v4325_v31, %v4324_v18 }
 0x496   : > { %v3633_v34 = vadd.f32 %v4326_v62, %v3558_v39  ;;  %v4327_v12 = vpop.f32.mrb[74].mxu0 }
 0x497   : > { %v4328_v51 = vpop.f32.mrb[75].mxu0  ;;  %v4362_v27 = vpop.f32.mrb[72].mxu1 }
 0x498   : > { %v4329_v19 = vadd.f32 %v4328_v51, %v4327_v12  ;;  %v4363_v14 = vpop.f32.mrb[73].mxu1 }
 0x499   : > { %v4364_v58 = vadd.f32 %v4363_v14, %v4362_v27 }
 0x49a   : > { %v3638_v59 = vadd.f32 %v4329_v19, %v3563_v13 }
 0x49b   : > { %v3708_v32 = vadd.f32 %v4364_v58, %v3633_v34  ;;  %v4365_v24 = vpop.f32.mrb[74].mxu1 }
 0x49c   : > { %v4366_v45 = vpop.f32.mrb[75].mxu1 }
 0x49d   : > { %v4367_v49 = vadd.f32 %v4366_v45, %v4365_v24 }
 0x49f   : > { %v3713_v35 = vadd.f32 %v4367_v49, %v3638_v59 }
 0x4b2   : > { %v4400_v55 = vpop.f32.mrb[76].mxu0 }
 0x4b3   : > { %v4401_v63 = vpop.f32.mrb[77].mxu0 }
 0x4b4   : > { %v4402_v37 = vadd.f32 %v4401_v63, %v4400_v55 }
 0x4b6   : > { %v3783_v40 = vadd.f32 %v4402_v37, %v3708_v32  ;;  %v4403_v21 = vpop.f32.mrb[78].mxu0 }
 0x4b7   : > { %v4404_v7 = vpop.f32.mrb[79].mxu0  ;;  %v4438_v46 = vpop.f32.mrb[76].mxu1 }
 0x4b8   : > { %v4405_v28 = vadd.f32 %v4404_v7, %v4403_v21  ;;  %v4439_v60 = vpop.f32.mrb[77].mxu1 }
 0x4b9   : > { %v4440_v43 = vadd.f32 %v4439_v60, %v4438_v46 }
 0x4ba   : > { %v3788_v20 = vadd.f32 %v4405_v28, %v3713_v35 }
 0x4bb   : > { %v3858_v30 = vadd.f32 %v4440_v43, %v3783_v40  ;;  %v4441_v38 = vpop.f32.mrb[78].mxu1  ;;  %3874 = sbr.rel (!%p5233_p5) target bundleno = 1226 (0x4ca), region = 63 }
 0x4bc   : > { %v4442_v4 = vpop.f32.mrb[79].mxu1 }
 0x4bd   : > { %3866 = vst [vmem:[%s241_s7] sm:$0xff] %v3858_v30  ;;  %v4443_v3 = vadd.f32 %v4442_v4, %v4441_v38 }
 0x4bf   : > { %v3863_v36 = vadd.f32 %v4443_v3, %v3788_v20 }
 0x4c1   : > { %3867 = vst [vmem:[%s241_s7 + $0x8] sm:$0xff] %v3863_v36 }
 0x4c4   : > { %v3906_v26 = vld [vmem:[%s241_s7] sm:$0xff] }
 0x4c5   : > { %3907 = vst [vmem:[%s3876_s10] sm:$0xff] %v3906_v26 }
 0x4c8   : > { %v3908_v23 = vld [vmem:[%s241_s7 + $0x8] sm:$0xff] }
 0x4c9   : > { %3909 = vst [vmem:[%s3876_s10 + $0x10] sm:$0xff] %v3908_v23 }
 0x4ca PF: > { %p11_p10 = scmp.ge.s32.totalorder %s5220_s19, 4   ;;  %s8598_s15 = smov %s5168_s16 }
 0x4cb   : > { %s8599_s16 = smov %s5231_s22  ;;  %s8600_s17 = smov %s5220_s19 }
 0x4cc   :  { %13 = sbr.rel (!%p11_p10) target bundleno = 2 (0x2), region = 134 }

</bundles_post_ra>
